<compile_context>
chip_gen: v7x
topology: tpu7x:2x2x1
jax: 0.10.0
libtpu: 0.0.40
codegen_flags: <defaults>
</compile_context>

<pallas_src>
import functools

import jax
import jax.numpy as jnp
from jax.experimental import pallas as pl
from jax.experimental.pallas import tpu as pltpu

EPS = 1e-5
LANE = 128


def _round_up(x, m):
    return ((x + m - 1) // m) * m


def _vmem_limit_bytes():
    # Raise the scoped-VMEM ceiling above the 16/32 MiB defaults but keep ample
    # headroom (128 MiB physical on v5e/v6e, 64 MiB per TensorCore on v7x).
    try:
        cap = int(pltpu.get_tpu_info().vmem_capacity_bytes)
    except Exception:
        cap = 64 * 1024 * 1024
    return max(32 * 1024 * 1024, min(cap // 2, 64 * 1024 * 1024))


# ----------------------------------------------------------------------------- kernel helpers
def _zero_halo(scr_ref):
    """Zero only the 1-px halo ring of the (H+2, W+2, Cp) VMEM scratch."""
    hp, wp, cp = scr_ref.shape
    zrow = jnp.zeros((wp, cp), scr_ref.dtype)
    scr_ref[0, :, :] = zrow
    scr_ref[hp - 1, :, :] = zrow
    zcol = jnp.zeros((hp - 2, 1, cp), scr_ref.dtype)
    scr_ref[1:hp - 1, 0:1, :] = zcol
    scr_ref[1:hp - 1, wp - 1:wp, :] = zcol


def _conv3x3_from_scratch(scr_ref, w_ref, h, w, cp):
    """3x3 conv as 9 accumulated K=Cp MXU matmuls; returns f32 (h*w, cp)."""
    acc = None
    for dy in range(3):
        for dx in range(3):
            tap = scr_ref[dy:dy + h, dx:dx + w, :].reshape(h * w, cp)
            part = jnp.dot(tap, w_ref[dy * 3 + dx],
                           preferred_element_type=jnp.float32)
            acc = part if acc is None else acc + part
    return acc


def _tile_stats(acc, hw):
    """Centered per-tile BN partials: [sum, sum((x - tile_mean)^2)], shape (2, cp)."""
    s = jnp.sum(acc, axis=0, keepdims=True)            # (1, cp)
    m = s * (1.0 / hw)
    d = acc - m
    css = jnp.sum(d * d, axis=0, keepdims=True)        # (1, cp)
    return jnp.concatenate([s, css], axis=0)           # (2, cp)


# ----------------------------------------------------------------------------- kernels
def _conv1_stats_kernel(x_ref, w_ref, y_ref, st_ref, scr_ref):
    # x_ref : (1, H, W, Cp)   unpadded input tile (one image)
    # w_ref : (9, Cp, Cp)     tap-major conv1 weights (constant index_map)
    # y_ref : (1, H, W, Cp)   conv1 output (pre-BN)
    # st_ref: (1, 2, Cp)      per-tile centered BN1 partials
    # scr_ref: (H+2, W+2, Cp) VMEM halo scratch
    _, h, w, cp = x_ref.shape
    _zero_halo(scr_ref)
    scr_ref[1:h + 1, 1:w + 1, :] = x_ref[0]
    acc = _conv3x3_from_scratch(scr_ref, w_ref, h, w, cp)
    y_ref[...] = acc.reshape(1, h, w, cp).astype(y_ref.dtype)
    st_ref[...] = _tile_stats(acc, h * w).reshape(1, 2, cp)


def _bn_relu_conv2_stats_kernel(y1_ref, sc_ref, sh_ref, w_ref, y_ref, st_ref, scr_ref):
    # y1_ref: (1, H, W, Cp)   conv1 output tile (pre-BN)
    # sc/sh : (1, Cp)         fused BN1 scale / shift (f32)
    # w_ref : (9, Cp, Cp)     tap-major conv2 weights
    _, h, w, cp = y1_ref.shape
    _zero_halo(scr_ref)
    a = jnp.maximum(y1_ref[0].astype(jnp.float32) * sc_ref[...] + sh_ref[...], 0.0)
    scr_ref[1:h + 1, 1:w + 1, :] = a.astype(scr_ref.dtype)     # halo stays zero
    acc = _conv3x3_from_scratch(scr_ref, w_ref, h, w, cp)
    y_ref[...] = acc.reshape(1, h, w, cp).astype(y_ref.dtype)
    st_ref[...] = _tile_stats(acc, h * w).reshape(1, 2, cp)


def _bn_add_relu_kernel(y2_ref, x_ref, sc_ref, sh_ref, o_ref):
    # Fused epilogue: bn2 affine + identity residual + relu.  One store per tile.
    y = y2_ref[...].astype(jnp.float32)
    r = x_ref[...].astype(jnp.float32)
    o_ref[...] = jnp.maximum(y * sc_ref[...] + sh_ref[...] + r, 0.0
                             ).astype(o_ref.dtype)


# ----------------------------------------------------------------------------- wrapper
def _pack_conv_weight(w_oihw, cp):
    """OIHW (Cout, Cin, 3, 3) -> (9, cp, cp), tap-major, zero channel pad."""
    co, ci, kh, kw = w_oihw.shape
    wt = jnp.transpose(w_oihw, (2, 3, 1, 0))                    # (kh, kw, ci, co)
    wt = jnp.pad(wt, ((0, 0), (0, 0), (0, cp - ci), (0, cp - co)))
    return wt.reshape(kh * kw, cp, cp)


def _pad_vec(v, cp):
    return jnp.pad(v.astype(jnp.float32), (0, cp - v.shape[0]))


def _bn_scale_shift(stats, gamma_p, beta_p, per_tile_count):
    """Training-mode BN from centered per-tile partials (Chan parallel combine)."""
    s_t = stats[:, 0, :]                                        # (T, Cp)
    css_t = stats[:, 1, :]                                      # (T, Cp)
    n_tiles = stats.shape[0]
    total = per_tile_count * n_tiles
    m_t = s_t / per_tile_count
    mean = jnp.sum(s_t, axis=0) / total
    css = jnp.sum(css_t, axis=0) \
        + per_tile_count * jnp.sum((m_t - mean) ** 2, axis=0)
    var = jnp.maximum(css / total, 0.0)                         # biased batch var
    scale = gamma_p / jnp.sqrt(var + EPS)
    shift = beta_p - mean * scale
    return scale.reshape(1, -1), shift.reshape(1, -1)


@functools.partial(jax.jit, static_argnames=("compute_dtype",))
def basic_block(x_nchw, params, *, compute_dtype=jnp.bfloat16):
    """ResNet BasicBlock forward (stride=1, identity shortcut). NCHW in, NCHW out."""
    w1, g1, b1, w2, g2, b2 = params
    N, C, H, W = x_nchw.shape
    P = w1.shape[0]
    if C != P:
        # TODO(synk): stride>1 / downsample shortcut not implemented.
        raise NotImplementedError("BasicBlock kernel supports stride=1 / identity shortcut only")

    Cp = _round_up(C, LANE)                  # lane-dense channel axis

    # Boundary layout ops: NCHW -> NHWC + cast, channel pad to Cp.  No spatial pad
    # (the 1-px halo is built inside the kernels' VMEM scratch).
    x = jnp.transpose(x_nchw, (0, 2, 3, 1)).astype(compute_dtype)
    x = jnp.pad(x, ((0, 0), (0, 0), (0, 0), (0, Cp - C)))

    w1k = _pack_conv_weight(w1, Cp).astype(compute_dtype)
    w2k = _pack_conv_weight(w2, Cp).astype(compute_dtype)
    g1p, b1p = _pad_vec(g1, Cp), _pad_vec(b1, Cp)
    g2p, b2p = _pad_vec(g2, Cp), _pad_vec(b2, Cp)

    cparams = pltpu.CompilerParams(
        dimension_semantics=("parallel",),   # shard grid over v7x's two TensorCores
        vmem_limit_bytes=_vmem_limit_bytes())

    conv_out_shape = (
        jax.ShapeDtypeStruct((N, H, W, Cp), compute_dtype),
        jax.ShapeDtypeStruct((N, 2, Cp), jnp.float32),
    )
    act_spec = pl.BlockSpec((1, H, W, Cp), lambda n: (n, 0, 0, 0))
    wgt_spec = pl.BlockSpec((9, Cp, Cp), lambda n: (0, 0, 0))     # constant -> fetched once
    vec_spec = pl.BlockSpec((1, Cp), lambda n: (0, 0))
    conv_out_specs = (
        pl.BlockSpec((1, H, W, Cp), lambda n: (n, 0, 0, 0)),
        pl.BlockSpec((1, 2, Cp), lambda n: (n, 0, 0)),
    )
    halo_scratch = [pltpu.VMEM((H + 2, W + 2, Cp), compute_dtype)]

    # ---- pass 1: conv1 + BN1 centered partials (grid over batch, pipelined) ----
    y1, st1 = pl.pallas_call(
        _conv1_stats_kernel,
        grid=(N,),
        in_specs=[act_spec, wgt_spec],
        out_specs=conv_out_specs,
        out_shape=conv_out_shape,
        scratch_shapes=halo_scratch,
        compiler_params=cparams,
    )(x, w1k)

    scale1, shift1 = _bn_scale_shift(st1, g1p, b1p, H * W)

    # ---- pass 2: bn1 + relu + conv2 + BN2 centered partials (no y1 re-pad) ----
    y2, st2 = pl.pallas_call(
        _bn_relu_conv2_stats_kernel,
        grid=(N,),
        in_specs=[act_spec, vec_spec, vec_spec, wgt_spec],
        out_specs=conv_out_specs,
        out_shape=conv_out_shape,
        scratch_shapes=halo_scratch,
        compiler_params=cparams,
    )(y1, scale1, shift1, w2k)

    scale2, shift2 = _bn_scale_shift(st2, g2p, b2p, H * W)

    # ---- pass 3: bn2 + identity residual + relu (lane-dense, large row tiles) ----
    R = N * H * W
    RB = R if R <= 1024 else 1024
    out_flat = pl.pallas_call(
        _bn_add_relu_kernel,
        grid=(pl.cdiv(R, RB),),
        in_specs=[
            pl.BlockSpec((RB, Cp), lambda r: (r, 0)),
            pl.BlockSpec((RB, Cp), lambda r: (r, 0)),
            pl.BlockSpec((1, Cp), lambda r: (0, 0)),
            pl.BlockSpec((1, Cp), lambda r: (0, 0)),
        ],
        out_specs=pl.BlockSpec((RB, Cp), lambda r: (r, 0)),
        out_shape=jax.ShapeDtypeStruct((R, Cp), jnp.float32),
        compiler_params=cparams,
    )(y2.reshape(R, Cp), x.reshape(R, Cp), scale2, shift2)

    out = out_flat.reshape(N, H, W, Cp)[..., :C]
    return jnp.transpose(out, (0, 3, 1, 2))                      # back to NCHW


# ----------------------------------------------------------------------------- reference
def reference(x_nchw, params):
    """Pure-JAX reference mirroring the PyTorch forward (NCHW, training-mode BN)."""
    w1, g1, b1, w2, g2, b2 = params

    def conv(x, w):
        return jax.lax.conv_general_dilated(
            x, w, window_strides=(1, 1), padding=((1, 1), (1, 1)),
            dimension_numbers=("NCHW", "OIHW", "NCHW"))

    def bn(x, g, b):
        m = jnp.mean(x, axis=(0, 2, 3), keepdims=True)
        v = jnp.mean((x - m) ** 2, axis=(0, 2, 3), keepdims=True)
        return (x - m) / jnp.sqrt(v + EPS) * g.reshape(1, -1, 1, 1) \
            + b.reshape(1, -1, 1, 1)

    out = jax.nn.relu(bn(conv(x_nchw, w1), g1, b1))
    out = bn(conv(out, w2), g2, b2)
    return jax.nn.relu(out + x_nchw)


if __name__ == "__main__":
    # small shapes: batch=2, inplanes=planes=8, spatial=16x16
    N, C, H, W = 2, 8, 16, 16
    key = jax.random.PRNGKey(0)
    kx, kw1, kw2 = jax.random.split(key, 3)

    x = jax.random.normal(kx, (N, C, H, W), dtype=jnp.float32)
    w1 = 0.1 * jax.random.normal(kw1, (C, C, 3, 3), dtype=jnp.float32)
    w2 = 0.1 * jax.random.normal(kw2, (C, C, 3, 3), dtype=jnp.float32)
    g1 = jnp.ones((C,), jnp.float32)
    b1 = jnp.zeros((C,), jnp.float32)
    g2 = jnp.ones((C,), jnp.float32)
    b2 = jnp.zeros((C,), jnp.float32)
    params = (w1, g1, b1, w2, g2, b2)

    ref = jax.block_until_ready(reference(x, params))

    # f32 matmul-operand path: tight check against the f32 reference.
    out = jax.block_until_ready(basic_block(x, params, compute_dtype=jnp.float32))
    assert out.shape == (N, C, H, W)
    err = float(jnp.max(jnp.abs(out - ref)))
    assert jnp.allclose(out, ref, atol=5e-3, rtol=5e-3), \
        f"f32 path max abs err = {err}"

    # Default bf16 MXU-operand path (all generations): f32 accumulation + f32 BN math.
    out_bf16 = jax.block_until_ready(basic_block(x, params))
    err_bf16 = float(jnp.max(jnp.abs(out_bf16 - ref)))
    assert jnp.allclose(out_bf16, ref, atol=1e-1, rtol=1e-1), \
        f"bf16 path max abs err = {err_bf16}"

    print("KERNEL_OK")
</pallas_src>

<mosaic_0001>
module attributes {stable_mosaic.version = 11 : i64} {
  func.func @_conv1_stats_kernel(%arg0: i32, %arg1: memref<1x16x16x128xf32, #tpu.memory_space<vmem>>, %arg2: memref<9x128x128xf32, #tpu.memory_space<vmem>>, %arg3: memref<1x16x16x128xf32, #tpu.memory_space<vmem>>, %arg4: memref<1x2x128xf32, #tpu.memory_space<vmem>>, %arg5: memref<18x18x128xf32, #tpu.memory_space<vmem>>) attributes {dimension_semantics = [#tpu.dimension_semantics<parallel>], iteration_bounds = array<i64: 2>, scalar_prefetch = 0 : i64, scratch_operands = 1 : i64, tpu.core_type = #tpu.core_type<tc>, window_params = [{transform_indices = @transform_0, window_bounds = array<i64: 1, 16, 16, 128>}, {pipeline_mode = #tpu.pipeline_mode<synchronous>, transform_indices = @transform_1, window_bounds = array<i64: 9, 128, 128>}, {transform_indices = @transform_2, window_bounds = array<i64: 1, 16, 16, 128>}, {transform_indices = @transform_3, window_bounds = array<i64: 1, 2, 128>}]} {
    %cst = arith.constant 0.000000e+00 : f32
    %0 = vector.broadcast %cst : f32 to vector<18x128xf32>
    %c0 = arith.constant 0 : index
    %c0_0 = arith.constant 0 : index
    %c0_1 = arith.constant 0 : index
    %1 = vector.load %arg5[%c0, %c0_0, %c0_1] : memref<18x18x128xf32, #tpu.memory_space<vmem>>, vector<1x18x128xf32>
    %2 = vector.shape_cast %1 : vector<1x18x128xf32> to vector<18x128xf32>
    %3 = vector.shape_cast %0 : vector<18x128xf32> to vector<1x18x128xf32>
    tpu.vector_store %arg5[%c0, %c0_0, %c0_1], %3 {strides = array<i32>} : memref<18x18x128xf32, #tpu.memory_space<vmem>>, vector<1x18x128xf32>,
    %c17 = arith.constant 17 : index
    %c0_2 = arith.constant 0 : index
    %c0_3 = arith.constant 0 : index
    %4 = vector.load %arg5[%c17, %c0_2, %c0_3] : memref<18x18x128xf32, #tpu.memory_space<vmem>>, vector<1x18x128xf32>
    %5 = vector.shape_cast %4 : vector<1x18x128xf32> to vector<18x128xf32>
    %6 = vector.shape_cast %0 : vector<18x128xf32> to vector<1x18x128xf32>
    tpu.vector_store %arg5[%c17, %c0_2, %c0_3], %6 {strides = array<i32>} : memref<18x18x128xf32, #tpu.memory_space<vmem>>, vector<1x18x128xf32>,
    %cst_4 = arith.constant 0.000000e+00 : f32
    %7 = vector.broadcast %cst_4 : f32 to vector<16x1x128xf32>
    %c1 = arith.constant 1 : index
    %c0_5 = arith.constant 0 : index
    %c0_6 = arith.constant 0 : index
    %8 = vector.load %arg5[%c1, %c0_5, %c0_6] : memref<18x18x128xf32, #tpu.memory_space<vmem>>, vector<16x1x128xf32>
    tpu.vector_store %arg5[%c1, %c0_5, %c0_6], %7 {strides = array<i32>} : memref<18x18x128xf32, #tpu.memory_space<vmem>>, vector<16x1x128xf32>,
    %c1_7 = arith.constant 1 : index
    %c17_8 = arith.constant 17 : index
    %c0_9 = arith.constant 0 : index
    %9 = vector.load %arg5[%c1_7, %c17_8, %c0_9] : memref<18x18x128xf32, #tpu.memory_space<vmem>>, vector<16x1x128xf32>
    tpu.vector_store %arg5[%c1_7, %c17_8, %c0_9], %7 {strides = array<i32>} : memref<18x18x128xf32, #tpu.memory_space<vmem>>, vector<16x1x128xf32>,
    %c0_10 = arith.constant 0 : index
    %c0_11 = arith.constant 0 : index
    %c0_12 = arith.constant 0 : index
    %c0_13 = arith.constant 0 : index
    %10 = vector.load %arg1[%c0_10, %c0_11, %c0_12, %c0_13] : memref<1x16x16x128xf32, #tpu.memory_space<vmem>>, vector<1x16x16x128xf32>
    %11 = vector.shape_cast %10 : vector<1x16x16x128xf32> to vector<16x16x128xf32>
    %c1_14 = arith.constant 1 : index
    %c1_15 = arith.constant 1 : index
    %c0_16 = arith.constant 0 : index
    %12 = vector.load %arg5[%c1_14, %c1_15, %c0_16] : memref<18x18x128xf32, #tpu.memory_space<vmem>>, vector<16x16x128xf32>
    tpu.vector_store %arg5[%c1_14, %c1_15, %c0_16], %11 {strides = array<i32>} : memref<18x18x128xf32, #tpu.memory_space<vmem>>, vector<16x16x128xf32>,
    %c0_17 = arith.constant 0 : index
    %c0_18 = arith.constant 0 : index
    %c0_19 = arith.constant 0 : index
    %13 = vector.load %arg5[%c0_17, %c0_18, %c0_19] : memref<18x18x128xf32, #tpu.memory_space<vmem>>, vector<16x16x128xf32>
    %14 = vector.shape_cast %13 : vector<16x16x128xf32> to vector<256x128xf32>
    %c0_20 = arith.constant 0 : index
    %c0_21 = arith.constant 0 : index
    %c0_22 = arith.constant 0 : index
    %15 = vector.load %arg2[%c0_20, %c0_21, %c0_22] : memref<9x128x128xf32, #tpu.memory_space<vmem>>, vector<1x128x128xf32>
    %16 = vector.shape_cast %15 : vector<1x128x128xf32> to vector<128x128xf32>
    %cst_23 = arith.constant dense<0.000000e+00> : vector<256x128xf32>
    %17 = tpu.matmul %14, %16, %cst_23 {dimension_numbers = #tpu.dot_dimension_numbers<[1], [0], [0], [1], [0, 0, 1, 1], [], []>} : vector<256x128xf32>, vector<128x128xf32>, vector<256x128xf32> -> vector<256x128xf32>
    %c0_24 = arith.constant 0 : index
    %c1_25 = arith.constant 1 : index
    %c0_26 = arith.constant 0 : index
    %18 = vector.load %arg5[%c0_24, %c1_25, %c0_26] : memref<18x18x128xf32, #tpu.memory_space<vmem>>, vector<16x16x128xf32>
    %19 = vector.shape_cast %18 : vector<16x16x128xf32> to vector<256x128xf32>
    %c1_27 = arith.constant 1 : index
    %c0_28 = arith.constant 0 : index
    %c0_29 = arith.constant 0 : index
    %20 = vector.load %arg2[%c1_27, %c0_28, %c0_29] : memref<9x128x128xf32, #tpu.memory_space<vmem>>, vector<1x128x128xf32>
    %21 = vector.shape_cast %20 : vector<1x128x128xf32> to vector<128x128xf32>
    %cst_30 = arith.constant dense<0.000000e+00> : vector<256x128xf32>
    %22 = tpu.matmul %19, %21, %cst_30 {dimension_numbers = #tpu.dot_dimension_numbers<[1], [0], [0], [1], [0, 0, 1, 1], [], []>} : vector<256x128xf32>, vector<128x128xf32>, vector<256x128xf32> -> vector<256x128xf32>
    %23 = arith.addf %17, %22 : vector<256x128xf32>
    %c0_31 = arith.constant 0 : index
    %c2 = arith.constant 2 : index
    %c0_32 = arith.constant 0 : index
    %24 = vector.load %arg5[%c0_31, %c2, %c0_32] : memref<18x18x128xf32, #tpu.memory_space<vmem>>, vector<16x16x128xf32>
    %25 = vector.shape_cast %24 : vector<16x16x128xf32> to vector<256x128xf32>
    %c2_33 = arith.constant 2 : index
    %c0_34 = arith.constant 0 : index
    %c0_35 = arith.constant 0 : index
    %26 = vector.load %arg2[%c2_33, %c0_34, %c0_35] : memref<9x128x128xf32, #tpu.memory_space<vmem>>, vector<1x128x128xf32>
    %27 = vector.shape_cast %26 : vector<1x128x128xf32> to vector<128x128xf32>
    %cst_36 = arith.constant dense<0.000000e+00> : vector<256x128xf32>
    %28 = tpu.matmul %25, %27, %cst_36 {dimension_numbers = #tpu.dot_dimension_numbers<[1], [0], [0], [1], [0, 0, 1, 1], [], []>} : vector<256x128xf32>, vector<128x128xf32>, vector<256x128xf32> -> vector<256x128xf32>
    %29 = arith.addf %23, %28 : vector<256x128xf32>
    %c1_37 = arith.constant 1 : index
    %c0_38 = arith.constant 0 : index
    %c0_39 = arith.constant 0 : index
    %30 = vector.load %arg5[%c1_37, %c0_38, %c0_39] : memref<18x18x128xf32, #tpu.memory_space<vmem>>, vector<16x16x128xf32>
    %31 = vector.shape_cast %30 : vector<16x16x128xf32> to vector<256x128xf32>
    %c3 = arith.constant 3 : index
    %c0_40 = arith.constant 0 : index
    %c0_41 = arith.constant 0 : index
    %32 = vector.load %arg2[%c3, %c0_40, %c0_41] : memref<9x128x128xf32, #tpu.memory_space<vmem>>, vector<1x128x128xf32>
    %33 = vector.shape_cast %32 : vector<1x128x128xf32> to vector<128x128xf32>
    %cst_42 = arith.constant dense<0.000000e+00> : vector<256x128xf32>
    %34 = tpu.matmul %31, %33, %cst_42 {dimension_numbers = #tpu.dot_dimension_numbers<[1], [0], [0], [1], [0, 0, 1, 1], [], []>} : vector<256x128xf32>, vector<128x128xf32>, vector<256x128xf32> -> vector<256x128xf32>
    %35 = arith.addf %29, %34 : vector<256x128xf32>
    %c1_43 = arith.constant 1 : index
    %c1_44 = arith.constant 1 : index
    %c0_45 = arith.constant 0 : index
    %36 = vector.load %arg5[%c1_43, %c1_44, %c0_45] : memref<18x18x128xf32, #tpu.memory_space<vmem>>, vector<16x16x128xf32>
    %37 = vector.shape_cast %36 : vector<16x16x128xf32> to vector<256x128xf32>
    %c4 = arith.constant 4 : index
    %c0_46 = arith.constant 0 : index
    %c0_47 = arith.constant 0 : index
    %38 = vector.load %arg2[%c4, %c0_46, %c0_47] : memref<9x128x128xf32, #tpu.memory_space<vmem>>, vector<1x128x128xf32>
    %39 = vector.shape_cast %38 : vector<1x128x128xf32> to vector<128x128xf32>
    %cst_48 = arith.constant dense<0.000000e+00> : vector<256x128xf32>
    %40 = tpu.matmul %37, %39, %cst_48 {dimension_numbers = #tpu.dot_dimension_numbers<[1], [0], [0], [1], [0, 0, 1, 1], [], []>} : vector<256x128xf32>, vector<128x128xf32>, vector<256x128xf32> -> vector<256x128xf32>
    %41 = arith.addf %35, %40 : vector<256x128xf32>
    %c1_49 = arith.constant 1 : index
    %c2_50 = arith.constant 2 : index
    %c0_51 = arith.constant 0 : index
    %42 = vector.load %arg5[%c1_49, %c2_50, %c0_51] : memref<18x18x128xf32, #tpu.memory_space<vmem>>, vector<16x16x128xf32>
    %43 = vector.shape_cast %42 : vector<16x16x128xf32> to vector<256x128xf32>
    %c5 = arith.constant 5 : index
    %c0_52 = arith.constant 0 : index
    %c0_53 = arith.constant 0 : index
    %44 = vector.load %arg2[%c5, %c0_52, %c0_53] : memref<9x128x128xf32, #tpu.memory_space<vmem>>, vector<1x128x128xf32>
    %45 = vector.shape_cast %44 : vector<1x128x128xf32> to vector<128x128xf32>
    %cst_54 = arith.constant dense<0.000000e+00> : vector<256x128xf32>
    %46 = tpu.matmul %43, %45, %cst_54 {dimension_numbers = #tpu.dot_dimension_numbers<[1], [0], [0], [1], [0, 0, 1, 1], [], []>} : vector<256x128xf32>, vector<128x128xf32>, vector<256x128xf32> -> vector<256x128xf32>
    %47 = arith.addf %41, %46 : vector<256x128xf32>
    %c2_55 = arith.constant 2 : index
    %c0_56 = arith.constant 0 : index
    %c0_57 = arith.constant 0 : index
    %48 = vector.load %arg5[%c2_55, %c0_56, %c0_57] : memref<18x18x128xf32, #tpu.memory_space<vmem>>, vector<16x16x128xf32>
    %49 = vector.shape_cast %48 : vector<16x16x128xf32> to vector<256x128xf32>
    %c6 = arith.constant 6 : index
    %c0_58 = arith.constant 0 : index
    %c0_59 = arith.constant 0 : index
    %50 = vector.load %arg2[%c6, %c0_58, %c0_59] : memref<9x128x128xf32, #tpu.memory_space<vmem>>, vector<1x128x128xf32>
    %51 = vector.shape_cast %50 : vector<1x128x128xf32> to vector<128x128xf32>
    %cst_60 = arith.constant dense<0.000000e+00> : vector<256x128xf32>
    %52 = tpu.matmul %49, %51, %cst_60 {dimension_numbers = #tpu.dot_dimension_numbers<[1], [0], [0], [1], [0, 0, 1, 1], [], []>} : vector<256x128xf32>, vector<128x128xf32>, vector<256x128xf32> -> vector<256x128xf32>
    %53 = arith.addf %47, %52 : vector<256x128xf32>
    %c2_61 = arith.constant 2 : index
    %c1_62 = arith.constant 1 : index
    %c0_63 = arith.constant 0 : index
    %54 = vector.load %arg5[%c2_61, %c1_62, %c0_63] : memref<18x18x128xf32, #tpu.memory_space<vmem>>, vector<16x16x128xf32>
    %55 = vector.shape_cast %54 : vector<16x16x128xf32> to vector<256x128xf32>
    %c7 = arith.constant 7 : index
    %c0_64 = arith.constant 0 : index
    %c0_65 = arith.constant 0 : index
    %56 = vector.load %arg2[%c7, %c0_64, %c0_65] : memref<9x128x128xf32, #tpu.memory_space<vmem>>, vector<1x128x128xf32>
    %57 = vector.shape_cast %56 : vector<1x128x128xf32> to vector<128x128xf32>
    %cst_66 = arith.constant dense<0.000000e+00> : vector<256x128xf32>
    %58 = tpu.matmul %55, %57, %cst_66 {dimension_numbers = #tpu.dot_dimension_numbers<[1], [0], [0], [1], [0, 0, 1, 1], [], []>} : vector<256x128xf32>, vector<128x128xf32>, vector<256x128xf32> -> vector<256x128xf32>
    %59 = arith.addf %53, %58 : vector<256x128xf32>
    %c2_67 = arith.constant 2 : index
    %c2_68 = arith.constant 2 : index
    %c0_69 = arith.constant 0 : index
    %60 = vector.load %arg5[%c2_67, %c2_68, %c0_69] : memref<18x18x128xf32, #tpu.memory_space<vmem>>, vector<16x16x128xf32>
    %61 = vector.shape_cast %60 : vector<16x16x128xf32> to vector<256x128xf32>
    %c8 = arith.constant 8 : index
    %c0_70 = arith.constant 0 : index
    %c0_71 = arith.constant 0 : index
    %62 = vector.load %arg2[%c8, %c0_70, %c0_71] : memref<9x128x128xf32, #tpu.memory_space<vmem>>, vector<1x128x128xf32>
    %63 = vector.shape_cast %62 : vector<1x128x128xf32> to vector<128x128xf32>
    %cst_72 = arith.constant dense<0.000000e+00> : vector<256x128xf32>
    %64 = tpu.matmul %61, %63, %cst_72 {dimension_numbers = #tpu.dot_dimension_numbers<[1], [0], [0], [1], [0, 0, 1, 1], [], []>} : vector<256x128xf32>, vector<128x128xf32>, vector<256x128xf32> -> vector<256x128xf32>
    %65 = arith.addf %59, %64 : vector<256x128xf32>
    %66 = vector.shape_cast %65 : vector<256x128xf32> to vector<1x16x16x128xf32>
    %c0_73 = arith.constant 0 : index
    %c0_74 = arith.constant 0 : index
    %c0_75 = arith.constant 0 : index
    %c0_76 = arith.constant 0 : index
    %67 = vector.load %arg3[%c0_73, %c0_74, %c0_75, %c0_76] : memref<1x16x16x128xf32, #tpu.memory_space<vmem>>, vector<1x16x16x128xf32>
    tpu.vector_store %arg3[%c0_73, %c0_74, %c0_75, %c0_76], %66 {strides = array<i32>} : memref<1x16x16x128xf32, #tpu.memory_space<vmem>>, vector<1x16x16x128xf32>,
    %cst_77 = arith.constant dense<0.000000e+00> : vector<128xf32>
    %68 = vector.multi_reduction <add>, %65, %cst_77 [0] : vector<256x128xf32> to vector<128xf32>
    %69 = vector.shape_cast %68 : vector<128xf32> to vector<1x128xf32>
    %cst_78 = arith.constant 3.906250e-03 : f32
    %70 = vector.broadcast %cst_78 : f32 to vector<1x128xf32>
    %71 = arith.mulf %69, %70 : vector<1x128xf32>
    %72 = vector.broadcast %71 : vector<1x128xf32> to vector<256x128xf32>
    %73 = arith.subf %65, %72 : vector<256x128xf32>
    %74 = arith.mulf %73, %73 : vector<256x128xf32>
    %cst_79 = arith.constant dense<0.000000e+00> : vector<128xf32>
    %75 = vector.multi_reduction <add>, %74, %cst_79 [0] : vector<256x128xf32> to vector<128xf32>
    %76 = vector.shape_cast %75 : vector<128xf32> to vector<1x128xf32>
    %77 = tpu.concatenate %69, %76 in 0 : vector<1x128xf32>, vector<1x128xf32> -> vector<2x128xf32>
    %78 = vector.shape_cast %77 : vector<2x128xf32> to vector<1x2x128xf32>
    %c0_80 = arith.constant 0 : index
    %c0_81 = arith.constant 0 : index
    %c0_82 = arith.constant 0 : index
    %79 = vector.load %arg4[%c0_80, %c0_81, %c0_82] : memref<1x2x128xf32, #tpu.memory_space<vmem>>, vector<1x2x128xf32>
    tpu.vector_store %arg4[%c0_80, %c0_81, %c0_82], %78 {strides = array<i32>} : memref<1x2x128xf32, #tpu.memory_space<vmem>>, vector<1x2x128xf32>,
    return
  }
  func.func @transform_0(%arg0: i32) -> (i32, i32, i32, i32) {
    %c0_i32 = arith.constant 0 : i32
    %c0_i32_0 = arith.constant 0 : i32
    %c0_i32_1 = arith.constant 0 : i32
    %c0_i32_2 = arith.constant 0 : i32
    return %arg0, %c0_i32, %c0_i32_0, %c0_i32_1 : i32, i32, i32, i32
  }
  func.func @transform_1(%arg0: i32) -> (i32, i32, i32) {
    %c0_i32 = arith.constant 0 : i32
    %c0_i32_0 = arith.constant 0 : i32
    %c0_i32_1 = arith.constant 0 : i32
    %c0_i32_2 = arith.constant 0 : i32
    return %c0_i32, %c0_i32_0, %c0_i32_1 : i32, i32, i32
  }
  func.func @transform_2(%arg0: i32) -> (i32, i32, i32, i32) {
    %c0_i32 = arith.constant 0 : i32
    %c0_i32_0 = arith.constant 0 : i32
    %c0_i32_1 = arith.constant 0 : i32
    %c0_i32_2 = arith.constant 0 : i32
    return %arg0, %c0_i32, %c0_i32_0, %c0_i32_1 : i32, i32, i32, i32
  }
  func.func @transform_3(%arg0: i32) -> (i32, i32, i32) {
    %c0_i32 = arith.constant 0 : i32
    %c0_i32_0 = arith.constant 0 : i32
    %c0_i32_1 = arith.constant 0 : i32
    return %arg0, %c0_i32, %c0_i32_0 : i32, i32, i32
  }
}

module attributes {stable_mosaic.version = 11 : i64} {
  func.func @_bn_add_relu_kernel(%arg0: i32, %arg1: memref<512x128xf32, #tpu.memory_space<vmem>>, %arg2: memref<512x128xf32, #tpu.memory_space<vmem>>, %arg3: memref<1x128xf32, #tpu.memory_space<vmem>>, %arg4: memref<1x128xf32, #tpu.memory_space<vmem>>, %arg5: memref<512x128xf32, #tpu.memory_space<vmem>>) attributes {dimension_semantics = [#tpu.dimension_semantics<parallel>], iteration_bounds = array<i64: 1>, scalar_prefetch = 0 : i64, scratch_operands = 0 : i64, tpu.core_type = #tpu.core_type<tc>, window_params = [{transform_indices = @transform_0, window_bounds = array<i64: 512, 128>}, {transform_indices = @transform_1, window_bounds = array<i64: 512, 128>}, {pipeline_mode = #tpu.pipeline_mode<synchronous>, transform_indices = @transform_2, window_bounds = array<i64: 1, 128>}, {pipeline_mode = #tpu.pipeline_mode<synchronous>, transform_indices = @transform_3, window_bounds = array<i64: 1, 128>}, {transform_indices = @transform_4, window_bounds = array<i64: 512, 128>}]} {
    %c0 = arith.constant 0 : index
    %c0_0 = arith.constant 0 : index
    %0 = vector.load %arg1[%c0, %c0_0] : memref<512x128xf32, #tpu.memory_space<vmem>>, vector<512x128xf32>
    %c0_1 = arith.constant 0 : index
    %c0_2 = arith.constant 0 : index
    %1 = vector.load %arg2[%c0_1, %c0_2] : memref<512x128xf32, #tpu.memory_space<vmem>>, vector<512x128xf32>
    %c0_3 = arith.constant 0 : index
    %c0_4 = arith.constant 0 : index
    %2 = vector.load %arg3[%c0_3, %c0_4] : memref<1x128xf32, #tpu.memory_space<vmem>>, vector<1x128xf32>
    %3 = vector.broadcast %2 : vector<1x128xf32> to vector<512x128xf32>
    %4 = arith.mulf %0, %3 : vector<512x128xf32>
    %c0_5 = arith.constant 0 : index
    %c0_6 = arith.constant 0 : index
    %5 = vector.load %arg4[%c0_5, %c0_6] : memref<1x128xf32, #tpu.memory_space<vmem>>, vector<1x128xf32>
    %6 = vector.broadcast %5 : vector<1x128xf32> to vector<512x128xf32>
    %7 = arith.addf %4, %6 : vector<512x128xf32>
    %8 = arith.addf %7, %1 : vector<512x128xf32>
    %cst = arith.constant 0.000000e+00 : f32
    %9 = vector.broadcast %cst : f32 to vector<512x128xf32>
    %10 = arith.maximumf %8, %9 : vector<512x128xf32>
    %c0_7 = arith.constant 0 : index
    %c0_8 = arith.constant 0 : index
    %11 = vector.load %arg5[%c0_7, %c0_8] : memref<512x128xf32, #tpu.memory_space<vmem>>, vector<512x128xf32>
    tpu.vector_store %arg5[%c0_7, %c0_8], %10 {strides = array<i32>} : memref<512x128xf32, #tpu.memory_space<vmem>>, vector<512x128xf32>,
    return
  }
  func.func @transform_0(%arg0: i32) -> (i32, i32) {
    %c0_i32 = arith.constant 0 : i32
    %c0_i32_0 = arith.constant 0 : i32
    return %arg0, %c0_i32 : i32, i32
  }
  func.func @transform_1(%arg0: i32) -> (i32, i32) {
    %c0_i32 = arith.constant 0 : i32
    %c0_i32_0 = arith.constant 0 : i32
    return %arg0, %c0_i32 : i32, i32
  }
  func.func @transform_2(%arg0: i32) -> (i32, i32) {
    %c0_i32 = arith.constant 0 : i32
    %c0_i32_0 = arith.constant 0 : i32
    %c0_i32_1 = arith.constant 0 : i32
    return %c0_i32, %c0_i32_0 : i32, i32
  }
  func.func @transform_3(%arg0: i32) -> (i32, i32) {
    %c0_i32 = arith.constant 0 : i32
    %c0_i32_0 = arith.constant 0 : i32
    %c0_i32_1 = arith.constant 0 : i32
    return %c0_i32, %c0_i32_0 : i32, i32
  }
  func.func @transform_4(%arg0: i32) -> (i32, i32) {
    %c0_i32 = arith.constant 0 : i32
    %c0_i32_0 = arith.constant 0 : i32
    return %arg0, %c0_i32 : i32, i32
  }
}

module attributes {stable_mosaic.version = 11 : i64} {
  func.func @_bn_relu_conv2_stats_kernel(%arg0: i32, %arg1: memref<1x16x16x128xf32, #tpu.memory_space<vmem>>, %arg2: memref<1x128xf32, #tpu.memory_space<vmem>>, %arg3: memref<1x128xf32, #tpu.memory_space<vmem>>, %arg4: memref<9x128x128xf32, #tpu.memory_space<vmem>>, %arg5: memref<1x16x16x128xf32, #tpu.memory_space<vmem>>, %arg6: memref<1x2x128xf32, #tpu.memory_space<vmem>>, %arg7: memref<18x18x128xf32, #tpu.memory_space<vmem>>) attributes {dimension_semantics = [#tpu.dimension_semantics<parallel>], iteration_bounds = array<i64: 2>, scalar_prefetch = 0 : i64, scratch_operands = 1 : i64, tpu.core_type = #tpu.core_type<tc>, window_params = [{transform_indices = @transform_0, window_bounds = array<i64: 1, 16, 16, 128>}, {pipeline_mode = #tpu.pipeline_mode<synchronous>, transform_indices = @transform_1, window_bounds = array<i64: 1, 128>}, {pipeline_mode = #tpu.pipeline_mode<synchronous>, transform_indices = @transform_2, window_bounds = array<i64: 1, 128>}, {pipeline_mode = #tpu.pipeline_mode<synchronous>, transform_indices = @transform_3, window_bounds = array<i64: 9, 128, 128>}, {transform_indices = @transform_4, window_bounds = array<i64: 1, 16, 16, 128>}, {transform_indices = @transform_5, window_bounds = array<i64: 1, 2, 128>}]} {
    %cst = arith.constant 0.000000e+00 : f32
    %0 = vector.broadcast %cst : f32 to vector<18x128xf32>
    %c0 = arith.constant 0 : index
    %c0_0 = arith.constant 0 : index
    %c0_1 = arith.constant 0 : index
    %1 = vector.load %arg7[%c0, %c0_0, %c0_1] : memref<18x18x128xf32, #tpu.memory_space<vmem>>, vector<1x18x128xf32>
    %2 = vector.shape_cast %1 : vector<1x18x128xf32> to vector<18x128xf32>
    %3 = vector.shape_cast %0 : vector<18x128xf32> to vector<1x18x128xf32>
    tpu.vector_store %arg7[%c0, %c0_0, %c0_1], %3 {strides = array<i32>} : memref<18x18x128xf32, #tpu.memory_space<vmem>>, vector<1x18x128xf32>,
    %c17 = arith.constant 17 : index
    %c0_2 = arith.constant 0 : index
    %c0_3 = arith.constant 0 : index
    %4 = vector.load %arg7[%c17, %c0_2, %c0_3] : memref<18x18x128xf32, #tpu.memory_space<vmem>>, vector<1x18x128xf32>
    %5 = vector.shape_cast %4 : vector<1x18x128xf32> to vector<18x128xf32>
    %6 = vector.shape_cast %0 : vector<18x128xf32> to vector<1x18x128xf32>
    tpu.vector_store %arg7[%c17, %c0_2, %c0_3], %6 {strides = array<i32>} : memref<18x18x128xf32, #tpu.memory_space<vmem>>, vector<1x18x128xf32>,
    %cst_4 = arith.constant 0.000000e+00 : f32
    %7 = vector.broadcast %cst_4 : f32 to vector<16x1x128xf32>
    %c1 = arith.constant 1 : index
    %c0_5 = arith.constant 0 : index
    %c0_6 = arith.constant 0 : index
    %8 = vector.load %arg7[%c1, %c0_5, %c0_6] : memref<18x18x128xf32, #tpu.memory_space<vmem>>, vector<16x1x128xf32>
    tpu.vector_store %arg7[%c1, %c0_5, %c0_6], %7 {strides = array<i32>} : memref<18x18x128xf32, #tpu.memory_space<vmem>>, vector<16x1x128xf32>,
    %c1_7 = arith.constant 1 : index
    %c17_8 = arith.constant 17 : index
    %c0_9 = arith.constant 0 : index
    %9 = vector.load %arg7[%c1_7, %c17_8, %c0_9] : memref<18x18x128xf32, #tpu.memory_space<vmem>>, vector<16x1x128xf32>
    tpu.vector_store %arg7[%c1_7, %c17_8, %c0_9], %7 {strides = array<i32>} : memref<18x18x128xf32, #tpu.memory_space<vmem>>, vector<16x1x128xf32>,
    %c0_10 = arith.constant 0 : index
    %c0_11 = arith.constant 0 : index
    %c0_12 = arith.constant 0 : index
    %c0_13 = arith.constant 0 : index
    %10 = vector.load %arg1[%c0_10, %c0_11, %c0_12, %c0_13] : memref<1x16x16x128xf32, #tpu.memory_space<vmem>>, vector<1x16x16x128xf32>
    %11 = vector.shape_cast %10 : vector<1x16x16x128xf32> to vector<16x16x128xf32>
    %c0_14 = arith.constant 0 : index
    %c0_15 = arith.constant 0 : index
    %12 = vector.load %arg2[%c0_14, %c0_15] : memref<1x128xf32, #tpu.memory_space<vmem>>, vector<1x128xf32>
    %13 = vector.shape_cast %12 : vector<1x128xf32> to vector<1x1x128xf32>
    %14 = vector.broadcast %13 : vector<1x1x128xf32> to vector<16x16x128xf32>
    %15 = arith.mulf %11, %14 : vector<16x16x128xf32>
    %c0_16 = arith.constant 0 : index
    %c0_17 = arith.constant 0 : index
    %16 = vector.load %arg3[%c0_16, %c0_17] : memref<1x128xf32, #tpu.memory_space<vmem>>, vector<1x128xf32>
    %17 = vector.shape_cast %16 : vector<1x128xf32> to vector<1x1x128xf32>
    %18 = vector.broadcast %17 : vector<1x1x128xf32> to vector<16x16x128xf32>
    %19 = arith.addf %15, %18 : vector<16x16x128xf32>
    %cst_18 = arith.constant 0.000000e+00 : f32
    %20 = vector.broadcast %cst_18 : f32 to vector<16x16x128xf32>
    %21 = arith.maximumf %19, %20 : vector<16x16x128xf32>
    %c1_19 = arith.constant 1 : index
    %c1_20 = arith.constant 1 : index
    %c0_21 = arith.constant 0 : index
    %22 = vector.load %arg7[%c1_19, %c1_20, %c0_21] : memref<18x18x128xf32, #tpu.memory_space<vmem>>, vector<16x16x128xf32>
    tpu.vector_store %arg7[%c1_19, %c1_20, %c0_21], %21 {strides = array<i32>} : memref<18x18x128xf32, #tpu.memory_space<vmem>>, vector<16x16x128xf32>,
    %c0_22 = arith.constant 0 : index
    %c0_23 = arith.constant 0 : index
    %c0_24 = arith.constant 0 : index
    %23 = vector.load %arg7[%c0_22, %c0_23, %c0_24] : memref<18x18x128xf32, #tpu.memory_space<vmem>>, vector<16x16x128xf32>
    %24 = vector.shape_cast %23 : vector<16x16x128xf32> to vector<256x128xf32>
    %c0_25 = arith.constant 0 : index
    %c0_26 = arith.constant 0 : index
    %c0_27 = arith.constant 0 : index
    %25 = vector.load %arg4[%c0_25, %c0_26, %c0_27] : memref<9x128x128xf32, #tpu.memory_space<vmem>>, vector<1x128x128xf32>
    %26 = vector.shape_cast %25 : vector<1x128x128xf32> to vector<128x128xf32>
    %cst_28 = arith.constant dense<0.000000e+00> : vector<256x128xf32>
    %27 = tpu.matmul %24, %26, %cst_28 {dimension_numbers = #tpu.dot_dimension_numbers<[1], [0], [0], [1], [0, 0, 1, 1], [], []>} : vector<256x128xf32>, vector<128x128xf32>, vector<256x128xf32> -> vector<256x128xf32>
    %c0_29 = arith.constant 0 : index
    %c1_30 = arith.constant 1 : index
    %c0_31 = arith.constant 0 : index
    %28 = vector.load %arg7[%c0_29, %c1_30, %c0_31] : memref<18x18x128xf32, #tpu.memory_space<vmem>>, vector<16x16x128xf32>
    %29 = vector.shape_cast %28 : vector<16x16x128xf32> to vector<256x128xf32>
    %c1_32 = arith.constant 1 : index
    %c0_33 = arith.constant 0 : index
    %c0_34 = arith.constant 0 : index
    %30 = vector.load %arg4[%c1_32, %c0_33, %c0_34] : memref<9x128x128xf32, #tpu.memory_space<vmem>>, vector<1x128x128xf32>
    %31 = vector.shape_cast %30 : vector<1x128x128xf32> to vector<128x128xf32>
    %cst_35 = arith.constant dense<0.000000e+00> : vector<256x128xf32>
    %32 = tpu.matmul %29, %31, %cst_35 {dimension_numbers = #tpu.dot_dimension_numbers<[1], [0], [0], [1], [0, 0, 1, 1], [], []>} : vector<256x128xf32>, vector<128x128xf32>, vector<256x128xf32> -> vector<256x128xf32>
    %33 = arith.addf %27, %32 : vector<256x128xf32>
    %c0_36 = arith.constant 0 : index
    %c2 = arith.constant 2 : index
    %c0_37 = arith.constant 0 : index
    %34 = vector.load %arg7[%c0_36, %c2, %c0_37] : memref<18x18x128xf32, #tpu.memory_space<vmem>>, vector<16x16x128xf32>
    %35 = vector.shape_cast %34 : vector<16x16x128xf32> to vector<256x128xf32>
    %c2_38 = arith.constant 2 : index
    %c0_39 = arith.constant 0 : index
    %c0_40 = arith.constant 0 : index
    %36 = vector.load %arg4[%c2_38, %c0_39, %c0_40] : memref<9x128x128xf32, #tpu.memory_space<vmem>>, vector<1x128x128xf32>
    %37 = vector.shape_cast %36 : vector<1x128x128xf32> to vector<128x128xf32>
    %cst_41 = arith.constant dense<0.000000e+00> : vector<256x128xf32>
    %38 = tpu.matmul %35, %37, %cst_41 {dimension_numbers = #tpu.dot_dimension_numbers<[1], [0], [0], [1], [0, 0, 1, 1], [], []>} : vector<256x128xf32>, vector<128x128xf32>, vector<256x128xf32> -> vector<256x128xf32>
    %39 = arith.addf %33, %38 : vector<256x128xf32>
    %c1_42 = arith.constant 1 : index
    %c0_43 = arith.constant 0 : index
    %c0_44 = arith.constant 0 : index
    %40 = vector.load %arg7[%c1_42, %c0_43, %c0_44] : memref<18x18x128xf32, #tpu.memory_space<vmem>>, vector<16x16x128xf32>
    %41 = vector.shape_cast %40 : vector<16x16x128xf32> to vector<256x128xf32>
    %c3 = arith.constant 3 : index
    %c0_45 = arith.constant 0 : index
    %c0_46 = arith.constant 0 : index
    %42 = vector.load %arg4[%c3, %c0_45, %c0_46] : memref<9x128x128xf32, #tpu.memory_space<vmem>>, vector<1x128x128xf32>
    %43 = vector.shape_cast %42 : vector<1x128x128xf32> to vector<128x128xf32>
    %cst_47 = arith.constant dense<0.000000e+00> : vector<256x128xf32>
    %44 = tpu.matmul %41, %43, %cst_47 {dimension_numbers = #tpu.dot_dimension_numbers<[1], [0], [0], [1], [0, 0, 1, 1], [], []>} : vector<256x128xf32>, vector<128x128xf32>, vector<256x128xf32> -> vector<256x128xf32>
    %45 = arith.addf %39, %44 : vector<256x128xf32>
    %c1_48 = arith.constant 1 : index
    %c1_49 = arith.constant 1 : index
    %c0_50 = arith.constant 0 : index
    %46 = vector.load %arg7[%c1_48, %c1_49, %c0_50] : memref<18x18x128xf32, #tpu.memory_space<vmem>>, vector<16x16x128xf32>
    %47 = vector.shape_cast %46 : vector<16x16x128xf32> to vector<256x128xf32>
    %c4 = arith.constant 4 : index
    %c0_51 = arith.constant 0 : index
    %c0_52 = arith.constant 0 : index
    %48 = vector.load %arg4[%c4, %c0_51, %c0_52] : memref<9x128x128xf32, #tpu.memory_space<vmem>>, vector<1x128x128xf32>
    %49 = vector.shape_cast %48 : vector<1x128x128xf32> to vector<128x128xf32>
    %cst_53 = arith.constant dense<0.000000e+00> : vector<256x128xf32>
    %50 = tpu.matmul %47, %49, %cst_53 {dimension_numbers = #tpu.dot_dimension_numbers<[1], [0], [0], [1], [0, 0, 1, 1], [], []>} : vector<256x128xf32>, vector<128x128xf32>, vector<256x128xf32> -> vector<256x128xf32>
    %51 = arith.addf %45, %50 : vector<256x128xf32>
    %c1_54 = arith.constant 1 : index
    %c2_55 = arith.constant 2 : index
    %c0_56 = arith.constant 0 : index
    %52 = vector.load %arg7[%c1_54, %c2_55, %c0_56] : memref<18x18x128xf32, #tpu.memory_space<vmem>>, vector<16x16x128xf32>
    %53 = vector.shape_cast %52 : vector<16x16x128xf32> to vector<256x128xf32>
    %c5 = arith.constant 5 : index
    %c0_57 = arith.constant 0 : index
    %c0_58 = arith.constant 0 : index
    %54 = vector.load %arg4[%c5, %c0_57, %c0_58] : memref<9x128x128xf32, #tpu.memory_space<vmem>>, vector<1x128x128xf32>
    %55 = vector.shape_cast %54 : vector<1x128x128xf32> to vector<128x128xf32>
    %cst_59 = arith.constant dense<0.000000e+00> : vector<256x128xf32>
    %56 = tpu.matmul %53, %55, %cst_59 {dimension_numbers = #tpu.dot_dimension_numbers<[1], [0], [0], [1], [0, 0, 1, 1], [], []>} : vector<256x128xf32>, vector<128x128xf32>, vector<256x128xf32> -> vector<256x128xf32>
    %57 = arith.addf %51, %56 : vector<256x128xf32>
    %c2_60 = arith.constant 2 : index
    %c0_61 = arith.constant 0 : index
    %c0_62 = arith.constant 0 : index
    %58 = vector.load %arg7[%c2_60, %c0_61, %c0_62] : memref<18x18x128xf32, #tpu.memory_space<vmem>>, vector<16x16x128xf32>
    %59 = vector.shape_cast %58 : vector<16x16x128xf32> to vector<256x128xf32>
    %c6 = arith.constant 6 : index
    %c0_63 = arith.constant 0 : index
    %c0_64 = arith.constant 0 : index
    %60 = vector.load %arg4[%c6, %c0_63, %c0_64] : memref<9x128x128xf32, #tpu.memory_space<vmem>>, vector<1x128x128xf32>
    %61 = vector.shape_cast %60 : vector<1x128x128xf32> to vector<128x128xf32>
    %cst_65 = arith.constant dense<0.000000e+00> : vector<256x128xf32>
    %62 = tpu.matmul %59, %61, %cst_65 {dimension_numbers = #tpu.dot_dimension_numbers<[1], [0], [0], [1], [0, 0, 1, 1], [], []>} : vector<256x128xf32>, vector<128x128xf32>, vector<256x128xf32> -> vector<256x128xf32>
    %63 = arith.addf %57, %62 : vector<256x128xf32>
    %c2_66 = arith.constant 2 : index
    %c1_67 = arith.constant 1 : index
    %c0_68 = arith.constant 0 : index
    %64 = vector.load %arg7[%c2_66, %c1_67, %c0_68] : memref<18x18x128xf32, #tpu.memory_space<vmem>>, vector<16x16x128xf32>
    %65 = vector.shape_cast %64 : vector<16x16x128xf32> to vector<256x128xf32>
    %c7 = arith.constant 7 : index
    %c0_69 = arith.constant 0 : index
    %c0_70 = arith.constant 0 : index
    %66 = vector.load %arg4[%c7, %c0_69, %c0_70] : memref<9x128x128xf32, #tpu.memory_space<vmem>>, vector<1x128x128xf32>
    %67 = vector.shape_cast %66 : vector<1x128x128xf32> to vector<128x128xf32>
    %cst_71 = arith.constant dense<0.000000e+00> : vector<256x128xf32>
    %68 = tpu.matmul %65, %67, %cst_71 {dimension_numbers = #tpu.dot_dimension_numbers<[1], [0], [0], [1], [0, 0, 1, 1], [], []>} : vector<256x128xf32>, vector<128x128xf32>, vector<256x128xf32> -> vector<256x128xf32>
    %69 = arith.addf %63, %68 : vector<256x128xf32>
    %c2_72 = arith.constant 2 : index
    %c2_73 = arith.constant 2 : index
    %c0_74 = arith.constant 0 : index
    %70 = vector.load %arg7[%c2_72, %c2_73, %c0_74] : memref<18x18x128xf32, #tpu.memory_space<vmem>>, vector<16x16x128xf32>
    %71 = vector.shape_cast %70 : vector<16x16x128xf32> to vector<256x128xf32>
    %c8 = arith.constant 8 : index
    %c0_75 = arith.constant 0 : index
    %c0_76 = arith.constant 0 : index
    %72 = vector.load %arg4[%c8, %c0_75, %c0_76] : memref<9x128x128xf32, #tpu.memory_space<vmem>>, vector<1x128x128xf32>
    %73 = vector.shape_cast %72 : vector<1x128x128xf32> to vector<128x128xf32>
    %cst_77 = arith.constant dense<0.000000e+00> : vector<256x128xf32>
    %74 = tpu.matmul %71, %73, %cst_77 {dimension_numbers = #tpu.dot_dimension_numbers<[1], [0], [0], [1], [0, 0, 1, 1], [], []>} : vector<256x128xf32>, vector<128x128xf32>, vector<256x128xf32> -> vector<256x128xf32>
    %75 = arith.addf %69, %74 : vector<256x128xf32>
    %76 = vector.shape_cast %75 : vector<256x128xf32> to vector<1x16x16x128xf32>
    %c0_78 = arith.constant 0 : index
    %c0_79 = arith.constant 0 : index
    %c0_80 = arith.constant 0 : index
    %c0_81 = arith.constant 0 : index
    %77 = vector.load %arg5[%c0_78, %c0_79, %c0_80, %c0_81] : memref<1x16x16x128xf32, #tpu.memory_space<vmem>>, vector<1x16x16x128xf32>
    tpu.vector_store %arg5[%c0_78, %c0_79, %c0_80, %c0_81], %76 {strides = array<i32>} : memref<1x16x16x128xf32, #tpu.memory_space<vmem>>, vector<1x16x16x128xf32>,
    %cst_82 = arith.constant dense<0.000000e+00> : vector<128xf32>
    %78 = vector.multi_reduction <add>, %75, %cst_82 [0] : vector<256x128xf32> to vector<128xf32>
    %79 = vector.shape_cast %78 : vector<128xf32> to vector<1x128xf32>
    %cst_83 = arith.constant 3.906250e-03 : f32
    %80 = vector.broadcast %cst_83 : f32 to vector<1x128xf32>
    %81 = arith.mulf %79, %80 : vector<1x128xf32>
    %82 = vector.broadcast %81 : vector<1x128xf32> to vector<256x128xf32>
    %83 = arith.subf %75, %82 : vector<256x128xf32>
    %84 = arith.mulf %83, %83 : vector<256x128xf32>
    %cst_84 = arith.constant dense<0.000000e+00> : vector<128xf32>
    %85 = vector.multi_reduction <add>, %84, %cst_84 [0] : vector<256x128xf32> to vector<128xf32>
    %86 = vector.shape_cast %85 : vector<128xf32> to vector<1x128xf32>
    %87 = tpu.concatenate %79, %86 in 0 : vector<1x128xf32>, vector<1x128xf32> -> vector<2x128xf32>
    %88 = vector.shape_cast %87 : vector<2x128xf32> to vector<1x2x128xf32>
    %c0_85 = arith.constant 0 : index
    %c0_86 = arith.constant 0 : index
    %c0_87 = arith.constant 0 : index
    %89 = vector.load %arg6[%c0_85, %c0_86, %c0_87] : memref<1x2x128xf32, #tpu.memory_space<vmem>>, vector<1x2x128xf32>
    tpu.vector_store %arg6[%c0_85, %c0_86, %c0_87], %88 {strides = array<i32>} : memref<1x2x128xf32, #tpu.memory_space<vmem>>, vector<1x2x128xf32>,
    return
  }
  func.func @transform_0(%arg0: i32) -> (i32, i32, i32, i32) {
    %c0_i32 = arith.constant 0 : i32
    %c0_i32_0 = arith.constant 0 : i32
    %c0_i32_1 = arith.constant 0 : i32
    %c0_i32_2 = arith.constant 0 : i32
    return %arg0, %c0_i32, %c0_i32_0, %c0_i32_1 : i32, i32, i32, i32
  }
  func.func @transform_1(%arg0: i32) -> (i32, i32) {
    %c0_i32 = arith.constant 0 : i32
    %c0_i32_0 = arith.constant 0 : i32
    %c0_i32_1 = arith.constant 0 : i32
    return %c0_i32, %c0_i32_0 : i32, i32
  }
  func.func @transform_2(%arg0: i32) -> (i32, i32) {
    %c0_i32 = arith.constant 0 : i32
    %c0_i32_0 = arith.constant 0 : i32
    %c0_i32_1 = arith.constant 0 : i32
    return %c0_i32, %c0_i32_0 : i32, i32
  }
  func.func @transform_3(%arg0: i32) -> (i32, i32, i32) {
    %c0_i32 = arith.constant 0 : i32
    %c0_i32_0 = arith.constant 0 : i32
    %c0_i32_1 = arith.constant 0 : i32
    %c0_i32_2 = arith.constant 0 : i32
    return %c0_i32, %c0_i32_0, %c0_i32_1 : i32, i32, i32
  }
  func.func @transform_4(%arg0: i32) -> (i32, i32, i32, i32) {
    %c0_i32 = arith.constant 0 : i32
    %c0_i32_0 = arith.constant 0 : i32
    %c0_i32_1 = arith.constant 0 : i32
    %c0_i32_2 = arith.constant 0 : i32
    return %arg0, %c0_i32, %c0_i32_0, %c0_i32_1 : i32, i32, i32, i32
  }
  func.func @transform_5(%arg0: i32) -> (i32, i32, i32) {
    %c0_i32 = arith.constant 0 : i32
    %c0_i32_0 = arith.constant 0 : i32
    %c0_i32_1 = arith.constant 0 : i32
    return %arg0, %c0_i32, %c0_i32_0 : i32, i32, i32
  }
}

</mosaic_0001>

<bundles_post_ra>
// kernel: basic_block.5
= control target key start
LH: loop header
LB: loop body
LE: loop exit
PB: predicated region body
PF: predicated region fallthrough
CT: control target
= control target key end

     0   :  { %s1224_s0 = inlined_call_operand.vmem [shape: f32[512,128], index: 0, kind: input, shape index: {}]   ;;  %s1225_s1 = inlined_call_operand.vmem [shape: f32[512,128], index: 1, kind: input, shape index: {}]   ;;  %s1226_s2 = inlined_call_operand.vmem [shape: f32[1,128], index: 2, kind: input, shape index: {}]   ;;  %s1227_s3 = inlined_call_operand.vmem [shape: f32[1,128], index: 3, kind: input, shape index: {}]   ;;  %s1228_s4 = inlined_call_operand.vmem [shape: f32[512,128], index: 4, kind: output, shape index: {}]  }
   0x1   :  { %v17_v0 = vld [vmem:[%s1224_s0] sm:$0xff]  ;;  %v18_v4 = vld [vmem:[%s1224_s0 + $0x8] sm:$0xff]  ;;  %v19_v7 = vld [vmem:[%s1224_s0 + $0x10] sm:$0xff] }
   0x2   :  { %v516_v1 = vld [vmem:[%s1226_s2] ss:$0 sm:$0xff]  ;;  %v20_v8 = vld [vmem:[%s1224_s0 + $0x18] sm:$0xff]  ;;  %v82_v10 = vld [vmem:[%s1225_s1 + $0x8] sm:$0xff] }
   0x3   :  { %v152_v2 = vmul.f32 %v516_v1, %v17_v0  ;;  %v522_v3 = vld [vmem:[%s1227_s3] ss:$0 sm:$0xff]  ;;  %v153_v6 = vmul.f32 %v516_v1, %v18_v4  ;;  %v83_v11 = vld [vmem:[%s1225_s1 + $0x10] sm:$0xff]  ;;  %v154_v12 = vmul.f32 %v516_v1, %v19_v7  ;;  %v155_v13 = vmul.f32 %v516_v1, %v20_v8  ;;  %v84_v16 = vld [vmem:[%s1225_s1 + $0x18] sm:$0xff] }
   0x4   :  { %v81_v5 = vld [vmem:[%s1225_s1] sm:$0xff]  ;;  %v22_v18 = vld [vmem:[%s1224_s0 + $0x28] sm:$0xff]  ;;  %v23_v19 = vld [vmem:[%s1224_s0 + $0x30] sm:$0xff] }
   0x5   :  { %v223_v9 = vadd.f32 %v522_v3, %v152_v2  ;;  %v21_v14 = vld [vmem:[%s1224_s0 + $0x20] sm:$0xff]  ;;  %v224_v15 = vadd.f32 %v522_v3, %v153_v6  ;;  %v225_v21 = vadd.f32 %v522_v3, %v154_v12  ;;  %v226_v22 = vadd.f32 %v522_v3, %v155_v13  ;;  %v24_v25 = vld [vmem:[%s1224_s0 + $0x38] sm:$0xff]  ;;  %v86_v28 = vld [vmem:[%s1225_s1 + $0x28] sm:$0xff] }
   0x6   :  { %v156_v17 = vmul.f32 %v516_v1, %v21_v14  ;;  %v85_v23 = vld [vmem:[%s1225_s1 + $0x20] sm:$0xff]  ;;  %v157_v24 = vmul.f32 %v516_v1, %v22_v18  ;;  %v158_v29 = vmul.f32 %v516_v1, %v23_v19  ;;  %v159_v30 = vmul.f32 %v516_v1, %v24_v25  ;;  %v87_v36 = vld [vmem:[%s1225_s1 + $0x30] sm:$0xff]  ;;  %v88_v37 = vld [vmem:[%s1225_s1 + $0x38] sm:$0xff] }
   0x7   :  { %v287_v20 = vadd.f32 %v223_v9, %v81_v5  ;;  %v288_v26 = vadd.f32 %v224_v15, %v82_v10  ;;  %v25_v31 = vld [vmem:[%s1224_s0 + $0x40] sm:$0xff]  ;;  %v289_v33 = vadd.f32 %v225_v21, %v83_v11  ;;  %v290_v34 = vadd.f32 %v226_v22, %v84_v16  ;;  %v26_v38 = vld [vmem:[%s1224_s0 + $0x48] sm:$0xff]  ;;  %v27_v43 = vld [vmem:[%s1224_s0 + $0x50] sm:$0xff] }
   0x8   :  { %v227_v27 = vadd.f32 %v522_v3, %v156_v17  ;;  %v228_v35 = vadd.f32 %v522_v3, %v157_v24  ;;  %v229_v41 = vadd.f32 %v522_v3, %v158_v29  ;;  %v230_v42 = vadd.f32 %v522_v3, %v159_v30  ;;  %v28_v44 = vld [vmem:[%s1224_s0 + $0x58] sm:$0xff]  ;;  %v29_v49 = vld [vmem:[%s1224_s0 + $0x60] sm:$0xff]  ;;  %v30_v55 = vld [vmem:[%s1224_s0 + $0x68] sm:$0xff] }
   0x9   :  { %v351_v32 = vmax.f32 %v287_v20, 0.0  ;;  %v352_v39 = vmax.f32 %v288_v26, 0.0  ;;  %v353_v45 = vmax.f32 %v289_v33, 0.0  ;;  %v354_v46 = vmax.f32 %v290_v34, 0.0  ;;  %v89_v53 = vld [vmem:[%s1225_s1 + $0x40] sm:$0xff]  ;;  %v90_v58 = vld [vmem:[%s1225_s1 + $0x48] sm:$0xff] }
   0xa   :  { %v291_v40 = vadd.f32 %v227_v27, %v85_v23  ;;  %v292_v47 = vadd.f32 %v228_v35, %v86_v28  ;;  %v160_v48 = vmul.f32 %v516_v1, %v25_v31  ;;  %v293_v51 = vadd.f32 %v229_v41, %v87_v36  ;;  %v31_v61 = vld [vmem:[%s1224_s0 + $0x70] sm:$0xff]  ;;  %v32_v62 = vld [vmem:[%s1224_s0 + $0x78] sm:$0xff]  ;;  %v93_v10 = vld [vmem:[%s1225_s1 + $0x60] sm:$0xff] }
   0xb   :  { %415 = vst [vmem:[%s1228_s4] sm:$0xff] %v351_v32  ;;  %416 = vst [vmem:[%s1228_s4 + $0x8] sm:$0xff] %v352_v39  ;;  %v294_v52 = vadd.f32 %v230_v42, %v88_v37  ;;  %v161_v54 = vmul.f32 %v516_v1, %v26_v38  ;;  %v162_v59 = vmul.f32 %v516_v1, %v27_v43  ;;  %v91_v4 = vld [vmem:[%s1225_s1 + $0x50] sm:$0xff]  ;;  %v92_v5 = vld [vmem:[%s1225_s1 + $0x58] sm:$0xff] }
   0xc   :  { %v355_v50 = vmax.f32 %v291_v40, 0.0  ;;  %417 = vst [vmem:[%s1228_s4 + $0x10] sm:$0xff] %v353_v45  ;;  %418 = vst [vmem:[%s1228_s4 + $0x18] sm:$0xff] %v354_v46  ;;  %v356_v56 = vmax.f32 %v292_v47, 0.0  ;;  %v231_v57 = vadd.f32 %v522_v3, %v160_v48  ;;  %v163_v60 = vmul.f32 %v516_v1, %v28_v44  ;;  %v94_v14 = vld [vmem:[%s1225_s1 + $0x68] sm:$0xff]  ;;  %v33_v17 = vld [vmem:[%s1224_s0 + $0x80] sm:$0xff] }
   0xd   :  { %v357_v63 = vmax.f32 %v293_v51, 0.0  ;;  %v358_v0 = vmax.f32 %v294_v52, 0.0  ;;  %v232_v2 = vadd.f32 %v522_v3, %v161_v54  ;;  %v164_v6 = vmul.f32 %v516_v1, %v29_v49  ;;  %v95_v22 = vld [vmem:[%s1225_s1 + $0x70] sm:$0xff]  ;;  %v96_v23 = vld [vmem:[%s1225_s1 + $0x78] sm:$0xff]  ;;  %v34_v24 = vld [vmem:[%s1224_s0 + $0x88] sm:$0xff] }
   0xe   :  { %419 = vst [vmem:[%s1228_s4 + $0x20] sm:$0xff] %v355_v50  ;;  %420 = vst [vmem:[%s1228_s4 + $0x28] sm:$0xff] %v356_v56  ;;  %v295_v7 = vadd.f32 %v231_v57, %v89_v53  ;;  %v233_v8 = vadd.f32 %v522_v3, %v162_v59  ;;  %v234_v9 = vadd.f32 %v522_v3, %v163_v60  ;;  %v35_v29 = vld [vmem:[%s1224_s0 + $0x90] sm:$0xff]  ;;  %v36_v30 = vld [vmem:[%s1224_s0 + $0x98] sm:$0xff] }
   0xf   :  { %v165_v11 = vmul.f32 %v516_v1, %v30_v55  ;;  %421 = vst [vmem:[%s1228_s4 + $0x30] sm:$0xff] %v357_v63  ;;  %422 = vst [vmem:[%s1228_s4 + $0x38] sm:$0xff] %v358_v0  ;;  %v296_v12 = vadd.f32 %v232_v2, %v90_v58  ;;  %v235_v13 = vadd.f32 %v522_v3, %v164_v6  ;;  %v37_v35 = vld [vmem:[%s1224_s0 + $0xa0] sm:$0xff]  ;;  %v38_v41 = vld [vmem:[%s1224_s0 + $0xa8] sm:$0xff] }
  0x10   :  { %v166_v15 = vmul.f32 %v516_v1, %v31_v61  ;;  %v167_v16 = vmul.f32 %v516_v1, %v32_v62  ;;  %v359_v18 = vmax.f32 %v295_v7, 0.0  ;;  %v297_v19 = vadd.f32 %v233_v8, %v91_v4  ;;  %v97_v39 = vld [vmem:[%s1225_s1 + $0x80] sm:$0xff]  ;;  %v98_v44 = vld [vmem:[%s1225_s1 + $0x88] sm:$0xff]  ;;  %v39_v47 = vld [vmem:[%s1224_s0 + $0xb0] sm:$0xff] }
  0x11   :  { %v298_v20 = vadd.f32 %v234_v9, %v92_v5  ;;  %v236_v21 = vadd.f32 %v522_v3, %v165_v11  ;;  %v360_v25 = vmax.f32 %v296_v12, 0.0  ;;  %v299_v26 = vadd.f32 %v235_v13, %v93_v10  ;;  %v40_v48 = vld [vmem:[%s1224_s0 + $0xb8] sm:$0xff]  ;;  %v99_v52 = vld [vmem:[%s1225_s1 + $0x90] sm:$0xff]  ;;  %v101_v58 = vld [vmem:[%s1225_s1 + $0xa0] sm:$0xff] }
  0x12   :  { %v237_v27 = vadd.f32 %v522_v3, %v166_v15  ;;  %v238_v28 = vadd.f32 %v522_v3, %v167_v16  ;;  %423 = vst [vmem:[%s1228_s4 + $0x40] sm:$0xff] %v359_v18  ;;  %v361_v31 = vmax.f32 %v297_v19, 0.0  ;;  %v168_v34 = vmul.f32 %v516_v1, %v33_v17  ;;  %v100_v53 = vld [vmem:[%s1225_s1 + $0x98] sm:$0xff]  ;;  %v102_v62 = vld [vmem:[%s1225_s1 + $0xa8] sm:$0xff]  ;;  %v41_v2 = vld [vmem:[%s1224_s0 + $0xc0] sm:$0xff] }
  0x13   :  { %v362_v32 = vmax.f32 %v298_v20, 0.0  ;;  %v300_v33 = vadd.f32 %v236_v21, %v94_v14  ;;  %424 = vst [vmem:[%s1228_s4 + $0x48] sm:$0xff] %v360_v25  ;;  %v363_v36 = vmax.f32 %v299_v26, 0.0  ;;  %v169_v40 = vmul.f32 %v516_v1, %v34_v24  ;;  %v103_v8 = vld [vmem:[%s1225_s1 + $0xb0] sm:$0xff]  ;;  %v104_v9 = vld [vmem:[%s1225_s1 + $0xb8] sm:$0xff]  ;;  %v42_v10 = vld [vmem:[%s1224_s0 + $0xc8] sm:$0xff] }
  0x14   :  { %v301_v37 = vadd.f32 %v237_v27, %v95_v22  ;;  %v302_v38 = vadd.f32 %v238_v28, %v96_v23  ;;  %425 = vst [vmem:[%s1228_s4 + $0x50] sm:$0xff] %v361_v31  ;;  %v239_v43 = vadd.f32 %v522_v3, %v168_v34  ;;  %v170_v45 = vmul.f32 %v516_v1, %v35_v29  ;;  %v43_v15 = vld [vmem:[%s1224_s0 + $0xd0] sm:$0xff]  ;;  %v44_v16 = vld [vmem:[%s1224_s0 + $0xd8] sm:$0xff]  ;;  %v45_v21 = vld [vmem:[%s1224_s0 + $0xe0] sm:$0xff] }
  0x15   :  { %426 = vst [vmem:[%s1228_s4 + $0x58] sm:$0xff] %v362_v32  ;;  %v364_v42 = vmax.f32 %v300_v33, 0.0  ;;  %v171_v46 = vmul.f32 %v516_v1, %v36_v30  ;;  %427 = vst [vmem:[%s1228_s4 + $0x60] sm:$0xff] %v363_v36  ;;  %v240_v51 = vadd.f32 %v522_v3, %v169_v40  ;;  %v172_v54 = vmul.f32 %v516_v1, %v37_v35  ;;  %v105_v25 = vld [vmem:[%s1225_s1 + $0xc0] sm:$0xff]  ;;  %v46_v27 = vld [vmem:[%s1224_s0 + $0xe8] sm:$0xff] }
  0x16   :  { %v365_v49 = vmax.f32 %v301_v37, 0.0  ;;  %v366_v50 = vmax.f32 %v302_v38, 0.0  ;;  %v303_v55 = vadd.f32 %v239_v43, %v97_v39  ;;  %v241_v56 = vadd.f32 %v522_v3, %v170_v45  ;;  %v106_v30 = vld [vmem:[%s1225_s1 + $0xc8] sm:$0xff]  ;;  %v47_v33 = vld [vmem:[%s1224_s0 + $0xf0] sm:$0xff]  ;;  %v48_v34 = vld [vmem:[%s1224_s0 + $0xf8] sm:$0xff] }
  0x17   :  { %428 = vst [vmem:[%s1228_s4 + $0x68] sm:$0xff] %v364_v42  ;;  %v242_v57 = vadd.f32 %v522_v3, %v171_v46  ;;  %v173_v59 = vmul.f32 %v516_v1, %v38_v41  ;;  %v304_v60 = vadd.f32 %v240_v51, %v98_v44  ;;  %v243_v61 = vadd.f32 %v522_v3, %v172_v54  ;;  %v107_v38 = vld [vmem:[%s1225_s1 + $0xd0] sm:$0xff]  ;;  %v108_v39 = vld [vmem:[%s1225_s1 + $0xd8] sm:$0xff]  ;;  %v109_v44 = vld [vmem:[%s1225_s1 + $0xe0] sm:$0xff] }
  0x18   :  { %429 = vst [vmem:[%s1228_s4 + $0x70] sm:$0xff] %v365_v49  ;;  %430 = vst [vmem:[%s1228_s4 + $0x78] sm:$0xff] %v366_v50  ;;  %v174_v63 = vmul.f32 %v516_v1, %v39_v47  ;;  %v175_v0 = vmul.f32 %v516_v1, %v40_v48  ;;  %v367_v4 = vmax.f32 %v303_v55, 0.0  ;;  %v305_v5 = vadd.f32 %v241_v56, %v99_v52  ;;  %v110_v48 = vld [vmem:[%s1225_s1 + $0xe8] sm:$0xff]  ;;  %v49_v51 = vld [vmem:[%s1224_s0 + $0x100] sm:$0xff] }
  0x19   :  { %v306_v6 = vadd.f32 %v242_v57, %v100_v53  ;;  %v244_v7 = vadd.f32 %v522_v3, %v173_v59  ;;  %v368_v11 = vmax.f32 %v304_v60, 0.0  ;;  %v307_v12 = vadd.f32 %v243_v61, %v101_v58  ;;  %v111_v56 = vld [vmem:[%s1225_s1 + $0xf0] sm:$0xff]  ;;  %v112_v57 = vld [vmem:[%s1225_s1 + $0xf8] sm:$0xff]  ;;  %v50_v58 = vld [vmem:[%s1224_s0 + $0x108] sm:$0xff] }
  0x1a   :  { %v245_v13 = vadd.f32 %v522_v3, %v174_v63  ;;  %v246_v14 = vadd.f32 %v522_v3, %v175_v0  ;;  %431 = vst [vmem:[%s1228_s4 + $0x80] sm:$0xff] %v367_v4  ;;  %v369_v17 = vmax.f32 %v305_v5, 0.0  ;;  %v176_v20 = vmul.f32 %v516_v1, %v41_v2  ;;  %v51_v63 = vld [vmem:[%s1224_s0 + $0x110] sm:$0xff]  ;;  %v52_v0 = vld [vmem:[%s1224_s0 + $0x118] sm:$0xff] }
  0x1b   :  { %v370_v18 = vmax.f32 %v306_v6, 0.0  ;;  %v308_v19 = vadd.f32 %v244_v7, %v102_v62  ;;  %432 = vst [vmem:[%s1228_s4 + $0x88] sm:$0xff] %v368_v11  ;;  %v371_v22 = vmax.f32 %v307_v12, 0.0  ;;  %v177_v26 = vmul.f32 %v516_v1, %v42_v10  ;;  %v53_v7 = vld [vmem:[%s1224_s0 + $0x120] sm:$0xff] }
  0x1c   :  { %v309_v23 = vadd.f32 %v245_v13, %v103_v8  ;;  %v310_v24 = vadd.f32 %v246_v14, %v104_v9  ;;  %433 = vst [vmem:[%s1228_s4 + $0x90] sm:$0xff] %v369_v17  ;;  %v247_v29 = vadd.f32 %v522_v3, %v176_v20  ;;  %v178_v31 = vmul.f32 %v516_v1, %v43_v15  ;;  %v113_v11 = vld [vmem:[%s1225_s1 + $0x100] sm:$0xff]  ;;  %v54_v13 = vld [vmem:[%s1224_s0 + $0x128] sm:$0xff]  ;;  %v56_v20 = vld [vmem:[%s1224_s0 + $0x138] sm:$0xff] }
  0x1d   :  { %434 = vst [vmem:[%s1228_s4 + $0x98] sm:$0xff] %v370_v18  ;;  %v372_v28 = vmax.f32 %v308_v19, 0.0  ;;  %v179_v32 = vmul.f32 %v516_v1, %v44_v16  ;;  %435 = vst [vmem:[%s1228_s4 + $0xa0] sm:$0xff] %v371_v22  ;;  %v248_v37 = vadd.f32 %v522_v3, %v177_v26  ;;  %v180_v40 = vmul.f32 %v516_v1, %v45_v21  ;;  %v114_v16 = vld [vmem:[%s1225_s1 + $0x108] sm:$0xff]  ;;  %v55_v19 = vld [vmem:[%s1224_s0 + $0x130] sm:$0xff] }
  0x1e   :  { %v373_v35 = vmax.f32 %v309_v23, 0.0  ;;  %v374_v36 = vmax.f32 %v310_v24, 0.0  ;;  %v311_v41 = vadd.f32 %v247_v29, %v105_v25  ;;  %v249_v42 = vadd.f32 %v522_v3, %v178_v31  ;;  %v115_v24 = vld [vmem:[%s1225_s1 + $0x110] sm:$0xff]  ;;  %v116_v25 = vld [vmem:[%s1225_s1 + $0x118] sm:$0xff] }
  0x1f   :  { %436 = vst [vmem:[%s1228_s4 + $0xa8] sm:$0xff] %v372_v28  ;;  %v250_v43 = vadd.f32 %v522_v3, %v179_v32  ;;  %v181_v45 = vmul.f32 %v516_v1, %v46_v27  ;;  %v312_v46 = vadd.f32 %v248_v37, %v106_v30  ;;  %v251_v47 = vadd.f32 %v522_v3, %v180_v40  ;;  %v117_v30 = vld [vmem:[%s1225_s1 + $0x120] sm:$0xff] }
  0x20   :  { %437 = vst [vmem:[%s1228_s4 + $0xb0] sm:$0xff] %v373_v35  ;;  %438 = vst [vmem:[%s1228_s4 + $0xb8] sm:$0xff] %v374_v36  ;;  %v182_v49 = vmul.f32 %v516_v1, %v47_v33  ;;  %v183_v50 = vmul.f32 %v516_v1, %v48_v34  ;;  %v375_v52 = vmax.f32 %v311_v41, 0.0  ;;  %v313_v53 = vadd.f32 %v249_v42, %v107_v38  ;;  %v118_v34 = vld [vmem:[%s1225_s1 + $0x128] sm:$0xff]  ;;  %v57_v37 = vld [vmem:[%s1224_s0 + $0x140] sm:$0xff] }
  0x21   :  { %v314_v54 = vadd.f32 %v250_v43, %v108_v39  ;;  %v252_v55 = vadd.f32 %v522_v3, %v181_v45  ;;  %v376_v59 = vmax.f32 %v312_v46, 0.0  ;;  %v315_v60 = vadd.f32 %v251_v47, %v109_v44  ;;  %v119_v42 = vld [vmem:[%s1225_s1 + $0x130] sm:$0xff]  ;;  %v120_v43 = vld [vmem:[%s1225_s1 + $0x138] sm:$0xff]  ;;  %v58_v44 = vld [vmem:[%s1224_s0 + $0x148] sm:$0xff] }
  0x22   :  { %v253_v61 = vadd.f32 %v522_v3, %v182_v49  ;;  %v254_v62 = vadd.f32 %v522_v3, %v183_v50  ;;  %439 = vst [vmem:[%s1228_s4 + $0xc0] sm:$0xff] %v375_v52  ;;  %v377_v2 = vmax.f32 %v313_v53, 0.0  ;;  %v184_v6 = vmul.f32 %v516_v1, %v49_v51  ;;  %v59_v49 = vld [vmem:[%s1224_s0 + $0x150] sm:$0xff]  ;;  %v60_v50 = vld [vmem:[%s1224_s0 + $0x158] sm:$0xff] }
  0x23   :  { %v378_v4 = vmax.f32 %v314_v54, 0.0  ;;  %v316_v5 = vadd.f32 %v252_v55, %v110_v48  ;;  %440 = vst [vmem:[%s1228_s4 + $0xc8] sm:$0xff] %v376_v59  ;;  %v379_v8 = vmax.f32 %v315_v60, 0.0  ;;  %v185_v12 = vmul.f32 %v516_v1, %v50_v58  ;;  %v61_v55 = vld [vmem:[%s1224_s0 + $0x160] sm:$0xff] }
  0x24   :  { %v317_v9 = vadd.f32 %v253_v61, %v111_v56  ;;  %v318_v10 = vadd.f32 %v254_v62, %v112_v57  ;;  %441 = vst [vmem:[%s1228_s4 + $0xd0] sm:$0xff] %v377_v2  ;;  %v255_v15 = vadd.f32 %v522_v3, %v184_v6  ;;  %v186_v17 = vmul.f32 %v516_v1, %v51_v63  ;;  %v121_v59 = vld [vmem:[%s1225_s1 + $0x140] sm:$0xff]  ;;  %v62_v61 = vld [vmem:[%s1224_s0 + $0x168] sm:$0xff]  ;;  %v64_v6 = vld [vmem:[%s1224_s0 + $0x178] sm:$0xff] }
  0x25   :  { %442 = vst [vmem:[%s1228_s4 + $0xd8] sm:$0xff] %v378_v4  ;;  %v380_v14 = vmax.f32 %v316_v5, 0.0  ;;  %v187_v18 = vmul.f32 %v516_v1, %v52_v0  ;;  %443 = vst [vmem:[%s1228_s4 + $0xe0] sm:$0xff] %v379_v8  ;;  %v256_v23 = vadd.f32 %v522_v3, %v185_v12  ;;  %v188_v26 = vmul.f32 %v516_v1, %v53_v7  ;;  %v122_v0 = vld [vmem:[%s1225_s1 + $0x148] sm:$0xff]  ;;  %v63_v5 = vld [vmem:[%s1224_s0 + $0x170] sm:$0xff] }
  0x26   :  { %v381_v21 = vmax.f32 %v317_v9, 0.0  ;;  %v382_v22 = vmax.f32 %v318_v10, 0.0  ;;  %v319_v27 = vadd.f32 %v255_v15, %v113_v11  ;;  %v257_v28 = vadd.f32 %v522_v3, %v186_v17  ;;  %v123_v10 = vld [vmem:[%s1225_s1 + $0x150] sm:$0xff]  ;;  %v124_v11 = vld [vmem:[%s1225_s1 + $0x158] sm:$0xff] }
  0x27   :  { %444 = vst [vmem:[%s1228_s4 + $0xe8] sm:$0xff] %v380_v14  ;;  %v258_v29 = vadd.f32 %v522_v3, %v187_v18  ;;  %v189_v31 = vmul.f32 %v516_v1, %v54_v13  ;;  %v320_v32 = vadd.f32 %v256_v23, %v114_v16  ;;  %v259_v33 = vadd.f32 %v522_v3, %v188_v26  ;;  %v125_v16 = vld [vmem:[%s1225_s1 + $0x160] sm:$0xff] }
  0x28   :  { %445 = vst [vmem:[%s1228_s4 + $0xf0] sm:$0xff] %v381_v21  ;;  %446 = vst [vmem:[%s1228_s4 + $0xf8] sm:$0xff] %v382_v22  ;;  %v190_v35 = vmul.f32 %v516_v1, %v55_v19  ;;  %v191_v36 = vmul.f32 %v516_v1, %v56_v20  ;;  %v383_v38 = vmax.f32 %v319_v27, 0.0  ;;  %v321_v39 = vadd.f32 %v257_v28, %v115_v24  ;;  %v126_v20 = vld [vmem:[%s1225_s1 + $0x168] sm:$0xff]  ;;  %v65_v23 = vld [vmem:[%s1224_s0 + $0x180] sm:$0xff] }
  0x29   :  { %v322_v40 = vadd.f32 %v258_v29, %v116_v25  ;;  %v260_v41 = vadd.f32 %v522_v3, %v189_v31  ;;  %v384_v45 = vmax.f32 %v320_v32, 0.0  ;;  %v323_v46 = vadd.f32 %v259_v33, %v117_v30  ;;  %v127_v28 = vld [vmem:[%s1225_s1 + $0x170] sm:$0xff]  ;;  %v128_v29 = vld [vmem:[%s1225_s1 + $0x178] sm:$0xff]  ;;  %v66_v30 = vld [vmem:[%s1224_s0 + $0x188] sm:$0xff] }
  0x2a   :  { %v261_v47 = vadd.f32 %v522_v3, %v190_v35  ;;  %v262_v48 = vadd.f32 %v522_v3, %v191_v36  ;;  %447 = vst [vmem:[%s1228_s4 + $0x100] sm:$0xff] %v383_v38  ;;  %v385_v51 = vmax.f32 %v321_v39, 0.0  ;;  %v192_v54 = vmul.f32 %v516_v1, %v57_v37  ;;  %v67_v35 = vld [vmem:[%s1224_s0 + $0x190] sm:$0xff]  ;;  %v68_v36 = vld [vmem:[%s1224_s0 + $0x198] sm:$0xff] }
  0x2b   :  { %v386_v52 = vmax.f32 %v322_v40, 0.0  ;;  %v324_v53 = vadd.f32 %v260_v41, %v118_v34  ;;  %448 = vst [vmem:[%s1228_s4 + $0x108] sm:$0xff] %v384_v45  ;;  %v387_v56 = vmax.f32 %v323_v46, 0.0  ;;  %v193_v60 = vmul.f32 %v516_v1, %v58_v44  ;;  %v69_v41 = vld [vmem:[%s1224_s0 + $0x1a0] sm:$0xff] }
  0x2c   :  { %v325_v57 = vadd.f32 %v261_v47, %v119_v42  ;;  %v326_v58 = vadd.f32 %v262_v48, %v120_v43  ;;  %449 = vst [vmem:[%s1228_s4 + $0x110] sm:$0xff] %v385_v51  ;;  %v263_v63 = vadd.f32 %v522_v3, %v192_v54  ;;  %v194_v2 = vmul.f32 %v516_v1, %v59_v49  ;;  %v129_v45 = vld [vmem:[%s1225_s1 + $0x180] sm:$0xff]  ;;  %v70_v47 = vld [vmem:[%s1224_s0 + $0x1a8] sm:$0xff]  ;;  %v72_v54 = vld [vmem:[%s1224_s0 + $0x1b8] sm:$0xff] }
  0x2d   :  { %450 = vst [vmem:[%s1228_s4 + $0x118] sm:$0xff] %v386_v52  ;;  %v388_v62 = vmax.f32 %v324_v53, 0.0  ;;  %v195_v4 = vmul.f32 %v516_v1, %v60_v50  ;;  %451 = vst [vmem:[%s1228_s4 + $0x120] sm:$0xff] %v387_v56  ;;  %v264_v9 = vadd.f32 %v522_v3, %v193_v60  ;;  %v196_v12 = vmul.f32 %v516_v1, %v61_v55  ;;  %v130_v50 = vld [vmem:[%s1225_s1 + $0x188] sm:$0xff]  ;;  %v71_v53 = vld [vmem:[%s1224_s0 + $0x1b0] sm:$0xff] }
  0x2e   :  { %v389_v7 = vmax.f32 %v325_v57, 0.0  ;;  %v390_v8 = vmax.f32 %v326_v58, 0.0  ;;  %v327_v13 = vadd.f32 %v263_v63, %v121_v59  ;;  %v265_v14 = vadd.f32 %v522_v3, %v194_v2  ;;  %v131_v58 = vld [vmem:[%s1225_s1 + $0x190] sm:$0xff]  ;;  %v132_v59 = vld [vmem:[%s1225_s1 + $0x198] sm:$0xff] }
  0x2f   :  { %452 = vst [vmem:[%s1228_s4 + $0x128] sm:$0xff] %v388_v62  ;;  %v266_v15 = vadd.f32 %v522_v3, %v195_v4  ;;  %v197_v17 = vmul.f32 %v516_v1, %v62_v61  ;;  %v328_v18 = vadd.f32 %v264_v9, %v122_v0  ;;  %v267_v19 = vadd.f32 %v522_v3, %v196_v12  ;;  %v133_v0 = vld [vmem:[%s1225_s1 + $0x1a0] sm:$0xff] }
  0x30   :  { %453 = vst [vmem:[%s1228_s4 + $0x130] sm:$0xff] %v389_v7  ;;  %454 = vst [vmem:[%s1228_s4 + $0x138] sm:$0xff] %v390_v8  ;;  %v198_v21 = vmul.f32 %v516_v1, %v63_v5  ;;  %v199_v22 = vmul.f32 %v516_v1, %v64_v6  ;;  %v391_v24 = vmax.f32 %v327_v13, 0.0  ;;  %v329_v25 = vadd.f32 %v265_v14, %v123_v10  ;;  %v134_v6 = vld [vmem:[%s1225_s1 + $0x1a8] sm:$0xff]  ;;  %v73_v9 = vld [vmem:[%s1224_s0 + $0x1c0] sm:$0xff] }
  0x31   :  { %v330_v26 = vadd.f32 %v266_v15, %v124_v11  ;;  %v268_v27 = vadd.f32 %v522_v3, %v197_v17  ;;  %v392_v31 = vmax.f32 %v328_v18, 0.0  ;;  %v331_v32 = vadd.f32 %v267_v19, %v125_v16  ;;  %v135_v14 = vld [vmem:[%s1225_s1 + $0x1b0] sm:$0xff]  ;;  %v136_v15 = vld [vmem:[%s1225_s1 + $0x1b8] sm:$0xff]  ;;  %v74_v16 = vld [vmem:[%s1224_s0 + $0x1c8] sm:$0xff] }
  0x32   :  { %v269_v33 = vadd.f32 %v522_v3, %v198_v21  ;;  %v270_v34 = vadd.f32 %v522_v3, %v199_v22  ;;  %455 = vst [vmem:[%s1228_s4 + $0x140] sm:$0xff] %v391_v24  ;;  %v393_v37 = vmax.f32 %v329_v25, 0.0  ;;  %v200_v40 = vmul.f32 %v516_v1, %v65_v23  ;;  %v75_v21 = vld [vmem:[%s1224_s0 + $0x1d0] sm:$0xff]  ;;  %v76_v22 = vld [vmem:[%s1224_s0 + $0x1d8] sm:$0xff] }
  0x33   :  { %v394_v38 = vmax.f32 %v330_v26, 0.0  ;;  %v332_v39 = vadd.f32 %v268_v27, %v126_v20  ;;  %456 = vst [vmem:[%s1228_s4 + $0x148] sm:$0xff] %v392_v31  ;;  %v395_v42 = vmax.f32 %v331_v32, 0.0  ;;  %v201_v46 = vmul.f32 %v516_v1, %v66_v30  ;;  %v77_v27 = vld [vmem:[%s1224_s0 + $0x1e0] sm:$0xff] }
  0x34   :  { %v333_v43 = vadd.f32 %v269_v33, %v127_v28  ;;  %v334_v44 = vadd.f32 %v270_v34, %v128_v29  ;;  %457 = vst [vmem:[%s1228_s4 + $0x150] sm:$0xff] %v393_v37  ;;  %v271_v49 = vadd.f32 %v522_v3, %v200_v40  ;;  %v202_v51 = vmul.f32 %v516_v1, %v67_v35  ;;  %v137_v31 = vld [vmem:[%s1225_s1 + $0x1c0] sm:$0xff]  ;;  %v78_v33 = vld [vmem:[%s1224_s0 + $0x1e8] sm:$0xff]  ;;  %v80_v40 = vld [vmem:[%s1224_s0 + $0x1f8] sm:$0xff] }
  0x35   :  { %458 = vst [vmem:[%s1228_s4 + $0x158] sm:$0xff] %v394_v38  ;;  %v396_v48 = vmax.f32 %v332_v39, 0.0  ;;  %v203_v52 = vmul.f32 %v516_v1, %v68_v36  ;;  %459 = vst [vmem:[%s1228_s4 + $0x160] sm:$0xff] %v395_v42  ;;  %v272_v57 = vadd.f32 %v522_v3, %v201_v46  ;;  %v204_v60 = vmul.f32 %v516_v1, %v69_v41  ;;  %v138_v36 = vld [vmem:[%s1225_s1 + $0x1c8] sm:$0xff]  ;;  %v79_v39 = vld [vmem:[%s1224_s0 + $0x1f0] sm:$0xff] }
  0x36   :  { %v397_v55 = vmax.f32 %v333_v43, 0.0  ;;  %v398_v56 = vmax.f32 %v334_v44, 0.0  ;;  %v335_v61 = vadd.f32 %v271_v49, %v129_v45  ;;  %v273_v62 = vadd.f32 %v522_v3, %v202_v51  ;;  %v139_v44 = vld [vmem:[%s1225_s1 + $0x1d0] sm:$0xff]  ;;  %v140_v45 = vld [vmem:[%s1225_s1 + $0x1d8] sm:$0xff] }
  0x37   :  { %460 = vst [vmem:[%s1228_s4 + $0x168] sm:$0xff] %v396_v48  ;;  %v274_v63 = vadd.f32 %v522_v3, %v203_v52  ;;  %v205_v2 = vmul.f32 %v516_v1, %v70_v47  ;;  %v336_v4 = vadd.f32 %v272_v57, %v130_v50  ;;  %v275_v5 = vadd.f32 %v522_v3, %v204_v60  ;;  %v141_v50 = vld [vmem:[%s1225_s1 + $0x1e0] sm:$0xff] }
  0x38   :  { %461 = vst [vmem:[%s1228_s4 + $0x170] sm:$0xff] %v397_v55  ;;  %462 = vst [vmem:[%s1228_s4 + $0x178] sm:$0xff] %v398_v56  ;;  %v206_v7 = vmul.f32 %v516_v1, %v71_v53  ;;  %v207_v8 = vmul.f32 %v516_v1, %v72_v54  ;;  %v399_v10 = vmax.f32 %v335_v61, 0.0  ;;  %v337_v11 = vadd.f32 %v273_v62, %v131_v58  ;;  %v142_v54 = vld [vmem:[%s1225_s1 + $0x1e8] sm:$0xff]  ;;  %v143_v61 = vld [vmem:[%s1225_s1 + $0x1f0] sm:$0xff] }
  0x39   :  { %v338_v12 = vadd.f32 %v274_v63, %v132_v59  ;;  %v276_v13 = vadd.f32 %v522_v3, %v205_v2  ;;  %v400_v17 = vmax.f32 %v336_v4, 0.0  ;;  %v339_v18 = vadd.f32 %v275_v5, %v133_v0  ;;  %v144_v62 = vld [vmem:[%s1225_s1 + $0x1f8] sm:$0xff] }
  0x3a   :  { %v277_v19 = vadd.f32 %v522_v3, %v206_v7  ;;  %v278_v20 = vadd.f32 %v522_v3, %v207_v8  ;;  %463 = vst [vmem:[%s1228_s4 + $0x180] sm:$0xff] %v399_v10  ;;  %v401_v23 = vmax.f32 %v337_v11, 0.0  ;;  %v208_v26 = vmul.f32 %v516_v1, %v73_v9 }
  0x3b   :  { %v402_v24 = vmax.f32 %v338_v12, 0.0  ;;  %v340_v25 = vadd.f32 %v276_v13, %v134_v6  ;;  %464 = vst [vmem:[%s1228_s4 + $0x188] sm:$0xff] %v400_v17  ;;  %v403_v28 = vmax.f32 %v339_v18, 0.0  ;;  %v209_v32 = vmul.f32 %v516_v1, %v74_v16 }
  0x3c   :  { %v341_v29 = vadd.f32 %v277_v19, %v135_v14  ;;  %v342_v30 = vadd.f32 %v278_v20, %v136_v15  ;;  %465 = vst [vmem:[%s1228_s4 + $0x190] sm:$0xff] %v401_v23  ;;  %v279_v35 = vadd.f32 %v522_v3, %v208_v26  ;;  %v210_v37 = vmul.f32 %v516_v1, %v75_v21 }
  0x3d   :  { %466 = vst [vmem:[%s1228_s4 + $0x198] sm:$0xff] %v402_v24  ;;  %v404_v34 = vmax.f32 %v340_v25, 0.0  ;;  %v211_v38 = vmul.f32 %v516_v1, %v76_v22  ;;  %467 = vst [vmem:[%s1228_s4 + $0x1a0] sm:$0xff] %v403_v28  ;;  %v280_v43 = vadd.f32 %v522_v3, %v209_v32  ;;  %v212_v46 = vmul.f32 %v516_v1, %v77_v27 }
  0x3e   :  { %v405_v41 = vmax.f32 %v341_v29, 0.0  ;;  %v406_v42 = vmax.f32 %v342_v30, 0.0  ;;  %v343_v47 = vadd.f32 %v279_v35, %v137_v31  ;;  %v281_v48 = vadd.f32 %v522_v3, %v210_v37 }
  0x3f   :  { %468 = vst [vmem:[%s1228_s4 + $0x1a8] sm:$0xff] %v404_v34  ;;  %v282_v49 = vadd.f32 %v522_v3, %v211_v38  ;;  %v213_v51 = vmul.f32 %v516_v1, %v78_v33  ;;  %v344_v52 = vadd.f32 %v280_v43, %v138_v36  ;;  %v283_v53 = vadd.f32 %v522_v3, %v212_v46 }
  0x40   :  { %469 = vst [vmem:[%s1228_s4 + $0x1b0] sm:$0xff] %v405_v41  ;;  %470 = vst [vmem:[%s1228_s4 + $0x1b8] sm:$0xff] %v406_v42  ;;  %v214_v55 = vmul.f32 %v516_v1, %v79_v39  ;;  %v215_v56 = vmul.f32 %v516_v1, %v80_v40  ;;  %v407_v57 = vmax.f32 %v343_v47, 0.0  ;;  %v345_v58 = vadd.f32 %v281_v48, %v139_v44 }
  0x41   :  { %v346_v59 = vadd.f32 %v282_v49, %v140_v45  ;;  %v284_v60 = vadd.f32 %v522_v3, %v213_v51  ;;  %v408_v63 = vmax.f32 %v344_v52, 0.0  ;;  %v347_v0 = vadd.f32 %v283_v53, %v141_v50 }
  0x42   :  { %v285_v2 = vadd.f32 %v522_v3, %v214_v55  ;;  %v286_v4 = vadd.f32 %v522_v3, %v215_v56  ;;  %471 = vst [vmem:[%s1228_s4 + $0x1c0] sm:$0xff] %v407_v57  ;;  %v409_v1 = vmax.f32 %v345_v58, 0.0 }
  0x43   :  { %v410_v5 = vmax.f32 %v346_v59, 0.0  ;;  %v348_v6 = vadd.f32 %v284_v60, %v142_v54  ;;  %472 = vst [vmem:[%s1228_s4 + $0x1c8] sm:$0xff] %v408_v63  ;;  %v411_v7 = vmax.f32 %v347_v0, 0.0 }
  0x44   :  { %v349_v8 = vadd.f32 %v285_v2, %v143_v61  ;;  %v350_v9 = vadd.f32 %v286_v4, %v144_v62  ;;  %473 = vst [vmem:[%s1228_s4 + $0x1d0] sm:$0xff] %v409_v1 }
  0x45   :  { %474 = vst [vmem:[%s1228_s4 + $0x1d8] sm:$0xff] %v410_v5  ;;  %v412_v3 = vmax.f32 %v348_v6, 0.0  ;;  %475 = vst [vmem:[%s1228_s4 + $0x1e0] sm:$0xff] %v411_v7 }
  0x46   :  { %v413_v10 = vmax.f32 %v349_v8, 0.0  ;;  %v414_v11 = vmax.f32 %v350_v9, 0.0 }
  0x47   :  { %476 = vst [vmem:[%s1228_s4 + $0x1e8] sm:$0xff] %v412_v3 }
  0x48   :  { %477 = vst [vmem:[%s1228_s4 + $0x1f0] sm:$0xff] %v413_v10  ;;  %478 = vst [vmem:[%s1228_s4 + $0x1f8] sm:$0xff] %v414_v11 }

// kernel: basic_block.4
= control target key start
LH: loop header
LB: loop body
LE: loop exit
PB: predicated region body
PF: predicated region fallthrough
CT: control target
= control target key end

     0   :  { %s5308_s18 = smov 0   ;;  %s6746_s0 = inlined_call_operand.vmem [shape: f32[2,16,16,128], index: 0, kind: input, shape index: {}]   ;;  %s6747_s1 = inlined_call_operand.vmem [shape: f32[1,128], index: 1, kind: input, shape index: {}]   ;;  %s6748_s2 = inlined_call_operand.vmem [shape: f32[1,128], index: 2, kind: input, shape index: {}]   ;;  %s6749_s3 = inlined_call_operand.vmem [shape: f32[9,128,128], index: 3, kind: input, shape index: {}]   ;;  %s6750_s4 = inlined_call_operand.vmem [shape: f32[2,16,16,128], index: 4, kind: output, shape index: {0}]   ;;  %s6751_s5 = inlined_call_operand.vmem [shape: f32[2,2,128], index: 5, kind: output, shape index: {1}]  }
   0x1 LB: > { %s3400_s19 = sadd.s32 4294967295, %s5275_s18   ;;  %p3404_p0 = scmp.ge.s32.totalorder %s5275_s18, 1  ;;  %s5275_s18 = sphi %s5308_s18, %s16_s18  }
   0x2   : > { %p190_p1 = scmp.lt.s32.totalorder %s5275_s18, 3 }
   0x4   : > { %p191_p2 = pnand %p3404_p0, %p190_p1 }
   0x6   : > { %194 = sbr.rel (%p191_p2) target bundleno = 647 (0x287), region = 36 }
   0xd   : > { %v3412_v0 = vld [vmem:[%s6749_s3 + $0x80] sm:$0xff]  ;;  %v3413_v1 = vld [vmem:[%s6749_s3 + $0x88] sm:$0xff]  ;;  %p5327_p3 = scmp.lt.s32.totalorder %s3400_s19, 1  ;;  %v3414_v5 = vld [vmem:[%s6749_s3 + $0x90] sm:$0xff]  ;;  %v5277_v7 = vmov 0.0   ;;  %vm3311_vm0 = vcmask 1040384  }
   0xe   : > { %v3460_v2 = vld [vmem:[%s6749_s3 + $0x200] sm:$0xff]  ;;  %v4696_v3 = vpack.c.bf16 %v3413_v1, %v3412_v0  ;;  %v3461_v4 = vld [vmem:[%s6749_s3 + $0x208] sm:$0xff]  ;;  %v3415_v6 = vld [vmem:[%s6749_s3 + $0x98] sm:$0xff]  ;;  %236 = vst [vmem:[#allocation2] sm:$0xff] %v5277_v7 }
   0xf   : > { %237 = vst [vmem:[#allocation2 + $0x8] sm:$0xff] %v5277_v7  ;;  %238 = vst [vmem:[#allocation2 + $0x10] sm:$0x3] %v5277_v7  ;;  %v5378_v8 = vpack.c.bf16 %v3461_v4, %v3460_v2  ;;  %v4700_v9 = vpack.c.bf16 %v3415_v6, %v3414_v5  ;;  %v3462_v10 = vld [vmem:[%s6749_s3 + $0x210] sm:$0xff]  ;;  %v3463_v11 = vld [vmem:[%s6749_s3 + $0x218] sm:$0xff]  ;;  %s6811_s19 = smov (!%p5327_p3, %s3400_s19), 1 }
  0x10   : > { %240 = vst [vmem:[#allocation2 + $0x198] sm:$0xff] %v5277_v7  ;;  %241 = vst [vmem:[#allocation2 + $0x1a0] sm:$0xff] %v5277_v7  ;;  %v3416_v12 = vld [vmem:[%s6749_s3 + $0xa0] sm:$0xff]  ;;  %4697 = vmatprep.subr.bf16.mxu1 %v4696_v3  ;;  %v5395_v13 = vpack.c.bf16 %v3463_v11, %v3462_v10  ;;  %v3417_v14 = vld [vmem:[%s6749_s3 + $0xa8] sm:$0xff]  ;;  %s3542_s22 = sshll.u32 %s6811_s19, 8 }
  0x11   : > { %242 = vst [vmem:[#allocation2 + $0x1a8] sm:$0x3] %v5277_v7  ;;  %244 = vst [vmem:[#allocation2 + $0x18] sm:$0x1] %v5277_v7  ;;  %v3464_v15 = vld [vmem:[%s6749_s3 + $0x220] sm:$0xff]  ;;  %v3465_v16 = vld [vmem:[%s6749_s3 + $0x228] sm:$0xff]  ;;  %4825 = vmatprep.subr.bf16.mxu0 %v5378_v8  ;;  %4699 = vmatpush3.bf16.msra.mxu1 %v4696_v3  ;;  %v4704_v17 = vpack.c.bf16 %v3417_v14, %v3416_v12  ;;  %s5429_s8 = scalar_lea.vmem %s6746_s0, %s3542_s22  ;;  %s6507_s11 = scalar_lea.vmem %s6750_s4, %s3542_s22 }
  0x12   : > { %245 = vst [vmem:[#allocation2 + $0x30] sm:$0x1] %v5277_v7  ;;  %246 = vst [vmem:[#allocation2 + $0x48] sm:$0x1] %v5277_v7  ;;  %4827 = vmatpush3.bf16.msra.mxu0 %v5378_v8  ;;  %4701 = vmatprep.subr.bf16.mxu1 %v4700_v9  ;;  %v5410_v18 = vpack.c.bf16 %v3465_v16, %v3464_v15  ;;  %v3418_v19 = vld [vmem:[%s6749_s3 + $0xb0] sm:$0xff]  ;;  %v3419_v20 = vld [vmem:[%s6749_s3 + $0xb8] sm:$0xff] }
  0x13   : > { %247 = vst [vmem:[#allocation2 + $0x60] sm:$0x1] %v5277_v7  ;;  %248 = vst [vmem:[#allocation2 + $0x78] sm:$0x1] %v5277_v7  ;;  %4829 = vmatprep.subr.bf16.mxu0 %v5395_v13  ;;  %v3466_v21 = vld [vmem:[%s6749_s3 + $0x230] sm:$0xff]  ;;  %v3467_v22 = vld [vmem:[%s6749_s3 + $0x238] sm:$0xff]  ;;  %v4708_v23 = vpack.c.bf16 %v3419_v20, %v3418_v19 }
  0x14   : > { %249 = vst [vmem:[#allocation2 + $0x90] sm:$0x1] %v5277_v7  ;;  %250 = vst [vmem:[#allocation2 + $0xa8] sm:$0x1] %v5277_v7  ;;  %v3420_v24 = vld [vmem:[%s6749_s3 + $0xc0] sm:$0xff]  ;;  %v3421_v25 = vld [vmem:[%s6749_s3 + $0xc8] sm:$0xff]  ;;  %v5439_v26 = vpack.c.bf16 %v3467_v22, %v3466_v21 }
  0x15   : > { %251 = vst [vmem:[#allocation2 + $0xc0] sm:$0x1] %v5277_v7  ;;  %252 = vst [vmem:[#allocation2 + $0xd8] sm:$0x1] %v5277_v7  ;;  %4703 = vmatpush3.bf16.msra.mxu1 %v4700_v9  ;;  %v3468_v27 = vld [vmem:[%s6749_s3 + $0x240] sm:$0xff]  ;;  %v3469_v28 = vld [vmem:[%s6749_s3 + $0x248] sm:$0xff]  ;;  %v4712_v34 = vpack.c.bf16 %v3421_v25, %v3420_v24 }
  0x16   : > { %253 = vst [vmem:[#allocation2 + $0xf0] sm:$0x1] %v5277_v7  ;;  %254 = vst [vmem:[#allocation2 + $0x108] sm:$0x1] %v5277_v7  ;;  %4831 = vmatpush3.bf16.msra.mxu0 %v5395_v13  ;;  %4705 = vmatprep.subr.bf16.mxu1 %v4704_v17  ;;  %v498_v29 = vld [vmem:[#allocation2 + $0x1] sm:$0xff]  ;;  %v3422_v35 = vld [vmem:[%s6749_s3 + $0xd0] sm:$0xff]  ;;  %v5465_v37 = vpack.c.bf16 %v3469_v28, %v3468_v27 }
  0x17   : > { %255 = vst [vmem:[#allocation2 + $0x120] sm:$0x1] %v5277_v7  ;;  %256 = vst [vmem:[#allocation2 + $0x138] sm:$0x1] %v5277_v7  ;;  %4833 = vmatprep.subr.bf16.mxu0 %v5410_v18  ;;  %4008 = vmatprep.mubr.f32.mxu1 %v498_v29  ;;  %v276_v30 = vld [vmem:[%s5429_s8] sm:$0xff]  ;;  %v277_v36 = vld [vmem:[%s5429_s8 + $0x8] sm:$0xff] }
  0x18   : > { %257 = vst [vmem:[#allocation2 + $0x150] sm:$0x1] %v5277_v7  ;;  %258 = vst [vmem:[#allocation2 + $0x168] sm:$0x1] %v5277_v7  ;;  %v5451_v31 = vld [vmem:[%s6747_s1] ss:$0 sm:$0xff] }
  0x19   : > { %259 = vst [vmem:[#allocation2 + $0x180] sm:$0x1] %v5277_v7  ;;  %260 = vst [vmem:[#allocation2 + $0x29] sm:$0x1] %v5277_v7  ;;  %v5456_v32 = vld [vmem:[%s6748_s2] ss:$0 sm:$0xff]  ;;  %4707 = vmatpush3.bf16.msra.mxu1 %v4704_v17  ;;  %v315_v33 = vmul.f32 %v5451_v31, %v276_v30  ;;  %v316_v40 = vmul.f32 %v5451_v31, %v277_v36 }
  0x1a   : > { %261 = vst [vmem:[#allocation2 + $0x41] sm:$0x1] %v5277_v7  ;;  %262 = vst [vmem:[#allocation2 + $0x59] sm:$0x1] %v5277_v7  ;;  %4835 = vmatpush3.bf16.msra.mxu0 %v5410_v18  ;;  %4709 = vmatprep.subr.bf16.mxu1 %v4708_v23  ;;  %v3423_v38 = vld [vmem:[%s6749_s3 + $0xd8] sm:$0xff]  ;;  %v278_v41 = vld [vmem:[%s5429_s8 + $0x10] sm:$0xff] }
  0x1b   : > { %263 = vst [vmem:[#allocation2 + $0x71] sm:$0x1] %v5277_v7  ;;  %264 = vst [vmem:[#allocation2 + $0x89] sm:$0x1] %v5277_v7  ;;  %4837 = vmatprep.subr.bf16.mxu0 %v5439_v26  ;;  %v354_v39 = vadd.f32 %v5456_v32, %v315_v33  ;;  %v279_v42 = vld [vmem:[%s5429_s8 + $0x18] sm:$0xff]  ;;  %v3470_v43 = vld [vmem:[%s6749_s3 + $0x250] sm:$0xff]  ;;  %v317_v45 = vmul.f32 %v5451_v31, %v278_v41  ;;  %v355_v49 = vadd.f32 %v5456_v32, %v316_v40 }
  0x1c   : > { %265 = vst [vmem:[#allocation2 + $0xa1] sm:$0x1] %v5277_v7  ;;  %266 = vst [vmem:[#allocation2 + $0xb9] sm:$0x1] %v5277_v7  ;;  %v3471_v44 = vld [vmem:[%s6749_s3 + $0x258] sm:$0xff]  ;;  %v318_v46 = vmul.f32 %v5451_v31, %v279_v42  ;;  %v280_v47 = vld [vmem:[%s5429_s8 + $0x20] sm:$0xff]  ;;  %v4716_v52 = vpack.c.bf16 %v3423_v38, %v3422_v35 }
  0x1d   : > { %267 = vst [vmem:[#allocation2 + $0xd1] sm:$0x1] %v5277_v7  ;;  %268 = vst [vmem:[#allocation2 + $0xe9] sm:$0x1] %v5277_v7  ;;  %4711 = vmatpush3.bf16.msra.mxu1 %v4708_v23  ;;  %v5483_v48 = vmax.f32 %v354_v39, 0.0  ;;  %v319_v50 = vmul.f32 %v5451_v31, %v280_v47  ;;  %v281_v51 = vld [vmem:[%s5429_s8 + $0x28] sm:$0xff]  ;;  %v356_v53 = vadd.f32 %v5456_v32, %v317_v45 }
  0x1e   : > { %269 = vst [vmem:[#allocation2 + $0x101] sm:$0x1] %v5277_v7  ;;  %270 = vst [vmem:[#allocation2 + $0x119] sm:$0x1] %v5277_v7  ;;  %4839 = vmatpush3.bf16.msra.mxu0 %v5439_v26  ;;  %4713 = vmatprep.subr.bf16.mxu1 %v4712_v34  ;;  %v357_v54 = vadd.f32 %v5456_v32, %v318_v46  ;;  %v282_v55 = vld [vmem:[%s5429_s8 + $0x30] sm:$0xff]  ;;  %v283_v56 = vld [vmem:[%s5429_s8 + $0x38] sm:$0xff]  ;;  %v5494_v57 = vpack.c.bf16 %v3471_v44, %v3470_v43 }
  0x1f   : > { %271 = vst [vmem:[#allocation2 + $0x131] sm:$0x1] %v5277_v7  ;;  %272 = vst [vmem:[#allocation2 + $0x149] sm:$0x1] %v5277_v7  ;;  %4841 = vmatprep.subr.bf16.mxu0 %v5465_v37  ;;  %v3424_v58 = vld [vmem:[%s6749_s3 + $0xe0] sm:$0xff]  ;;  %v3425_v59 = vld [vmem:[%s6749_s3 + $0xe8] sm:$0xff]  ;;  %4328 = vmatprep.mubr.f32.mxu0 %v5483_v48  ;;  %v358_v61 = vadd.f32 %v5456_v32, %v319_v50  ;;  %v320_v62 = vmul.f32 %v5451_v31, %v281_v51 }
  0x20   : > { %273 = vst [vmem:[#allocation2 + $0x161] sm:$0x1] %v5277_v7  ;;  %274 = vst [vmem:[#allocation2 + $0x179] sm:$0x1] %v5277_v7  ;;  %v5504_v60 = vmax.f32 %v355_v49, 0.0  ;;  %v284_v63 = vld [vmem:[%s5429_s8 + $0x40] sm:$0xff]  ;;  %v321_v4 = vmul.f32 %v5451_v31, %v282_v55  ;;  %v322_v5 = vmul.f32 %v5451_v31, %v283_v56  ;;  %v4720_v14 = vpack.c.bf16 %v3425_v59, %v3424_v58 }
  0x21   : > { %275 = vst [vmem:[#allocation2 + $0x191] sm:$0x1] %v5277_v7  ;;  %6776 = vst [vmem:[#allocation3_spill] sm:$0xff] %v5439_v26  ;;  %v3472_v0 = vld [vmem:[%s6749_s3 + $0x260] sm:$0xff]  ;;  %v3473_v1 = vld [vmem:[%s6749_s3 + $0x268] sm:$0xff]  ;;  %v5515_v2 = vmax.f32 %v356_v53, 0.0  ;;  %4715 = vmatpush3.bf16.msra.mxu1 %v4712_v34  ;;  %v359_v10 = vadd.f32 %v5456_v32, %v320_v62  ;;  %v323_v11 = vmul.f32 %v5451_v31, %v284_v63 }
  0x22   : > { %6777 = vst [vmem:[#allocation4_spill] sm:$0xff] %v5465_v37  ;;  %6778 = vst [vmem:[#allocation5_spill] sm:$0xff] %v5494_v57  ;;  %v5517_v3 = vmax.f32 %v357_v54, 0.0  ;;  %v285_v6 = vld [vmem:[%s5429_s8 + $0x48] sm:$0xff]  ;;  %v5523_v9 = vmax.f32 %v358_v61, 0.0  ;;  %v286_v12 = vld [vmem:[%s5429_s8 + $0x50] sm:$0xff]  ;;  %4843 = vmatpush3.bf16.msra.mxu0 %v5465_v37  ;;  %4717 = vmatprep.subr.bf16.mxu1 %v4716_v52  ;;  %v360_v15 = vadd.f32 %v5456_v32, %v321_v4 }
  0x23   : > { %418 = vst [vmem:[#allocation2 + $0x19] sm:$0xff] %v5483_v48  ;;  %419 = vst [vmem:[#allocation2 + $0x21] sm:$0xff] %v5504_v60  ;;  %v361_v16 = vadd.f32 %v5456_v32, %v322_v5  ;;  %v287_v17 = vld [vmem:[%s5429_s8 + $0x58] sm:$0xff]  ;;  %4845 = vmatprep.subr.bf16.mxu0 %v5494_v57  ;;  %v5535_v19 = vpack.c.bf16 %v3473_v1, %v3472_v0  ;;  %v3426_v20 = vld [vmem:[%s6749_s3 + $0xf0] sm:$0xff]  ;;  %v5544_v22 = vmax.f32 %v359_v10, 0.0  ;;  %s3409_s22 = sshll.u32 %s6811_s19, 1 }
  0x24   : > { %420 = vst [vmem:[#allocation2 + $0x31] sm:$0xff] %v5515_v2  ;;  %421 = vst [vmem:[#allocation2 + $0x39] sm:$0xff] %v5517_v3  ;;  %v3427_v21 = vld [vmem:[%s6749_s3 + $0xf8] sm:$0xff]  ;;  %v362_v23 = vadd.f32 %v5456_v32, %v323_v11  ;;  %v324_v24 = vmul.f32 %v5451_v31, %v285_v6  ;;  %v288_v25 = vld [vmem:[%s5429_s8 + $0x60] sm:$0xff]  ;;  %v5555_v29 = vmax.f32 %v360_v15, 0.0  ;;  %v325_v33 = vmul.f32 %v5451_v31, %v286_v12  ;;  %s235_s14 = scalar_lea.vmem %s6751_s5, %s3409_s22 }
  0x25   : > { %6779 = vst [vmem:[#allocation6_spill] sm:$0xff] %v5535_v19  ;;  %422 = vst [vmem:[#allocation2 + $0x49] sm:$0xff] %v5523_v9  ;;  %v3474_v27 = vld [vmem:[%s6749_s3 + $0x270] sm:$0xff]  ;;  %v3475_v28 = vld [vmem:[%s6749_s3 + $0x278] sm:$0xff]  ;;  %v5557_v30 = vmax.f32 %v361_v16, 0.0  ;;  %v326_v34 = vmul.f32 %v5451_v31, %v287_v17  ;;  %4719 = vmatpush3.bf16.msra.mxu1 %v4716_v52  ;;  %v327_v39 = vmul.f32 %v5451_v31, %v288_v25 }
  0x26   : > { %v289_v35 = vld [vmem:[%s5429_s8 + $0x68] sm:$0xff]  ;;  %423 = vst [vmem:[#allocation2 + $0x51] sm:$0xff] %v5544_v22  ;;  %v5563_v36 = vmax.f32 %v362_v23, 0.0  ;;  %v363_v38 = vadd.f32 %v5456_v32, %v324_v24  ;;  %v290_v40 = vld [vmem:[%s5429_s8 + $0x70] sm:$0xff]  ;;  %v291_v41 = vld [vmem:[%s5429_s8 + $0x78] sm:$0xff]  ;;  %4847 = vmatpush3.bf16.msra.mxu0 %v5494_v57  ;;  %4721 = vmatprep.subr.bf16.mxu1 %v4720_v14  ;;  %v4724_v42 = vpack.c.bf16 %v3427_v21, %v3426_v20 }
  0x27   : > { %v482_v43 = vld [vmem:[%s6749_s3] sm:$0xff]  ;;  %v483_v44 = vld [vmem:[%s6749_s3 + $0x8] sm:$0xff]  ;;  %424 = vst [vmem:[#allocation2 + $0x61] sm:$0xff] %v5555_v29  ;;  %425 = vst [vmem:[#allocation2 + $0x69] sm:$0xff] %v5557_v30  ;;  %v364_v45 = vadd.f32 %v5456_v32, %v325_v33  ;;  %v365_v46 = vadd.f32 %v5456_v32, %v326_v34  ;;  %4849 = vmatprep.subr.bf16.mxu0 %v5535_v19  ;;  %v5581_v47 = vpack.c.bf16 %v3475_v28, %v3474_v27 }
  0x28   : > { %v3476_v49 = vld [vmem:[%s6749_s3 + $0x280] sm:$0xff]  ;;  %v3477_v50 = vld [vmem:[%s6749_s3 + $0x288] sm:$0xff]  ;;  %426 = vst [vmem:[#allocation2 + $0x79] sm:$0xff] %v5563_v36  ;;  %v5590_v51 = vmax.f32 %v363_v38, 0.0  ;;  %v366_v52 = vadd.f32 %v5456_v32, %v327_v39  ;;  %v328_v53 = vmul.f32 %v5451_v31, %v289_v35  ;;  %v329_v56 = vmul.f32 %v5451_v31, %v290_v40  ;;  %v3478_v63 = vld [vmem:[%s6749_s3 + $0x290] sm:$0xff] }
  0x29   : > { %6780 = vst [vmem:[#allocation7_spill] sm:$0xff] %v5581_v47  ;;  %v5594_v54 = vmax.f32 %v364_v45, 0.0  ;;  %v5596_v55 = vmax.f32 %v365_v46, 0.0  ;;  %v330_v58 = vmul.f32 %v5451_v31, %v291_v41  ;;  %v292_v59 = vld [vmem:[%s5429_s8 + $0x80] sm:$0xff]  ;;  %v293_v61 = vld [vmem:[%s5429_s8 + $0x88] sm:$0xff]  ;;  %4723 = vmatpush3.bf16.msra.mxu1 %v4720_v14  ;;  %v4728_v62 = vpack.c.bf16 %v483_v44, %v482_v43  ;;  %v3479_v0 = vld [vmem:[%s6749_s3 + $0x298] sm:$0xff] }
  0x2a   : > { %427 = vst [vmem:[#allocation2 + $0x81] sm:$0xff] %v5590_v51  ;;  %v5609_v1 = vmax.f32 %v366_v52, 0.0  ;;  %v367_v4 = vadd.f32 %v5456_v32, %v328_v53  ;;  %v294_v5 = vld [vmem:[%s5429_s8 + $0x90] sm:$0xff]  ;;  %4851 = vmatpush3.bf16.msra.mxu0 %v5535_v19  ;;  %4725 = vmatprep.subr.bf16.mxu1 %v4724_v42  ;;  %v4856_v6 = vpack.c.bf16 %v3477_v50, %v3476_v49  ;;  %v485_v11 = vld [vmem:[%s6749_s3 + $0x18] sm:$0xff]  ;;  %v296_v23 = vld [vmem:[%s5429_s8 + $0xa0] sm:$0xff] }
  0x2b   : > { %v484_v10 = vld [vmem:[%s6749_s3 + $0x10] sm:$0xff]  ;;  %428 = vst [vmem:[#allocation2 + $0x91] sm:$0xff] %v5594_v54  ;;  %429 = vst [vmem:[#allocation2 + $0x99] sm:$0xff] %v5596_v55  ;;  %v368_v12 = vadd.f32 %v5456_v32, %v329_v56  ;;  %v369_v14 = vadd.f32 %v5456_v32, %v330_v58  ;;  %v295_v15 = vld [vmem:[%s5429_s8 + $0x98] sm:$0xff]  ;;  %4853 = vmatprep.subr.bf16.mxu0 %v5581_v47  ;;  %v331_v17 = vmul.f32 %v5451_v31, %v292_v59 }
  0x2c   : > { %430 = vst [vmem:[#allocation2 + $0xa9] sm:$0xff] %v5609_v1  ;;  %v5627_v16 = vmax.f32 %v367_v4, 0.0  ;;  %v332_v20 = vmul.f32 %v5451_v31, %v293_v61  ;;  %v333_v21 = vmul.f32 %v5451_v31, %v294_v5  ;;  %v5633_v24 = vpack.c.bf16 %v3479_v0, %v3478_v63  ;;  %v297_v33 = vld [vmem:[%s5429_s8 + $0xa8] sm:$0xff]  ;;  %v298_v41 = vld [vmem:[%s5429_s8 + $0xb0] sm:$0xff]  ;;  %v299_v49 = vld [vmem:[%s5429_s8 + $0xb8] sm:$0xff] }
  0x2d   : > { %v5635_v25 = vmax.f32 %v368_v12, 0.0  ;;  %v5637_v27 = vmax.f32 %v369_v14, 0.0  ;;  %v334_v28 = vmul.f32 %v5451_v31, %v295_v15  ;;  %4727 = vmatpush3.bf16.msra.mxu1 %v4724_v42  ;;  %v499_v34 = vld [vmem:[#allocation2 + $0x9] sm:$0xff]  ;;  %v5641_v35 = vpack.c.bf16 %v485_v11, %v484_v10  ;;  %v3480_v42 = vld [vmem:[%s6749_s3 + $0x2a0] sm:$0xff]  ;;  %v3515_v19 = vld [vmem:[%s6749_s3 + $0x3b8] sm:$0xff] }
  0x2e   : > { %431 = vst [vmem:[#allocation2 + $0xb1] sm:$0xff] %v5627_v16  ;;  %v5645_v38 = vadd.f32 %v5456_v32, %v331_v17  ;;  %v5648_v39 = vadd.f32 %v5456_v32, %v332_v20  ;;  %v5651_v40 = vadd.f32 %v5456_v32, %v333_v21  ;;  %4855 = vmatpush3.bf16.msra.mxu0 %v5581_v47  ;;  %v3481_v43 = vld [vmem:[%s6749_s3 + $0x2a8] sm:$0xff]  ;;  %v300_v58 = vld [vmem:[%s5429_s8 + $0xc0] sm:$0xff]  ;;  %v302_v12 = vld [vmem:[%s5429_s8 + $0xd0] sm:$0xff] }
  0x2f   : > { %4729 = vmatprep.subr.bf16.mxu1 %v4728_v62  ;;  %432 = vst [vmem:[#allocation2 + $0xc1] sm:$0xff] %v5635_v25  ;;  %433 = vst [vmem:[#allocation2 + $0xc9] sm:$0xff] %v5637_v27  ;;  %v5664_v44 = vadd.f32 %v5456_v32, %v334_v28  ;;  %v335_v45 = vmul.f32 %v5451_v31, %v296_v23  ;;  %v336_v46 = vmul.f32 %v5451_v31, %v297_v33  ;;  %v301_v4 = vld [vmem:[%s5429_s8 + $0xc8] sm:$0xff]  ;;  %v486_v10 = vld [vmem:[%s6749_s3 + $0x20] sm:$0xff] }
  0x30   : > { %4857 = vmatprep.subr.bf16.mxu0 %v4856_v6  ;;  %v402_v50 = vmax.f32 %v5645_v38, 0.0  ;;  %v403_v52 = vmax.f32 %v5648_v39, 0.0  ;;  %v404_v53 = vmax.f32 %v5651_v40, 0.0  ;;  %v337_v56 = vmul.f32 %v5451_v31, %v298_v41  ;;  %4009 = vmatmul.mubr.f32.vlgmr.msra.gmra.mrb[0].mxu1 %v499_v34  ;;  %v487_v11 = vld [vmem:[%s6749_s3 + $0x28] sm:$0xff]  ;;  %v303_v21 = vld [vmem:[%s5429_s8 + $0xd8] sm:$0xff]  ;;  %v304_v33 = vld [vmem:[%s5429_s8 + $0xe0] sm:$0xff] }
  0x31   : > { %v405_v59 = vmax.f32 %v5664_v44, 0.0  ;;  %v5676_v61 = vadd.f32 %v5456_v32, %v335_v45  ;;  %v5679_v63 = vadd.f32 %v5456_v32, %v336_v46  ;;  %v338_v0 = vmul.f32 %v5451_v31, %v299_v49  ;;  %4329 = vmatmul.mubr.f32.vlgmr.msra.gmra.mrb[0].mxu0 %v5504_v60  ;;  %4731 = vmatpush3.bf16.msra.mxu1 %v4728_v62  ;;  %v3482_v34 = vld [vmem:[%s6749_s3 + $0x2b0] sm:$0xff]  ;;  %v3483_v41 = vld [vmem:[%s6749_s3 + $0x2b8] sm:$0xff]  ;;  %v305_v45 = vld [vmem:[%s5429_s8 + $0xe8] sm:$0xff] }
  0x32   : > { %v5684_v5 = vpack.c.bf16 %v3481_v43, %v3480_v42  ;;  %434 = vst [vmem:[#allocation2 + $0xd9] sm:$0xff] %v402_v50  ;;  %435 = vst [vmem:[#allocation2 + $0xe1] sm:$0xff] %v403_v52  ;;  %v5699_v62 = vadd.f32 %v5456_v32, %v337_v56  ;;  %4859 = vmatpush3.bf16.msra.mxu0 %v4856_v6  ;;  %4011 = vmatprep.mubr.f32.mxu1 %v5483_v48  ;;  %v488_v46 = vld [vmem:[%s6749_s3 + $0x30] sm:$0xff]  ;;  %v489_v49 = vld [vmem:[%s6749_s3 + $0x38] sm:$0xff] }
  0x33   : > { %436 = vst [vmem:[#allocation2 + $0xf1] sm:$0xff] %v404_v53  ;;  %437 = vst [vmem:[#allocation2 + $0xf9] sm:$0xff] %v405_v59  ;;  %v406_v14 = vmax.f32 %v5676_v61, 0.0  ;;  %v407_v15 = vmax.f32 %v5679_v63, 0.0  ;;  %v5708_v17 = vadd.f32 %v5456_v32, %v338_v0  ;;  %v339_v20 = vmul.f32 %v5451_v31, %v300_v58  ;;  %4331 = vmatprep.mubr.f32.mxu0 %v5515_v2  ;;  %v3499_v38 = vld [vmem:[%s6749_s3 + $0x338] sm:$0xff]  ;;  %v5932_v39 = vld [vmem:[#allocation2 + $0x62] sm:$0xff] }
  0x34   : > { %4861 = vmatprep.subr.bf16.mxu0 %v5633_v24  ;;  %v408_v48 = vmax.f32 %v5699_v62, 0.0  ;;  %v340_v6 = vmul.f32 %v5451_v31, %v301_v4  ;;  %v341_v23 = vmul.f32 %v5451_v31, %v302_v12  ;;  %v342_v28 = vmul.f32 %v5451_v31, %v303_v21  ;;  %4012 = vmatmul.mubr.f32.gmra.mrb[2].mxu1 %v5504_v60  ;;  %v3484_v21 = vld [vmem:[%s6749_s3 + $0x2c0] sm:$0xff]  ;;  %v3501_v40 = vld [vmem:[%s6749_s3 + $0x348] sm:$0xff]  ;;  %v3503_v61 = vld [vmem:[%s6749_s3 + $0x358] sm:$0xff] }
  0x35   : > { %4733 = vmatprep.subr.bf16.mxu1 %v5641_v35  ;;  %v4736_v42 = vpack.c.bf16 %v487_v11, %v486_v10  ;;  %438 = vst [vmem:[#allocation2 + $0x109] sm:$0xff] %v406_v14  ;;  %439 = vst [vmem:[#allocation2 + $0x111] sm:$0xff] %v407_v15  ;;  %v409_v43 = vmax.f32 %v5708_v17, 0.0  ;;  %v5733_v60 = vadd.f32 %v5456_v32, %v339_v20  ;;  %4332 = vmatmul.mubr.f32.gmra.mrb[2].mxu0 %v5517_v3  ;;  %v5948_v44 = vld [vmem:[#allocation2 + $0x7a] sm:$0xff]  ;;  %v5964_v63 = vld [vmem:[#allocation2 + $0x92] sm:$0xff] }
  0x36   : > { %4014 = vmatprep.mubr.f32.mxu1 %v5515_v2  ;;  %440 = vst [vmem:[#allocation2 + $0x121] sm:$0xff] %v408_v48  ;;  %v5747_v56 = vadd.f32 %v5456_v32, %v340_v6  ;;  %v5750_v58 = vadd.f32 %v5456_v32, %v341_v23  ;;  %v5753_v0 = vadd.f32 %v5456_v32, %v342_v28  ;;  %v3485_v6 = vld [vmem:[%s6749_s3 + $0x2c8] sm:$0xff]  ;;  %v3511_v47 = vld [vmem:[%s6749_s3 + $0x398] sm:$0xff] }
  0x37   : > { %4863 = vmatpush3.bf16.msra.mxu0 %v5633_v24  ;;  %4334 = vmatprep.mubr.f32.mxu0 %v5523_v9  ;;  %441 = vst [vmem:[#allocation2 + $0x129] sm:$0xff] %v409_v43  ;;  %v410_v2 = vmax.f32 %v5733_v60, 0.0  ;;  %v343_v4 = vmul.f32 %v5451_v31, %v304_v33  ;;  %v344_v10 = vmul.f32 %v5451_v31, %v305_v45  ;;  %v491_v33 = vld [vmem:[%s6749_s3 + $0x48] sm:$0xff]  ;;  %v3486_v45 = vld [vmem:[%s6749_s3 + $0x2d0] sm:$0xff]  ;;  %v3507_v60 = vld [vmem:[%s6749_s3 + $0x378] sm:$0xff] }
  0x38   : > { %4865 = vmatprep.subr.bf16.mxu0 %v5684_v5  ;;  %4735 = vmatpush3.bf16.msra.mxu1 %v5641_v35  ;;  %v4868_v11 = vpack.c.bf16 %v3483_v41, %v3482_v34  ;;  %v411_v12 = vmax.f32 %v5747_v56, 0.0  ;;  %v412_v24 = vmax.f32 %v5750_v58, 0.0  ;;  %v413_v20 = vmax.f32 %v5753_v0, 0.0  ;;  %v3505_v62 = vld [vmem:[%s6749_s3 + $0x368] sm:$0xff] }
  0x39   : > { %4015 = vmatmul.mubr.f32.gmra.mrb[4].mxu1 %v5517_v3  ;;  %4737 = vmatprep.subr.bf16.mxu1 %v4736_v42  ;;  %v4740_v23 = vpack.c.bf16 %v489_v49, %v488_v46  ;;  %442 = vst [vmem:[#allocation2 + $0x139] sm:$0xff] %v410_v2  ;;  %v5777_v35 = vadd.f32 %v5456_v32, %v343_v4  ;;  %v490_v3 = vld [vmem:[%s6749_s3 + $0x40] sm:$0xff]  ;;  %v3487_v46 = vld [vmem:[%s6749_s3 + $0x2d8] sm:$0xff]  ;;  %v3489_v4 = vld [vmem:[%s6749_s3 + $0x2e8] sm:$0xff] }
  0x3a   : > { %v5780_v28 = vadd.f32 %v5456_v32, %v344_v10  ;;  %4335 = vmatmul.mubr.f32.gmra.mrb[4].mxu0 %v5544_v22  ;;  %4017 = vmatprep.mubr.f32.mxu1 %v5523_v9  ;;  %443 = vst [vmem:[#allocation2 + $0x141] sm:$0xff] %v411_v12  ;;  %444 = vst [vmem:[#allocation2 + $0x151] sm:$0xff] %v412_v24  ;;  %v4872_v41 = vpack.c.bf16 %v3485_v6, %v3484_v21  ;;  %v3490_v6 = vld [vmem:[%s6749_s3 + $0x2f0] sm:$0xff]  ;;  %v5996_v56 = vld [vmem:[#allocation2 + $0xc2] sm:$0xff] }
  0x3b   : > { %445 = vst [vmem:[#allocation2 + $0x159] sm:$0xff] %v413_v20  ;;  %4867 = vmatpush3.bf16.msra.mxu0 %v5684_v5  ;;  %4337 = vmatprep.mubr.f32.mxu0 %v5555_v29  ;;  %v414_v9 = vmax.f32 %v5777_v35, 0.0  ;;  %v4744_v5 = vpack.c.bf16 %v491_v33, %v490_v3  ;;  %v4876_v49 = vpack.c.bf16 %v3487_v46, %v3486_v45  ;;  %v306_v3 = vld [vmem:[%s5429_s8 + $0xf0] sm:$0xff]  ;;  %v307_v33 = vld [vmem:[%s5429_s8 + $0xf8] sm:$0xff]  ;;  %v3509_v58 = vld [vmem:[%s6749_s3 + $0x388] sm:$0xff] }
  0x3c   : > { %v415_v34 = vmax.f32 %v5780_v28, 0.0  ;;  %4869 = vmatprep.subr.bf16.mxu0 %v4868_v11  ;;  %4739 = vmatpush3.bf16.msra.mxu1 %v4736_v42  ;;  %v493_v42 = vld [vmem:[%s6749_s3 + $0x58] sm:$0xff]  ;;  %v345_v45 = vmul.f32 %v5451_v31, %v306_v3  ;;  %v346_v46 = vmul.f32 %v5451_v31, %v307_v33  ;;  %v3493_v31 = vld [vmem:[%s6749_s3 + $0x308] sm:$0xff]  ;;  %v6208_v37 = vld [vmem:[#allocation2 + $0x110] sm:$0xff] }
  0x3d   : > { %4018 = vmatmul.mubr.f32.gmra.mrb[6].mxu1 %v5544_v22  ;;  %4741 = vmatprep.subr.bf16.mxu1 %v4740_v23  ;;  %446 = vst [vmem:[#allocation2 + $0x169] sm:$0xff] %v414_v9  ;;  %v492_v22 = vld [vmem:[%s6749_s3 + $0x50] sm:$0xff]  ;;  %v5914_v3 = vld [vmem:[#allocation2 + $0x3a] sm:$0xff]  ;;  %v3517_v57 = vld [vmem:[%s6749_s3 + $0x3c8] sm:$0xff] }
  0x3e   : > { %447 = vst [vmem:[#allocation2 + $0x171] sm:$0xff] %v415_v34  ;;  %4338 = vmatmul.mubr.f32.gmra.mrb[6].mxu0 %v5557_v30  ;;  %4020 = vmatprep.mubr.f32.mxu1 %v5555_v29  ;;  %v3488_v29 = vld [vmem:[%s6749_s3 + $0x2e0] sm:$0xff]  ;;  %v4748_v10 = vpack.c.bf16 %v493_v42, %v492_v22  ;;  %v5860_v22 = vadd.f32 %v5456_v32, %v346_v46  ;;  %v5980_v17 = vld [vmem:[#allocation2 + $0xaa] sm:$0xff]  ;;  %v3431_v35 = vld [vmem:[%s6749_s3 + $0x118] sm:$0xff] }
  0x3f   : > { %4871 = vmatpush3.bf16.msra.mxu0 %v4868_v11  ;;  %4340 = vmatprep.mubr.f32.mxu0 %v5563_v36  ;;  %v495_v11 = vld [vmem:[%s6749_s3 + $0x68] sm:$0xff]  ;;  %v4880_v21 = vpack.c.bf16 %v3489_v4, %v3488_v29  ;;  %v3492_v42 = vld [vmem:[%s6749_s3 + $0x300] sm:$0xff]  ;;  %v6031_v28 = vld [vmem:[#allocation2 + $0xf2] sm:$0xff] }
  0x40   : > { %4873 = vmatprep.subr.bf16.mxu0 %v4872_v41  ;;  %4743 = vmatpush3.bf16.msra.mxu1 %v4740_v23  ;;  %6782 = vst [vmem:[#allocation9_spill] sm:$0xff] %v5860_v22  ;;  %v6752_v4 = vmax.f32 %v5860_v22, 0.0  ;;  %v3504_v46 = vld [vmem:[%s6749_s3 + $0x360] sm:$0xff]  ;;  %v998_v26 = vld [vmem:[#allocation2 + $0xa] sm:$0xff] }
  0x41   : > { %4021 = vmatmul.mubr.f32.gmra.mrb[8].mxu1 %v5557_v30  ;;  %4745 = vmatprep.subr.bf16.mxu1 %v4744_v5  ;;  %v494_v30 = vld [vmem:[%s6749_s3 + $0x60] sm:$0xff] }
  0x42   : > { %4341 = vmatmul.mubr.f32.gmra.mrb[8].mxu0 %v5590_v51  ;;  %4023 = vmatprep.mubr.f32.mxu1 %v5563_v36  ;;  %v3491_v36 = vld [vmem:[%s6749_s3 + $0x2f8] sm:$0xff]  ;;  %v4752_v23 = vpack.c.bf16 %v495_v11, %v494_v30  ;;  %v4888_v30 = vpack.c.bf16 %v3493_v31, %v3492_v42  ;;  %449 = vst [vmem:[#allocation2 + $0x189] sm:$0xff] %v6752_v4  ;;  %v3508_v42 = vld [vmem:[%s6749_s3 + $0x380] sm:$0xff]  ;;  %v3430_v31 = vld [vmem:[%s6749_s3 + $0x110] sm:$0xff] }
  0x43   : > { %4875 = vmatpush3.bf16.msra.mxu0 %v4872_v41  ;;  %4343 = vmatprep.mubr.f32.mxu0 %v5594_v54  ;;  %v496_v41 = vld [vmem:[%s6749_s3 + $0x70] sm:$0xff]  ;;  %v3495_v11 = vld [vmem:[%s6749_s3 + $0x318] sm:$0xff]  ;;  %v6179_v22 = vld [vmem:[#allocation2 + $0xe0] sm:$0xff] }
  0x44   : > { %4877 = vmatprep.subr.bf16.mxu0 %v4876_v49  ;;  %4747 = vmatpush3.bf16.msra.mxu1 %v4744_v5  ;;  %v4884_v5 = vpack.c.bf16 %v3491_v36, %v3490_v6  ;;  %v5898_v6 = vld [vmem:[#allocation2 + $0x22] sm:$0xff]  ;;  %v6012_v0 = vld [vmem:[#allocation2 + $0xda] sm:$0xff]  ;;  %v6150_v4 = vld [vmem:[#allocation2 + $0xb0] sm:$0xff] }
  0x45   : > { %4024 = vmatmul.mubr.f32.gmra.mrb[10].mxu1 %v5590_v51  ;;  %4749 = vmatprep.subr.bf16.mxu1 %v4748_v10  ;;  %v497_v51 = vld [vmem:[%s6749_s3 + $0x78] sm:$0xff]  ;;  %6789 = vst [vmem:[#allocation16_spill] sm:$0xff] %v6150_v4 }
  0x46   : > { %4344 = vmatmul.mubr.f32.gmra.mrb[10].mxu0 %v5596_v55  ;;  %4026 = vmatprep.mubr.f32.mxu1 %v5594_v54  ;;  %v5857_v54 = vadd.f32 %v5456_v32, %v345_v45  ;;  %v3428_v32 = vld [vmem:[%s6749_s3 + $0x100] sm:$0xff]  ;;  %v3502_v45 = vld [vmem:[%s6749_s3 + $0x350] sm:$0xff] }
  0x47   : > { %4879 = vmatpush3.bf16.msra.mxu0 %v4876_v49  ;;  %4346 = vmatprep.mubr.f32.mxu0 %v5609_v1  ;;  %v4756_v49 = vpack.c.bf16 %v497_v51, %v496_v41  ;;  %v3498_v41 = vld [vmem:[%s6749_s3 + $0x330] sm:$0xff]  ;;  %v3500_v51 = vld [vmem:[%s6749_s3 + $0x340] sm:$0xff] }
  0x48   : > { %4881 = vmatprep.subr.bf16.mxu0 %v4880_v21  ;;  %4751 = vmatpush3.bf16.msra.mxu1 %v4748_v10  ;;  %6781 = vst [vmem:[#allocation8_spill] sm:$0xff] %v5857_v54  ;;  %v6753_v29 = vmax.f32 %v5857_v54, 0.0  ;;  %v5880_v10 = vld [vmem:[#allocation2 + $0x1a] sm:$0xff] }
  0x49   : > { %4027 = vmatmul.mubr.f32.gmra.mrb[12].mxu1 %v5596_v55  ;;  %4753 = vmatprep.subr.bf16.mxu1 %v4752_v23  ;;  %v3429_v55 = vld [vmem:[%s6749_s3 + $0x108] sm:$0xff]  ;;  %v3516_v54 = vld [vmem:[%s6749_s3 + $0x3c0] sm:$0xff] }
  0x4a   : > { %4347 = vmatmul.mubr.f32.gmra.mrb[12].mxu0 %v5627_v16  ;;  %4029 = vmatprep.mubr.f32.mxu1 %v5609_v1  ;;  %448 = vst [vmem:[#allocation2 + $0x181] sm:$0xff] %v6753_v29  ;;  %v3494_v1 = vld [vmem:[%s6749_s3 + $0x310] sm:$0xff]  ;;  %v6152_v29 = vld [vmem:[#allocation2 + $0xc0] sm:$0xff] }
  0x4b   : > { %4883 = vmatpush3.bf16.msra.mxu0 %v4880_v21  ;;  %4349 = vmatprep.mubr.f32.mxu0 %v5635_v25  ;;  %v5893_v21 = vpack.c.bf16 %v3429_v55, %v3428_v32  ;;  %v4892_v36 = vpack.c.bf16 %v3495_v11, %v3494_v1  ;;  %v3432_v32 = vld [vmem:[%s6749_s3 + $0x120] sm:$0xff]  ;;  %v3433_v55 = vld [vmem:[%s6749_s3 + $0x128] sm:$0xff]  ;;  %6790 = vst [vmem:[#allocation17_spill] sm:$0xff] %v6152_v29 }
  0x4c   : > { %4885 = vmatprep.subr.bf16.mxu0 %v4884_v5  ;;  %4755 = vmatpush3.bf16.msra.mxu1 %v4752_v23  ;;  %v3496_v23 = vld [vmem:[%s6749_s3 + $0x320] sm:$0xff]  ;;  %v6051_v11 = vld [vmem:[#allocation2 + $0x10a] sm:$0xff] }
  0x4d   : > { %4030 = vmatmul.mubr.f32.gmra.mrb[14].mxu1 %v5627_v16  ;;  %4757 = vmatprep.subr.bf16.mxu1 %v4756_v49  ;;  %v5900_v16 = vld [vmem:[#allocation2 + $0x32] sm:$0xff]  ;;  %v6047_v1 = vld [vmem:[#allocation2 + $0xfa] sm:$0xff] }
  0x4e   : > { %4350 = vmatmul.mubr.f32.gmra.mrb[14].mxu0 %v5637_v27  ;;  %4032 = vmatprep.mubr.f32.mxu1 %v5635_v25  ;;  %v3497_v25 = vld [vmem:[%s6749_s3 + $0x328] sm:$0xff] }
  0x4f   : > { %4887 = vmatpush3.bf16.msra.mxu0 %v4884_v5  ;;  %4408 = vmatprep.mubr.f32.mxu0 %v5880_v10  ;;  %v4896_v33 = vpack.c.bf16 %v3497_v25, %v3496_v23  ;;  %v3506_v5 = vld [vmem:[%s6749_s3 + $0x370] sm:$0xff]  ;;  %v3435_v23 = vld [vmem:[%s6749_s3 + $0x138] sm:$0xff] }
  0x50   : > { %4889 = vmatprep.subr.bf16.mxu0 %v4888_v30  ;;  %4759 = vmatpush3.bf16.msra.mxu1 %v4756_v49  ;;  %v6029_v49 = vld [vmem:[#allocation2 + $0x18] sm:$0xff] }
  0x51   : > { %4033 = vmatmul.mubr.f32.gmra.mrb[16].mxu1 %v5637_v27  ;;  %4761 = vmatprep.subr.bf16.mxu1 %v5893_v21  ;;  %v5916_v27 = vld [vmem:[#allocation2 + $0x4a] sm:$0xff]  ;;  %v6062_v25 = vld [vmem:[#allocation2 + $0x38] sm:$0xff] }
  0x52   : > { %4409 = vmatmul.mubr.f32.vlgmr.msra.gmra.mrb[0].mxu0 %v5898_v6  ;;  %4035 = vmatprep.mubr.f32.mxu1 %v402_v50  ;;  %v5930_v50 = vld [vmem:[#allocation2 + $0x52] sm:$0xff] }
  0x53   : > { %4891 = vmatpush3.bf16.msra.mxu0 %v4888_v30  ;;  %4411 = vmatprep.mubr.f32.mxu0 %v5900_v16  ;;  %v6043_v30 = vld [vmem:[#allocation2 + $0x20] sm:$0xff] }
  0x54   : > { %4893 = vmatprep.subr.bf16.mxu0 %v4892_v36 }
  0x55   : > { %4036 = vmatmul.mubr.f32.gmra.mrb[18].mxu1 %v403_v52  ;;  %v4900_v52 = vpack.c.bf16 %v3499_v38, %v3498_v41  ;;  %v6067_v41 = vld [vmem:[#allocation2 + $0x48] sm:$0xff] }
  0x56   : > { %4412 = vmatmul.mubr.f32.gmra.mrb[2].mxu0 %v5914_v3  ;;  %4038 = vmatprep.mubr.f32.mxu1 %v404_v53  ;;  %v5946_v53 = vld [vmem:[#allocation2 + $0x6a] sm:$0xff]  ;;  %v6069_v38 = vld [vmem:[#allocation2 + $0x122] sm:$0xff] }
  0x57   : > { %4414 = vmatprep.mubr.f32.mxu0 %v5916_v27  ;;  %4895 = vmatpush3.bf16.msra.mxu0 %v4892_v36  ;;  %v4768_v36 = vpack.c.bf16 %v3433_v55, %v3432_v32  ;;  %v6119_v32 = vld [vmem:[#allocation2 + $0x15a] sm:$0xff]  ;;  %v6121_v55 = vld [vmem:[#allocation2 + $0x90] sm:$0xff] }
  0x58   : > { %4897 = vmatprep.subr.bf16.mxu0 %v4896_v33  ;;  %6786 = vst [vmem:[#allocation13_spill] sm:$0xff] %v6121_v55 }
  0x59   : > { %4039 = vmatmul.mubr.f32.gmra.mrb[20].mxu1 %v405_v59  ;;  %v4904_v59 = vpack.c.bf16 %v3501_v40, %v3500_v51  ;;  %v3436_v51 = vld [vmem:[%s6749_s3 + $0x140] sm:$0xff]  ;;  %v3437_v40 = vld [vmem:[%s6749_s3 + $0x148] sm:$0xff] }
  0x5a   : > { %4415 = vmatmul.mubr.f32.gmra.mrb[4].mxu0 %v5930_v50  ;;  %4041 = vmatprep.mubr.f32.mxu1 %v406_v14  ;;  %v5962_v14 = vld [vmem:[#allocation2 + $0x82] sm:$0xff] }
  0x5b   : > { %4417 = vmatprep.mubr.f32.mxu0 %v5932_v39  ;;  %4899 = vmatpush3.bf16.msra.mxu0 %v4896_v33  ;;  %v6065_v33 = vld [vmem:[#allocation2 + $0x112] sm:$0xff] }
  0x5c   : > { %4901 = vmatprep.subr.bf16.mxu0 %v4900_v52 }
  0x5d   : > { %4042 = vmatmul.mubr.f32.gmra.mrb[22].mxu1 %v407_v15  ;;  %v4908_v15 = vpack.c.bf16 %v3503_v61, %v3502_v45  ;;  %v6083_v45 = vld [vmem:[#allocation2 + $0x12a] sm:$0xff]  ;;  %v6085_v61 = vld [vmem:[#allocation2 + $0x60] sm:$0xff] }
  0x5e   : > { %4418 = vmatmul.mubr.f32.gmra.mrb[6].mxu0 %v5946_v53  ;;  %4044 = vmatprep.mubr.f32.mxu1 %v408_v48  ;;  %v5978_v48 = vld [vmem:[#allocation2 + $0x9a] sm:$0xff] }
  0x5f   : > { %4420 = vmatprep.mubr.f32.mxu0 %v5948_v44  ;;  %4903 = vmatpush3.bf16.msra.mxu0 %v4900_v52 }
  0x60   : > { %4905 = vmatprep.subr.bf16.mxu0 %v4904_v59 }
  0x61   : > { %4045 = vmatmul.mubr.f32.gmra.mrb[24].mxu1 %v409_v43  ;;  %v4912_v43 = vpack.c.bf16 %v3505_v62, %v3504_v46  ;;  %v4776_v46 = vpack.c.bf16 %v3437_v40, %v3436_v51  ;;  %v3438_v62 = vld [vmem:[%s6749_s3 + $0x150] sm:$0xff]  ;;  %v6134_v51 = vld [vmem:[#allocation2 + $0x98] sm:$0xff] }
  0x62   : > { %4421 = vmatmul.mubr.f32.gmra.mrb[8].mxu0 %v5962_v14  ;;  %4047 = vmatprep.mubr.f32.mxu1 %v410_v2  ;;  %v5994_v2 = vld [vmem:[#allocation2 + $0xb2] sm:$0xff]  ;;  %6787 = vst [vmem:[#allocation14_spill] sm:$0xff] %v6134_v51 }
  0x63   : > { %4423 = vmatprep.mubr.f32.mxu0 %v5964_v63  ;;  %4907 = vmatpush3.bf16.msra.mxu0 %v4904_v59  ;;  %v6080_v59 = vld [vmem:[#allocation2 + $0x50] sm:$0xff] }
  0x64   : > { %4909 = vmatprep.subr.bf16.mxu0 %v4908_v15  ;;  %v6137_v40 = vld [vmem:[#allocation2 + $0x172] sm:$0xff] }
  0x65   : > { %4048 = vmatmul.mubr.f32.gmra.mrb[26].mxu1 %v411_v12  ;;  %v4916_v12 = vpack.c.bf16 %v3507_v60, %v3506_v5  ;;  %v6098_v5 = vld [vmem:[#allocation2 + $0x68] sm:$0xff] }
  0x66   : > { %4424 = vmatmul.mubr.f32.gmra.mrb[10].mxu0 %v5978_v48  ;;  %4050 = vmatprep.mubr.f32.mxu1 %v412_v24  ;;  %v6010_v24 = vld [vmem:[#allocation2 + $0xca] sm:$0xff]  ;;  %6783 = vst [vmem:[#allocation10_spill] sm:$0xff] %v6098_v5  ;;  %v6101_v60 = vld [vmem:[#allocation2 + $0x142] sm:$0xff] }
  0x67   : > { %4426 = vmatprep.mubr.f32.mxu0 %v5980_v17  ;;  %4911 = vmatpush3.bf16.msra.mxu0 %v4908_v15  ;;  %v6087_v15 = vld [vmem:[#allocation2 + $0x13a] sm:$0xff] }
  0x68   : > { %4913 = vmatprep.subr.bf16.mxu0 %v4912_v43 }
  0x69   : > { %4051 = vmatmul.mubr.f32.gmra.mrb[28].mxu1 %v413_v20  ;;  %v6014_v20 = vpack.c.bf16 %v3509_v58, %v3508_v42  ;;  %v6105_v42 = vld [vmem:[#allocation2 + $0x152] sm:$0xff] }
  0x6a   : > { %4427 = vmatmul.mubr.f32.gmra.mrb[12].mxu0 %v5994_v2  ;;  %4053 = vmatprep.mubr.f32.mxu1 %v414_v9  ;;  %v6027_v9 = vld [vmem:[#allocation2 + $0xe2] sm:$0xff] }
  0x6b   : > { %4429 = vmatprep.mubr.f32.mxu0 %v5996_v56  ;;  %4915 = vmatpush3.bf16.msra.mxu0 %v4912_v43  ;;  %v3439_v43 = vld [vmem:[%s6749_s3 + $0x158] sm:$0xff] }
  0x6c   : > { %4917 = vmatprep.subr.bf16.mxu0 %v4916_v12  ;;  %v4780_v58 = vpack.c.bf16 %v3439_v43, %v3438_v62  ;;  %v1945_v62 = vld [vmem:[#allocation2 + $0x182] sm:$0xff] }
  0x6d   : > { %4054 = vmatmul.mubr.f32.gmra.mrb[30].mxu1 %v415_v34  ;;  %v4764_v34 = vpack.c.bf16 %v3431_v35, %v3430_v31  ;;  %v3440_v31 = vld [vmem:[%s6749_s3 + $0x160] sm:$0xff]  ;;  %v3441_v35 = vld [vmem:[%s6749_s3 + $0x168] sm:$0xff] }
  0x6e   : > { %4430 = vmatmul.mubr.f32.gmra.mrb[14].mxu0 %v6010_v24  ;;  %4088 = vmatprep.mubr.f32.mxu1 %v5277_v7 }
  0x6f   : > { %4432 = vmatprep.mubr.f32.mxu0 %v6012_v0  ;;  %4919 = vmatpush3.bf16.msra.mxu0 %v4916_v12  ;;  %v6103_v12 = vld [vmem:[#allocation2 + $0x78] sm:$0xff] }
  0x70   : > { %4921 = vmatprep.subr.bf16.mxu0 %v6014_v20  ;;  %6784 = vst [vmem:[#allocation11_spill] sm:$0xff] %v6103_v12 }
  0x71   : > { %4089 = vmatmul.mubr.f32.vlgmr.msra.gmra.mrb[0].mxu1 %v5277_v7  ;;  %v6049_v7 = vld [vmem:[#allocation2 + $0x30] sm:$0xff] }
  0x72   : > { %4433 = vmatmul.mubr.f32.gmra.mrb[16].mxu0 %v6027_v9  ;;  %4763 = vmatpush3.bf16.msra.mxu1 %v5893_v21  ;;  %v3434_v21 = vld [vmem:[%s6749_s3 + $0x130] sm:$0xff] }
  0x73   : > { %4091 = vmatprep.mubr.f32.mxu1 %v6029_v49  ;;  %4435 = vmatprep.mubr.f32.mxu0 %v6031_v28  ;;  %v4772_v52 = vpack.c.bf16 %v3435_v23, %v3434_v21  ;;  %v4784_v21 = vpack.c.bf16 %v3441_v35, %v3440_v31  ;;  %v3442_v23 = vld [vmem:[%s6749_s3 + $0x170] sm:$0xff]  ;;  %v3444_v31 = vld [vmem:[%s6749_s3 + $0x180] sm:$0xff]  ;;  %v3445_v35 = vld [vmem:[%s6749_s3 + $0x188] sm:$0xff] }
  0x74   : > { %4765 = vmatprep.subr.bf16.mxu1 %v4764_v34 }
  0x75   : > { %4092 = vmatmul.mubr.f32.gmra.mrb[2].mxu1 %v6043_v30 }
  0x76   : > { %4436 = vmatmul.mubr.f32.gmra.mrb[18].mxu0 %v6047_v1  ;;  %4094 = vmatprep.mubr.f32.mxu1 %v6049_v7 }
  0x77   : > { %4438 = vmatprep.mubr.f32.mxu0 %v6051_v11  ;;  %4767 = vmatpush3.bf16.msra.mxu1 %v4764_v34  ;;  %v6116_v34 = vld [vmem:[#allocation2 + $0x80] sm:$0xff] }
  0x78   : > { %4769 = vmatprep.subr.bf16.mxu1 %v4768_v36  ;;  %6785 = vst [vmem:[#allocation12_spill] sm:$0xff] %v6116_v34 }
  0x79   : > { %4095 = vmatmul.mubr.f32.gmra.mrb[4].mxu1 %v6062_v25 }
  0x7a   : > { %4439 = vmatmul.mubr.f32.gmra.mrb[20].mxu0 %v6065_v33  ;;  %4097 = vmatprep.mubr.f32.mxu1 %v6067_v41 }
  0x7b   : > { %4441 = vmatprep.mubr.f32.mxu0 %v6069_v38  ;;  %4771 = vmatpush3.bf16.msra.mxu1 %v4768_v36  ;;  %v6123_v36 = vld [vmem:[#allocation2 + $0x16a] sm:$0xff] }
  0x7c   : > { %4773 = vmatprep.subr.bf16.mxu1 %v4772_v52 }
  0x7d   : > { %4098 = vmatmul.mubr.f32.gmra.mrb[6].mxu1 %v6080_v59 }
  0x7e   : > { %4442 = vmatmul.mubr.f32.gmra.mrb[22].mxu0 %v6083_v45  ;;  %4100 = vmatprep.mubr.f32.mxu1 %v6085_v61 }
  0x7f   : > { %4444 = vmatprep.mubr.f32.mxu0 %v6087_v15  ;;  %4775 = vmatpush3.bf16.msra.mxu1 %v4772_v52  ;;  %v3443_v52 = vld [vmem:[%s6749_s3 + $0x178] sm:$0xff] }
  0x80   : > { %4777 = vmatprep.subr.bf16.mxu1 %v4776_v46  ;;  %v4788_v43 = vpack.c.bf16 %v3443_v52, %v3442_v23  ;;  %v6154_v23 = vpack.c.bf16 %v3445_v35, %v3444_v31  ;;  %v3510_v52 = vld [vmem:[%s6749_s3 + $0x390] sm:$0xff]  ;;  %v3512_v35 = vld [vmem:[%s6749_s3 + $0x3a0] sm:$0xff] }
  0x81   : > { %4101 = vmatmul.mubr.f32.gmra.mrb[8].mxu1 %v6098_v5  ;;  %v4924_v31 = vpack.c.bf16 %v3511_v47, %v3510_v52  ;;  %v6183_v47 = vld [vmem:[#allocation2 + $0xf0] sm:$0xff] }
  0x82   : > { %4445 = vmatmul.mubr.f32.gmra.mrb[24].mxu0 %v6101_v60  ;;  %4103 = vmatprep.mubr.f32.mxu1 %v6103_v12  ;;  %v3514_v52 = vld [vmem:[%s6749_s3 + $0x3b0] sm:$0xff] }
  0x83   : > { %4447 = vmatprep.mubr.f32.mxu0 %v6105_v42  ;;  %4779 = vmatpush3.bf16.msra.mxu1 %v4776_v46  ;;  %v6139_v46 = vld [vmem:[#allocation2 + $0xa8] sm:$0xff] }
  0x84   : > { %4781 = vmatprep.subr.bf16.mxu1 %v4780_v58  ;;  %6788 = vst [vmem:[#allocation15_spill] sm:$0xff] %v6139_v46 }
  0x85   : > { %4104 = vmatmul.mubr.f32.gmra.mrb[10].mxu1 %v6116_v34 }
  0x86   : > { %4448 = vmatmul.mubr.f32.gmra.mrb[26].mxu0 %v6119_v32  ;;  %4106 = vmatprep.mubr.f32.mxu1 %v6121_v55 }
  0x87   : > { %4450 = vmatprep.mubr.f32.mxu0 %v6123_v36  ;;  %4783 = vmatpush3.bf16.msra.mxu1 %v4780_v58  ;;  %v1946_v58 = vld [vmem:[#allocation2 + $0x18a] sm:$0xff] }
  0x88   : > { %4785 = vmatprep.subr.bf16.mxu1 %v4784_v21 }
  0x89   : > { %4107 = vmatmul.mubr.f32.gmra.mrb[12].mxu1 %v6134_v51 }
  0x8a   : > { %4451 = vmatmul.mubr.f32.gmra.mrb[28].mxu0 %v6137_v40  ;;  %4109 = vmatprep.mubr.f32.mxu1 %v6139_v46 }
  0x8b   : > { %4453 = vmatprep.mubr.f32.mxu0 %v1945_v62  ;;  %4787 = vmatpush3.bf16.msra.mxu1 %v4784_v21  ;;  %v6164_v62 = vld [vmem:[#allocation2 + $0xc8] sm:$0xff]  ;;  %v6167_v21 = vld [vmem:[#allocation2 + $0xd8] sm:$0xff] }
  0x8c   : > { %4789 = vmatprep.subr.bf16.mxu1 %v4788_v43  ;;  %6791 = vst [vmem:[#allocation18_spill] sm:$0xff] %v6164_v62 }
  0x8d   : > { %4110 = vmatmul.mubr.f32.gmra.mrb[14].mxu1 %v6150_v4 }
  0x8e   : > { %4454 = vmatmul.mubr.f32.gmra.mrb[30].mxu0 %v1946_v58  ;;  %4112 = vmatprep.mubr.f32.mxu1 %v6152_v29  ;;  %v3513_v58 = vld [vmem:[%s6749_s3 + $0x3a8] sm:$0xff] }
  0x8f   : > { %4488 = vmatprep.mubr.f32.mxu0 %v6049_v7  ;;  %4791 = vmatpush3.bf16.msra.mxu1 %v4788_v43  ;;  %v4928_v43 = vpack.c.bf16 %v3513_v58, %v3512_v35  ;;  %v6197_v35 = vld [vmem:[#allocation2 + $0x108] sm:$0xff]  ;;  %v4932_v58 = vpack.c.bf16 %v3515_v19, %v3514_v52  ;;  %v4936_v19 = vpack.c.bf16 %v3517_v57, %v3516_v54  ;;  %v3518_v52 = vld [vmem:[%s6749_s3 + $0x3d0] sm:$0xff]  ;;  %v3520_v54 = vld [vmem:[%s6749_s3 + $0x3e0] sm:$0xff] }
  0x90   : > { %4793 = vmatprep.subr.bf16.mxu1 %v6154_v23 }
  0x91   : > { %4113 = vmatmul.mubr.f32.gmra.mrb[16].mxu1 %v6164_v62 }
  0x92   : > { %4489 = vmatmul.mubr.f32.vlgmr.msra.gmra.mrb[0].mxu0 %v6062_v25  ;;  %4115 = vmatprep.mubr.f32.mxu1 %v6167_v21 }
  0x93   : > { %4923 = vmatpush3.bf16.msra.mxu0 %v6014_v20  ;;  %4491 = vmatprep.mubr.f32.mxu0 %v6067_v41  ;;  %v6194_v20 = vld [vmem:[#allocation2 + $0xf8] sm:$0xff] }
  0x94   : > { %4925 = vmatprep.subr.bf16.mxu0 %v4924_v31 }
  0x95   : > { %4116 = vmatmul.mubr.f32.gmra.mrb[18].mxu1 %v6179_v22 }
  0x96   : > { %4492 = vmatmul.mubr.f32.gmra.mrb[2].mxu0 %v6080_v59  ;;  %4118 = vmatprep.mubr.f32.mxu1 %v6183_v47 }
  0x97   : > { %4494 = vmatprep.mubr.f32.mxu0 %v6085_v61  ;;  %4927 = vmatpush3.bf16.msra.mxu0 %v4924_v31  ;;  %v6211_v31 = vld [vmem:[#allocation2 + $0x120] sm:$0xff] }
  0x98   : > { %4929 = vmatprep.subr.bf16.mxu0 %v4928_v43 }
  0x99   : > { %4119 = vmatmul.mubr.f32.gmra.mrb[20].mxu1 %v6194_v20 }
  0x9a   : > { %4495 = vmatmul.mubr.f32.gmra.mrb[4].mxu0 %v6098_v5  ;;  %4121 = vmatprep.mubr.f32.mxu1 %v6197_v35  ;;  %v3519_v5 = vld [vmem:[%s6749_s3 + $0x3d8] sm:$0xff] }
  0x9b   : > { %4497 = vmatprep.mubr.f32.mxu0 %v6103_v12  ;;  %4931 = vmatpush3.bf16.msra.mxu0 %v4928_v43  ;;  %v6222_v12 = vld [vmem:[#allocation2 + $0x128] sm:$0xff]  ;;  %v6225_v43 = vld [vmem:[#allocation2 + $0x138] sm:$0xff]  ;;  %v4940_v57 = vpack.c.bf16 %v3519_v5, %v3518_v52  ;;  %v3522_v52 = vld [vmem:[%s6749_s3 + $0x3f0] sm:$0xff] }
  0x9c   : > { %4933 = vmatprep.subr.bf16.mxu0 %v4932_v58 }
  0x9d   : > { %4122 = vmatmul.mubr.f32.gmra.mrb[22].mxu1 %v6208_v37 }
  0x9e   : > { %4498 = vmatmul.mubr.f32.gmra.mrb[6].mxu0 %v6116_v34  ;;  %4124 = vmatprep.mubr.f32.mxu1 %v6211_v31  ;;  %v3521_v34 = vld [vmem:[%s6749_s3 + $0x3e8] sm:$0xff] }
  0x9f   : > { %4500 = vmatprep.mubr.f32.mxu0 %v6121_v55  ;;  %4935 = vmatpush3.bf16.msra.mxu0 %v4932_v58  ;;  %v6236_v55 = vld [vmem:[#allocation2 + $0x140] sm:$0xff]  ;;  %v6239_v58 = vld [vmem:[#allocation2 + $0x150] sm:$0xff]  ;;  %v4944_v5 = vpack.c.bf16 %v3521_v34, %v3520_v54 }
  0xa0   : > { %4937 = vmatprep.subr.bf16.mxu0 %v4936_v19  ;;  %v3524_v54 = vld [vmem:[%s6749_s3 + $0x400] sm:$0xff] }
  0xa1   : > { %4125 = vmatmul.mubr.f32.gmra.mrb[24].mxu1 %v6222_v12 }
  0xa2   : > { %4501 = vmatmul.mubr.f32.gmra.mrb[8].mxu0 %v6134_v51  ;;  %4127 = vmatprep.mubr.f32.mxu1 %v6225_v43  ;;  %v3523_v51 = vld [vmem:[%s6749_s3 + $0x3f8] sm:$0xff] }
  0xa3   : > { %4503 = vmatprep.mubr.f32.mxu0 %v6139_v46  ;;  %4939 = vmatpush3.bf16.msra.mxu0 %v4936_v19  ;;  %v6250_v46 = vld [vmem:[#allocation2 + $0x158] sm:$0xff]  ;;  %v6253_v19 = vld [vmem:[#allocation2 + $0x168] sm:$0xff]  ;;  %v4948_v34 = vpack.c.bf16 %v3523_v51, %v3522_v52  ;;  %v3446_v52 = vld [vmem:[%s6749_s3 + $0x190] sm:$0xff] }
  0xa4   : > { %4941 = vmatprep.subr.bf16.mxu0 %v4940_v57 }
  0xa5   : > { %4128 = vmatmul.mubr.f32.gmra.mrb[26].mxu1 %v6236_v55 }
  0xa6   : > { %4504 = vmatmul.mubr.f32.gmra.mrb[10].mxu0 %v6150_v4  ;;  %4130 = vmatprep.mubr.f32.mxu1 %v6239_v58  ;;  %v3525_v4 = vld [vmem:[%s6749_s3 + $0x408] sm:$0xff] }
  0xa7   : > { %4506 = vmatprep.mubr.f32.mxu0 %v6152_v29  ;;  %4943 = vmatpush3.bf16.msra.mxu0 %v4940_v57  ;;  %v6264_v29 = vld [vmem:[#allocation2 + $0x170] sm:$0xff]  ;;  %v997_v57 = vld [vmem:[#allocation2 + $0x2] sm:$0xff]  ;;  %v6267_v51 = vpack.c.bf16 %v3525_v4, %v3524_v54 }
  0xa8   : > { %4945 = vmatprep.subr.bf16.mxu0 %v4944_v5  ;;  %v3448_v4 = vld [vmem:[%s6749_s3 + $0x1a0] sm:$0xff]  ;;  %v3449_v54 = vld [vmem:[%s6749_s3 + $0x1a8] sm:$0xff] }
  0xa9   : > { %4131 = vmatmul.mubr.f32.gmra.mrb[28].mxu1 %v6250_v46 }
  0xaa   : > { %4507 = vmatmul.mubr.f32.gmra.mrb[12].mxu0 %v6164_v62  ;;  %4133 = vmatprep.mubr.f32.mxu1 %v6253_v19  ;;  %v3447_v62 = vld [vmem:[%s6749_s3 + $0x198] sm:$0xff] }
  0xab   : > { %4509 = vmatprep.mubr.f32.mxu0 %v6167_v21  ;;  %4947 = vmatpush3.bf16.msra.mxu0 %v4944_v5  ;;  %v4796_v5 = vpack.c.bf16 %v3447_v62, %v3446_v52  ;;  %v4800_v62 = vpack.c.bf16 %v3449_v54, %v3448_v4  ;;  %v3457_v52 = vld [vmem:[%s6749_s3 + $0x1e8] sm:$0xff]  ;;  %v3459_v4 = vld [vmem:[%s6749_s3 + $0x1f8] sm:$0xff] }
  0xac   : > { %4949 = vmatprep.subr.bf16.mxu0 %v4948_v34 }
  0xad   : > { %4134 = vmatmul.mubr.f32.gmra.mrb[30].mxu1 %v6264_v29 }
  0xae   : > { %4510 = vmatmul.mubr.f32.gmra.mrb[14].mxu0 %v6179_v22  ;;  %4168 = vmatprep.mubr.f32.mxu1 %v997_v57  ;;  %v3455_v57 = vld [vmem:[%s6749_s3 + $0x1d8] sm:$0xff] }
  0xaf   : > { %4512 = vmatprep.mubr.f32.mxu0 %v6183_v47  ;;  %4951 = vmatpush3.bf16.msra.mxu0 %v4948_v34  ;;  %v3451_v34 = vld [vmem:[%s6749_s3 + $0x1b8] sm:$0xff] }
  0xb0   : > { %4953 = vmatprep.subr.bf16.mxu0 %v6267_v51 }
  0xb1   : > { %4169 = vmatmul.mubr.f32.vlgmr.msra.gmra.mrb[0].mxu1 %v998_v26  ;;  %v3450_v26 = vld [vmem:[%s6749_s3 + $0x1b0] sm:$0xff] }
  0xb2   : > { %4513 = vmatmul.mubr.f32.gmra.mrb[16].mxu0 %v6194_v20  ;;  %4795 = vmatpush3.bf16.msra.mxu1 %v6154_v23  ;;  %v3453_v23 = vld [vmem:[%s6749_s3 + $0x1c8] sm:$0xff] }
  0xb3   : > { %4171 = vmatprep.mubr.f32.mxu1 %v5880_v10  ;;  %4515 = vmatprep.mubr.f32.mxu0 %v6197_v35  ;;  %v4804_v10 = vpack.c.bf16 %v3451_v34, %v3450_v26  ;;  %v3527_v26 = vld [vmem:[%s6749_s3 + $0x418] sm:$0xff] }
  0xb4   : > { %4797 = vmatprep.subr.bf16.mxu1 %v4796_v5 }
  0xb5   : > { %4172 = vmatmul.mubr.f32.gmra.mrb[2].mxu1 %v5898_v6  ;;  %v3452_v6 = vld [vmem:[%s6749_s3 + $0x1c0] sm:$0xff] }
  0xb6   : > { %4516 = vmatmul.mubr.f32.gmra.mrb[18].mxu0 %v6208_v37  ;;  %4174 = vmatprep.mubr.f32.mxu1 %v5900_v16  ;;  %v4808_v16 = vpack.c.bf16 %v3453_v23, %v3452_v6  ;;  %v2532_v6 = vld [vmem:[#allocation2 + $0x61] sm:$0xff] }
  0xb7   : > { %4518 = vmatprep.mubr.f32.mxu0 %v6211_v31  ;;  %4799 = vmatpush3.bf16.msra.mxu1 %v4796_v5 }
  0xb8   : > { %4801 = vmatprep.subr.bf16.mxu1 %v4800_v62 }
  0xb9   : > { %4175 = vmatmul.mubr.f32.gmra.mrb[4].mxu1 %v5914_v3  ;;  %v3454_v3 = vld [vmem:[%s6749_s3 + $0x1d0] sm:$0xff] }
  0xba   : > { %4519 = vmatmul.mubr.f32.gmra.mrb[20].mxu0 %v6222_v12  ;;  %4177 = vmatprep.mubr.f32.mxu1 %v5916_v27  ;;  %v4812_v27 = vpack.c.bf16 %v3455_v57, %v3454_v3  ;;  %v3533_v57 = vld [vmem:[%s6749_s3 + $0x448] sm:$0xff] }
  0xbb   : > { %4521 = vmatprep.mubr.f32.mxu0 %v6225_v43  ;;  %4803 = vmatpush3.bf16.msra.mxu1 %v4800_v62  ;;  %v2528_v62 = vld [vmem:[#allocation2 + $0x31] sm:$0xff] }
  0xbc   : > { %4805 = vmatprep.subr.bf16.mxu1 %v4804_v10 }
  0xbd   : > { %4178 = vmatmul.mubr.f32.gmra.mrb[6].mxu1 %v5930_v50  ;;  %v3456_v50 = vld [vmem:[%s6749_s3 + $0x1e0] sm:$0xff] }
  0xbe   : > { %4522 = vmatmul.mubr.f32.gmra.mrb[22].mxu0 %v6236_v55  ;;  %4180 = vmatprep.mubr.f32.mxu1 %v5932_v39  ;;  %v6329_v39 = vld [vmem:[#allocation2 + $0x180] sm:$0xff]  ;;  %v4816_v5 = vpack.c.bf16 %v3457_v52, %v3456_v50  ;;  %v3535_v52 = vld [vmem:[%s6749_s3 + $0x458] sm:$0xff] }
  0xbf   : > { %4524 = vmatprep.mubr.f32.mxu0 %v6239_v58  ;;  %4807 = vmatpush3.bf16.msra.mxu1 %v4804_v10  ;;  %v3529_v10 = vld [vmem:[%s6749_s3 + $0x428] sm:$0xff] }
  0xc0   : > { %4809 = vmatprep.subr.bf16.mxu1 %v4808_v16 }
  0xc1   : > { %4181 = vmatmul.mubr.f32.gmra.mrb[8].mxu1 %v5946_v53  ;;  %v3458_v53 = vld [vmem:[%s6749_s3 + $0x1f0] sm:$0xff] }
  0xc2   : > { %4525 = vmatmul.mubr.f32.gmra.mrb[24].mxu0 %v6250_v46  ;;  %4183 = vmatprep.mubr.f32.mxu1 %v5948_v44  ;;  %v6341_v44 = vld [vmem:[#allocation2 + $0x188] sm:$0xff]  ;;  %v4820_v54 = vpack.c.bf16 %v3459_v4, %v3458_v53 }
  0xc3   : > { %4527 = vmatprep.mubr.f32.mxu0 %v6253_v19  ;;  %4811 = vmatpush3.bf16.msra.mxu1 %v4808_v16  ;;  %v3531_v16 = vld [vmem:[%s6749_s3 + $0x438] sm:$0xff]  ;;  %v3537_v4 = vld [vmem:[%s6749_s3 + $0x468] sm:$0xff] }
  0xc4   : > { %4813 = vmatprep.subr.bf16.mxu1 %v4812_v27 }
  0xc5   : > { %4184 = vmatmul.mubr.f32.gmra.mrb[10].mxu1 %v5962_v14  ;;  %v5265_v14 = vld [vmem:[#allocation2] sm:$0xff] }
  0xc6   : > { %4528 = vmatmul.mubr.f32.gmra.mrb[26].mxu0 %v6264_v29  ;;  %4186 = vmatprep.mubr.f32.mxu1 %v5964_v63  ;;  %v3526_v63 = vld [vmem:[%s6749_s3 + $0x410] sm:$0xff] }
  0xc7   : > { %4530 = vmatprep.mubr.f32.mxu0 %v6329_v39  ;;  %4815 = vmatpush3.bf16.msra.mxu1 %v4812_v27  ;;  %v4956_v34 = vpack.c.bf16 %v3527_v26, %v3526_v63  ;;  %v2536_v27 = vld [vmem:[#allocation2 + $0x91] sm:$0xff]  ;;  %v6404_v63 = vld [vmem:[#allocation2 + $0xd9] sm:$0xff] }
  0xc8   : > { %4817 = vmatprep.subr.bf16.mxu1 %v4816_v5 }
  0xc9   : > { %4187 = vmatmul.mubr.f32.gmra.mrb[12].mxu1 %v5978_v48  ;;  %v2529_v48 = vld [vmem:[#allocation2 + $0x39] sm:$0xff] }
  0xca   : > { %4531 = vmatmul.mubr.f32.gmra.mrb[28].mxu0 %v6341_v44  ;;  %4189 = vmatprep.mubr.f32.mxu1 %v5980_v17  ;;  %v2530_v17 = vld [vmem:[#allocation2 + $0x49] sm:$0xff] }
  0xcb   : > { %4533 = vmatprep.mubr.f32.mxu0 %v5265_v14  ;;  %4819 = vmatpush3.bf16.msra.mxu1 %v4816_v5  ;;  %v2538_v5 = vld [vmem:[#allocation2 + $0xa9] sm:$0xff] }
  0xcc   : > { %4821 = vmatprep.subr.bf16.mxu1 %v4820_v54 }
  0xcd   : > { %4190 = vmatmul.mubr.f32.gmra.mrb[14].mxu1 %v5994_v2  ;;  %v3528_v2 = vld [vmem:[%s6749_s3 + $0x420] sm:$0xff] }
  0xce   : > { %4534 = vmatmul.mubr.f32.gmra.mrb[30].mxu0 %v5265_v14  ;;  %4192 = vmatprep.mubr.f32.mxu1 %v5996_v56  ;;  %v2531_v56 = vld [vmem:[#allocation2 + $0x51] sm:$0xff]  ;;  %v4960_v23 = vpack.c.bf16 %v3529_v10, %v3528_v2  ;;  %v6798_v2 = vld [vmem:[#allocation5_spill] sm:$0xff]  ;;  %v6799_v10 = vld [vmem:[#allocation14_spill] sm:$0xff] }
  0xcf   : > { %4568 = vmatprep.mubr.f32.mxu0 %v2528_v62  ;;  %4823 = vmatpush3.bf16.msra.mxu1 %v4820_v54  ;;  %v2540_v54 = vld [vmem:[#allocation2 + $0xc1] sm:$0xff]  ;;  %v3539_v62 = vld [vmem:[%s6749_s3 + $0x478] sm:$0xff] }
  0xd0   : > { %4984 = vmatprep.subr.bf16.mxu1 %v5378_v8 }
  0xd1   : > { %4193 = vmatmul.mubr.f32.gmra.mrb[16].mxu1 %v6010_v24  ;;  %v3530_v24 = vld [vmem:[%s6749_s3 + $0x430] sm:$0xff] }
  0xd2   : > { %4569 = vmatmul.mubr.f32.vlgmr.msra.gmra.mrb[0].mxu0 %v2529_v48  ;;  %4195 = vmatprep.mubr.f32.mxu1 %v6012_v0  ;;  %v2533_v0 = vld [vmem:[#allocation2 + $0x69] sm:$0xff]  ;;  %v4964_v3 = vpack.c.bf16 %v3531_v16, %v3530_v24  ;;  %v6411_v48 = vld [vmem:[#allocation2 + $0xf1] sm:$0xff]  ;;  %v2558_v16 = vld [vmem:[#allocation2 + $0x199] sm:$0xff] }
  0xd3   : > { %4955 = vmatpush3.bf16.msra.mxu0 %v6267_v51  ;;  %4571 = vmatprep.mubr.f32.mxu0 %v2530_v17  ;;  %v2534_v51 = vld [vmem:[#allocation2 + $0x79] sm:$0xff] }
  0xd4   : > { %4957 = vmatprep.subr.bf16.mxu0 %v4956_v34  ;;  %v5266_v17 = vld [vmem:[#allocation2 + $0x159] sm:$0xff] }
  0xd5   : > { %4196 = vmatmul.mubr.f32.gmra.mrb[18].mxu1 %v6027_v9  ;;  %v3532_v9 = vld [vmem:[%s6749_s3 + $0x440] sm:$0xff] }
  0xd6   : > { %4572 = vmatmul.mubr.f32.gmra.mrb[2].mxu0 %v2531_v56  ;;  %4198 = vmatprep.mubr.f32.mxu1 %v6031_v28  ;;  %v2535_v28 = vld [vmem:[#allocation2 + $0x81] sm:$0xff]  ;;  %v4968_v50 = vpack.c.bf16 %v3533_v57, %v3532_v9  ;;  %v5268_v56 = vld [vmem:[#allocation2 + $0x171] sm:$0xff] }
  0xd7   : > { %4574 = vmatprep.mubr.f32.mxu0 %v2532_v6  ;;  %4959 = vmatpush3.bf16.msra.mxu0 %v4956_v34  ;;  %v5267_v34 = vld [vmem:[#allocation2 + $0x169] sm:$0xff]  ;;  %v6807_v57 = vld [vmem:[#allocation17_spill] sm:$0xff] }
  0xd8   : > { %4961 = vmatprep.subr.bf16.mxu0 %v4960_v23  ;;  %v6800_v6 = vld [vmem:[#allocation15_spill] sm:$0xff] }
  0xd9   : > { %4199 = vmatmul.mubr.f32.gmra.mrb[20].mxu1 %v6047_v1  ;;  %v3534_v1 = vld [vmem:[%s6749_s3 + $0x450] sm:$0xff] }
  0xda   : > { %4575 = vmatmul.mubr.f32.gmra.mrb[4].mxu0 %v2533_v0  ;;  %4201 = vmatprep.mubr.f32.mxu1 %v6051_v11  ;;  %v2537_v11 = vld [vmem:[#allocation2 + $0x99] sm:$0xff]  ;;  %v4972_v53 = vpack.c.bf16 %v3535_v52, %v3534_v1  ;;  %v6803_v0 = vld [vmem:[#allocation6_spill] sm:$0xff] }
  0xdb   : > { %4577 = vmatprep.mubr.f32.mxu0 %v2534_v51  ;;  %4963 = vmatpush3.bf16.msra.mxu0 %v4960_v23  ;;  %v6801_v23 = vld [vmem:[#allocation8_spill] sm:$0xff]  ;;  %v6809_v1 = vld [vmem:[#allocation18_spill] sm:$0xff] }
  0xdc   : > { %4965 = vmatprep.subr.bf16.mxu0 %v4964_v3  ;;  %v6802_v24 = vmax.f32 %v6801_v23, 0.0  ;;  %v6804_v51 = vld [vmem:[#allocation16_spill] sm:$0xff] }
  0xdd   : > { %4202 = vmatmul.mubr.f32.gmra.mrb[22].mxu1 %v6065_v33  ;;  %v3536_v33 = vld [vmem:[%s6749_s3 + $0x460] sm:$0xff] }
  0xde   : > { %4578 = vmatmul.mubr.f32.gmra.mrb[6].mxu0 %v2535_v28  ;;  %4204 = vmatprep.mubr.f32.mxu1 %v6069_v38  ;;  %v2539_v38 = vld [vmem:[#allocation2 + $0xb1] sm:$0xff]  ;;  %v4976_v14 = vpack.c.bf16 %v3537_v4, %v3536_v33  ;;  %v2559_v28 = vld [vmem:[#allocation2 + $0x1a1] sm:$0xff] }
  0xdf   : > { %4580 = vmatprep.mubr.f32.mxu0 %v2536_v27  ;;  %4967 = vmatpush3.bf16.msra.mxu0 %v4964_v3  ;;  %v6805_v3 = vld [vmem:[#allocation9_spill] sm:$0xff]  ;;  %v2834_v27 = vld [vmem:[#allocation2 + $0x32] sm:$0xff] }
  0xe0   : > { %4969 = vmatprep.subr.bf16.mxu0 %v4968_v50  ;;  %v6806_v9 = vmax.f32 %v6805_v3, 0.0  ;;  %v2835_v52 = vld [vmem:[#allocation2 + $0x3a] sm:$0xff]  ;;  %v2842_v4 = vld [vmem:[#allocation2 + $0x92] sm:$0xff] }
  0xe1   : > { %4205 = vmatmul.mubr.f32.gmra.mrb[24].mxu1 %v6083_v45  ;;  %v3538_v45 = vld [vmem:[%s6749_s3 + $0x470] sm:$0xff]  ;;  %v2840_v33 = vld [vmem:[#allocation2 + $0x7a] sm:$0xff] }
  0xe2   : > { %4581 = vmatmul.mubr.f32.gmra.mrb[8].mxu0 %v2537_v11  ;;  %4207 = vmatprep.mubr.f32.mxu1 %v6087_v15  ;;  %v2541_v15 = vld [vmem:[#allocation2 + $0xc9] sm:$0xff]  ;;  %v4980_v26 = vpack.c.bf16 %v3539_v62, %v3538_v45  ;;  %v1636_v62 = vld [vmem:[#allocation2 + $0x159] sm:$0xff] }
  0xe3   : > { %4583 = vmatprep.mubr.f32.mxu0 %v2538_v5  ;;  %4971 = vmatpush3.bf16.msra.mxu0 %v4968_v50  ;;  %v6808_v50 = vld [vmem:[#allocation7_spill] sm:$0xff] }
  0xe4   : > { %4973 = vmatprep.subr.bf16.mxu0 %v4972_v53  ;;  %v2836_v11 = vld [vmem:[#allocation2 + $0x4a] sm:$0xff]  ;;  %v2837_v5 = vld [vmem:[#allocation2 + $0x52] sm:$0xff] }
  0xe5   : > { %4208 = vmatmul.mubr.f32.gmra.mrb[26].mxu1 %v6101_v60  ;;  %v6409_v60 = vld [vmem:[#allocation2 + $0xe1] sm:$0xff]  ;;  %v2860_v45 = vld [vmem:[#allocation2 + $0x16a] sm:$0xff] }
  0xe6   : > { %4584 = vmatmul.mubr.f32.gmra.mrb[10].mxu0 %v2539_v38  ;;  %4210 = vmatprep.mubr.f32.mxu1 %v6105_v42  ;;  %v6417_v42 = vld [vmem:[#allocation2 + $0xf9] sm:$0xff]  ;;  %v2857_v38 = vld [vmem:[#allocation2 + $0x142] sm:$0xff] }
  0xe7   : > { %4586 = vmatprep.mubr.f32.mxu0 %v2540_v54  ;;  %4975 = vmatpush3.bf16.msra.mxu0 %v4972_v53  ;;  %v2838_v53 = vld [vmem:[#allocation2 + $0x62] sm:$0xff]  ;;  %v2858_v54 = vld [vmem:[#allocation2 + $0x152] sm:$0xff] }
  0xe8   : > { %4977 = vmatprep.subr.bf16.mxu0 %v4976_v14 }
  0xe9   : > { %4211 = vmatmul.mubr.f32.gmra.mrb[28].mxu1 %v6119_v32  ;;  %v6419_v32 = vld [vmem:[#allocation2 + $0x109] sm:$0xff] }
  0xea   : > { %4587 = vmatmul.mubr.f32.gmra.mrb[12].mxu0 %v2541_v15  ;;  %4213 = vmatprep.mubr.f32.mxu1 %v6123_v36  ;;  %v6426_v36 = vld [vmem:[#allocation2 + $0x111] sm:$0xff] }
  0xeb   : > { %4589 = vmatprep.mubr.f32.mxu0 %v6404_v63  ;;  %4979 = vmatpush3.bf16.msra.mxu0 %v4976_v14  ;;  %v2859_v14 = vld [vmem:[#allocation2 + $0x15a] sm:$0xff]  ;;  %v2861_v15 = vld [vmem:[#allocation2 + $0x172] sm:$0xff] }
  0xec   : > { %4981 = vmatprep.subr.bf16.mxu0 %v4980_v26 }
  0xed   : > { %4214 = vmatmul.mubr.f32.gmra.mrb[30].mxu1 %v6137_v40  ;;  %v6794_v40 = vld [vmem:[#allocation11_spill] sm:$0xff] }
  0xee   : > { %4590 = vmatmul.mubr.f32.gmra.mrb[14].mxu0 %v6409_v60  ;;  %4248 = vmatprep.mubr.f32.mxu1 %v6029_v49  ;;  %v6428_v49 = vld [vmem:[#allocation2 + $0x121] sm:$0xff] }
  0xef   : > { %4592 = vmatprep.mubr.f32.mxu0 %v6411_v48  ;;  %4983 = vmatpush3.bf16.msra.mxu0 %v4980_v26  ;;  %v2862_v26 = vld [vmem:[#allocation2 + $0x182] sm:$0xff] }
  0xf1   : > { %4249 = vmatmul.mubr.f32.vlgmr.msra.gmra.mrb[0].mxu1 %v6043_v30  ;;  %v6435_v30 = vld [vmem:[#allocation2 + $0x129] sm:$0xff] }
  0xf2   : > { %4593 = vmatmul.mubr.f32.gmra.mrb[16].mxu0 %v6417_v42  ;;  %4992 = vmatpush3.bf16.msra.mxu1 %v5378_v8  ;;  %v6438_v8 = vld [vmem:[#allocation2 + $0x139] sm:$0xff] }
  0xf3   : > { %4251 = vmatprep.mubr.f32.mxu1 %v6049_v7  ;;  %4595 = vmatprep.mubr.f32.mxu0 %v6419_v32  ;;  %v6445_v7 = vld [vmem:[#allocation2 + $0x141] sm:$0xff] }
  0xf4   : > { %4985 = vmatprep.subr.bf16.mxu1 %v5395_v13 }
  0xf5   : > { %4252 = vmatmul.mubr.f32.gmra.mrb[2].mxu1 %v6062_v25  ;;  %v6448_v25 = vld [vmem:[#allocation2 + $0x151] sm:$0xff] }
  0xf6   : > { %4596 = vmatmul.mubr.f32.gmra.mrb[18].mxu0 %v6426_v36  ;;  %4254 = vmatprep.mubr.f32.mxu1 %v6067_v41  ;;  %v6792_v41 = vld [vmem:[#allocation3_spill] sm:$0xff] }
  0xf7   : > { %4598 = vmatprep.mubr.f32.mxu0 %v6428_v49  ;;  %4993 = vmatpush3.bf16.msra.mxu1 %v5395_v13  ;;  %v6793_v13 = vld [vmem:[#allocation10_spill] sm:$0xff] }
  0xf8   : > { %4986 = vmatprep.subr.bf16.mxu1 %v5410_v18 }
  0xf9   : > { %4255 = vmatmul.mubr.f32.gmra.mrb[4].mxu1 %v6080_v59  ;;  %v6795_v59 = vld [vmem:[#allocation4_spill] sm:$0xff] }
  0xfa   : > { %4599 = vmatmul.mubr.f32.gmra.mrb[20].mxu0 %v6435_v30  ;;  %4257 = vmatprep.mubr.f32.mxu1 %v6085_v61  ;;  %v6796_v61 = vld [vmem:[#allocation12_spill] sm:$0xff] }
  0xfb   : > { %4601 = vmatprep.mubr.f32.mxu0 %v6438_v8  ;;  %4994 = vmatpush3.bf16.msra.mxu1 %v5410_v18  ;;  %v6797_v18 = vld [vmem:[#allocation13_spill] sm:$0xff] }
  0xfc   : > { %4987 = vmatprep.subr.bf16.mxu1 %v6792_v41 }
  0xfd   : > { %4258 = vmatmul.mubr.f32.gmra.mrb[6].mxu1 %v6793_v13 }
  0xfe   : > { %4602 = vmatmul.mubr.f32.gmra.mrb[22].mxu0 %v6445_v7  ;;  %4260 = vmatprep.mubr.f32.mxu1 %v6794_v40 }
  0xff   : > { %4604 = vmatprep.mubr.f32.mxu0 %v6448_v25  ;;  %4995 = vmatpush3.bf16.msra.mxu1 %v6792_v41 }
 0x100   : > { %4988 = vmatprep.subr.bf16.mxu1 %v6795_v59 }
 0x101   : > { %4261 = vmatmul.mubr.f32.gmra.mrb[8].mxu1 %v6796_v61 }
 0x102   : > { %4605 = vmatmul.mubr.f32.gmra.mrb[24].mxu0 %v5266_v17  ;;  %4263 = vmatprep.mubr.f32.mxu1 %v6797_v18 }
 0x103   : > { %4607 = vmatprep.mubr.f32.mxu0 %v5267_v34  ;;  %4996 = vmatpush3.bf16.msra.mxu1 %v6795_v59 }
 0x104   : > { %4989 = vmatprep.subr.bf16.mxu1 %v6798_v2 }
 0x105   : > { %4264 = vmatmul.mubr.f32.gmra.mrb[10].mxu1 %v6799_v10 }
 0x106   : > { %4608 = vmatmul.mubr.f32.gmra.mrb[26].mxu0 %v5268_v56  ;;  %4266 = vmatprep.mubr.f32.mxu1 %v6800_v6 }
 0x107   : > { %4610 = vmatprep.mubr.f32.mxu0 %v6802_v24  ;;  %4997 = vmatpush3.bf16.msra.mxu1 %v6798_v2 }
 0x108   : > { %4990 = vmatprep.subr.bf16.mxu1 %v6803_v0 }
 0x109   : > { %4267 = vmatmul.mubr.f32.gmra.mrb[12].mxu1 %v6804_v51 }
 0x10a   : > { %4611 = vmatmul.mubr.f32.gmra.mrb[28].mxu0 %v6806_v9  ;;  %4269 = vmatprep.mubr.f32.mxu1 %v6807_v57 }
 0x10b   : > { %4613 = vmatprep.mubr.f32.mxu0 %v2558_v16  ;;  %4998 = vmatpush3.bf16.msra.mxu1 %v6803_v0 }
 0x10c   : > { %4991 = vmatprep.subr.bf16.mxu1 %v6808_v50 }
 0x10d   : > { %4270 = vmatmul.mubr.f32.gmra.mrb[14].mxu1 %v6809_v1 }
 0x10e   : > { %4614 = vmatmul.mubr.f32.gmra.mrb[30].mxu0 %v2559_v28  ;;  %4272 = vmatprep.mubr.f32.mxu1 %v6167_v21  ;;  %v2839_v21 = vld [vmem:[#allocation2 + $0x6a] sm:$0xff] }
 0x10f   : > { %4648 = vmatprep.mubr.f32.mxu0 %v2834_v27  ;;  %4999 = vmatpush3.bf16.msra.mxu1 %v6808_v50 }
 0x111   : > { %4273 = vmatmul.mubr.f32.gmra.mrb[16].mxu1 %v6179_v22  ;;  %v2841_v22 = vld [vmem:[#allocation2 + $0x82] sm:$0xff] }
 0x112   : > { %4649 = vmatmul.mubr.f32.vlgmr.msra.gmra.mrb[0].mxu0 %v2835_v52  ;;  %4275 = vmatprep.mubr.f32.mxu1 %v6183_v47  ;;  %v2843_v47 = vld [vmem:[#allocation2 + $0x9a] sm:$0xff] }
 0x113   : > { %4651 = vmatprep.mubr.f32.mxu0 %v2836_v11 }
 0x115   : > { %4276 = vmatmul.mubr.f32.gmra.mrb[18].mxu1 %v6194_v20  ;;  %v2844_v20 = vld [vmem:[#allocation2 + $0xaa] sm:$0xff] }
 0x116   : > { %4652 = vmatmul.mubr.f32.gmra.mrb[2].mxu0 %v2837_v5  ;;  %4278 = vmatprep.mubr.f32.mxu1 %v6197_v35  ;;  %v2846_v35 = vld [vmem:[#allocation2 + $0xc2] sm:$0xff] }
 0x117   : > { %4654 = vmatprep.mubr.f32.mxu0 %v2838_v53 }
 0x119   : > { %4279 = vmatmul.mubr.f32.gmra.mrb[20].mxu1 %v6208_v37  ;;  %v2845_v37 = vld [vmem:[#allocation2 + $0xb2] sm:$0xff] }
 0x11a   : > { %4655 = vmatmul.mubr.f32.gmra.mrb[4].mxu0 %v2839_v21  ;;  %4281 = vmatprep.mubr.f32.mxu1 %v6211_v31  ;;  %v2848_v31 = vld [vmem:[#allocation2 + $0xda] sm:$0xff] }
 0x11b   : > { %4657 = vmatprep.mubr.f32.mxu0 %v2840_v33 }
 0x11d   : > { %4282 = vmatmul.mubr.f32.gmra.mrb[22].mxu1 %v6222_v12  ;;  %v2847_v12 = vld [vmem:[#allocation2 + $0xca] sm:$0xff] }
 0x11e   : > { %4658 = vmatmul.mubr.f32.gmra.mrb[6].mxu0 %v2841_v22  ;;  %4284 = vmatprep.mubr.f32.mxu1 %v6225_v43  ;;  %v2850_v43 = vld [vmem:[#allocation2 + $0xf2] sm:$0xff] }
 0x11f   : > { %4660 = vmatprep.mubr.f32.mxu0 %v2842_v4 }
 0x121   : > { %4285 = vmatmul.mubr.f32.gmra.mrb[24].mxu1 %v6236_v55  ;;  %v2849_v55 = vld [vmem:[#allocation2 + $0xe2] sm:$0xff] }
 0x122   : > { %4661 = vmatmul.mubr.f32.gmra.mrb[8].mxu0 %v2843_v47  ;;  %4287 = vmatprep.mubr.f32.mxu1 %v6239_v58  ;;  %v2852_v58 = vld [vmem:[#allocation2 + $0x10a] sm:$0xff] }
 0x123   : > { %4663 = vmatprep.mubr.f32.mxu0 %v2844_v20 }
 0x125   : > { %4288 = vmatmul.mubr.f32.gmra.mrb[26].mxu1 %v6250_v46  ;;  %v2851_v46 = vld [vmem:[#allocation2 + $0xfa] sm:$0xff] }
 0x126   : > { %4664 = vmatmul.mubr.f32.gmra.mrb[10].mxu0 %v2845_v37  ;;  %4290 = vmatprep.mubr.f32.mxu1 %v6253_v19  ;;  %v2854_v19 = vld [vmem:[#allocation2 + $0x122] sm:$0xff] }
 0x127   : > { %4666 = vmatprep.mubr.f32.mxu0 %v2846_v35 }
 0x129   : > { %4291 = vmatmul.mubr.f32.gmra.mrb[28].mxu1 %v6264_v29  ;;  %v2853_v29 = vld [vmem:[#allocation2 + $0x112] sm:$0xff] }
 0x12a   : > { %4667 = vmatmul.mubr.f32.gmra.mrb[12].mxu0 %v2847_v12  ;;  %4293 = vmatprep.mubr.f32.mxu1 %v6329_v39  ;;  %v2855_v39 = vld [vmem:[#allocation2 + $0x12a] sm:$0xff] }
 0x12b   : > { %4669 = vmatprep.mubr.f32.mxu0 %v2848_v31 }
 0x12d   : > { %4294 = vmatmul.mubr.f32.gmra.mrb[30].mxu1 %v6341_v44  ;;  %v2856_v44 = vld [vmem:[#allocation2 + $0x13a] sm:$0xff] }
 0x12e   : > { %4670 = vmatmul.mubr.f32.gmra.mrb[14].mxu0 %v2849_v55  ;;  %4352 = vmatprep.mubr.f32.mxu1 %v6404_v63  ;;  %v1637_v63 = vld [vmem:[#allocation2 + $0x169] sm:$0xff] }
 0x12f   : > { %4672 = vmatprep.mubr.f32.mxu0 %v2850_v43 }
 0x131   : > { %4353 = vmatmul.mubr.f32.vlgmr.msra.gmra.mrb[16].mxu1 %v6409_v60  ;;  %v1638_v60 = vld [vmem:[#allocation2 + $0x171] sm:$0xff] }
 0x132   : > { %4673 = vmatmul.mubr.f32.gmra.mrb[16].mxu0 %v2851_v46  ;;  %4355 = vmatprep.mubr.f32.mxu1 %v6411_v48  ;;  %v2863_v48 = vld [vmem:[#allocation2 + $0x18a] sm:$0xff] }
 0x133   : > { %4675 = vmatprep.mubr.f32.mxu0 %v2852_v58 }
 0x135   : > { %4356 = vmatmul.mubr.f32.gmra.mrb[18].mxu1 %v6417_v42  ;;  %v1639_v42 = vld [vmem:[#allocation2 + $0x181] sm:$0xff] }
 0x136   : > { %4676 = vmatmul.mubr.f32.gmra.mrb[18].mxu0 %v2853_v29  ;;  %4358 = vmatprep.mubr.f32.mxu1 %v6419_v32  ;;  %v2864_v32 = vld [vmem:[#allocation2 + $0x19a] sm:$0xff] }
 0x137   : > { %4678 = vmatprep.mubr.f32.mxu0 %v2854_v19 }
 0x139   : > { %4359 = vmatmul.mubr.f32.gmra.mrb[20].mxu1 %v6426_v36  ;;  %v1640_v36 = vld [vmem:[#allocation2 + $0x189] sm:$0xff] }
 0x13a   : > { %4679 = vmatmul.mubr.f32.gmra.mrb[20].mxu0 %v2855_v39  ;;  %4361 = vmatprep.mubr.f32.mxu1 %v6428_v49  ;;  %v2865_v49 = vld [vmem:[#allocation2 + $0x1a2] sm:$0xff] }
 0x13b   : > { %4681 = vmatprep.mubr.f32.mxu0 %v2856_v44 }
 0x13d   : > { %4362 = vmatmul.mubr.f32.gmra.mrb[22].mxu1 %v6435_v30 }
 0x13e   : > { %4682 = vmatmul.mubr.f32.gmra.mrb[22].mxu0 %v2857_v38  ;;  %4364 = vmatprep.mubr.f32.mxu1 %v6438_v8 }
 0x13f   : > { %4684 = vmatprep.mubr.f32.mxu0 %v2858_v54 }
 0x141   : > { %4365 = vmatmul.mubr.f32.gmra.mrb[24].mxu1 %v6445_v7 }
 0x142   : > { %4685 = vmatmul.mubr.f32.gmra.mrb[24].mxu0 %v2859_v14  ;;  %4367 = vmatprep.mubr.f32.mxu1 %v6448_v25 }
 0x143   : > { %4687 = vmatprep.mubr.f32.mxu0 %v2860_v45 }
 0x145   : > { %4368 = vmatmul.mubr.f32.gmra.mrb[26].mxu1 %v1636_v62 }
 0x146   : > { %4688 = vmatmul.mubr.f32.gmra.mrb[26].mxu0 %v2861_v15  ;;  %4370 = vmatprep.mubr.f32.mxu1 %v1637_v63 }
 0x147   : > { %4690 = vmatprep.mubr.f32.mxu0 %v2862_v26 }
 0x149   : > { %4371 = vmatmul.mubr.f32.gmra.mrb[28].mxu1 %v1638_v60 }
 0x14a   : > { %4691 = vmatmul.mubr.f32.gmra.mrb[28].mxu0 %v2863_v48  ;;  %4373 = vmatprep.mubr.f32.mxu1 %v1639_v42 }
 0x14b   : > { %4693 = vmatprep.mubr.f32.mxu0 %v2864_v32 }
 0x14d   : > { %4374 = vmatmul.mubr.f32.gmra.mrb[30].mxu1 %v1640_v36 }
 0x14e   : > { %4694 = vmatmul.mubr.f32.gmra.mrb[30].mxu0 %v2865_v49 }
 0x1c4   : > { %v4250_v30 = vpop.f32.mrb[0].mxu1 }
 0x1c5   : > { %v1418_v8 = vpop.f32.mrb[1].mxu1 }
 0x1c8   : > { %v4253_v7 = vpop.f32.mrb[2].mxu1 }
 0x1c9   : > { %v1428_v25 = vpop.f32.mrb[3].mxu1 }
 0x1cc   : > { %v4256_v41 = vpop.f32.mrb[4].mxu1 }
 0x1cd   : > { %v1438_v13 = vpop.f32.mrb[5].mxu1 }
 0x1d0   : > { %v4259_v40 = vpop.f32.mrb[6].mxu1 }
 0x1d1   : > { %v1448_v59 = vpop.f32.mrb[7].mxu1 }
 0x1d4   : > { %v4262_v61 = vpop.f32.mrb[8].mxu1 }
 0x1d5   : > { %v1458_v17 = vpop.f32.mrb[9].mxu1 }
 0x1d8   : > { %v4265_v18 = vpop.f32.mrb[10].mxu1 }
 0x1d9   : > { %v1468_v34 = vpop.f32.mrb[11].mxu1 }
 0x1dc   : > { %v4268_v2 = vpop.f32.mrb[12].mxu1 }
 0x1dd   : > { %v1478_v10 = vpop.f32.mrb[13].mxu1 }
 0x1e0   : > { %v4271_v56 = vpop.f32.mrb[14].mxu1 }
 0x1e1   : > { %v1488_v6 = vpop.f32.mrb[15].mxu1 }
 0x1e5   : > { %v4650_v23 = vpop.f32.mrb[0].mxu0 }
 0x1e6   : > { %v6509_v24 = vadd.f32 %v4650_v23, %v4250_v30  ;;  %v2949_v16 = vpop.f32.mrb[1].mxu0 }
 0x1e7   : > { %v6511_v0 = vadd.f32 %v2949_v16, %v1418_v8 }
 0x1e8   : > { %3141 = vst [vmem:[%s6507_s11 + $0x8] sm:$0xff] %v6509_v24 }
 0x1e9   : > { %3140 = vst [vmem:[%s6507_s11] sm:$0xff] %v6511_v0  ;;  %v4653_v51 = vpop.f32.mrb[2].mxu0  ;;  %v3172_v57 = vadd.f32 %v6511_v0, %v6509_v24 }
 0x1ea   : > { %v6517_v3 = vadd.f32 %v4653_v51, %v4253_v7  ;;  %v2959_v9 = vpop.f32.mrb[3].mxu0 }
 0x1eb   : > { %v6521_v28 = vadd.f32 %v2959_v9, %v1428_v25 }
 0x1ec   : > { %3143 = vst [vmem:[%s6507_s11 + $0x18] sm:$0xff] %v6517_v3 }
 0x1ed   : > { %3142 = vst [vmem:[%s6507_s11 + $0x10] sm:$0xff] %v6521_v28  ;;  %v3173_v27 = vadd.f32 %v6521_v28, %v3172_v57  ;;  %v4656_v50 = vpop.f32.mrb[4].mxu0 }
 0x1ee   : > { %v6528_v1 = vadd.f32 %v4656_v50, %v4256_v41  ;;  %v2969_v52 = vpop.f32.mrb[5].mxu0 }
 0x1ef   : > { %v6530_v11 = vadd.f32 %v2969_v52, %v1438_v13  ;;  %v3174_v5 = vadd.f32 %v6517_v3, %v3173_v27 }
 0x1f0   : > { %3145 = vst [vmem:[%s6507_s11 + $0x28] sm:$0xff] %v6528_v1 }
 0x1f1   : > { %3144 = vst [vmem:[%s6507_s11 + $0x20] sm:$0xff] %v6530_v11  ;;  %v3175_v53 = vadd.f32 %v6530_v11, %v3174_v5  ;;  %v4659_v21 = vpop.f32.mrb[6].mxu0 }
 0x1f2   : > { %v6538_v33 = vadd.f32 %v4659_v21, %v4259_v40  ;;  %v2979_v22 = vpop.f32.mrb[7].mxu0 }
 0x1f3   : > { %v6540_v4 = vadd.f32 %v2979_v22, %v1448_v59  ;;  %v3176_v47 = vadd.f32 %v6528_v1, %v3175_v53 }
 0x1f4   : > { %3147 = vst [vmem:[%s6507_s11 + $0x38] sm:$0xff] %v6538_v33 }
 0x1f5   : > { %3146 = vst [vmem:[%s6507_s11 + $0x30] sm:$0xff] %v6540_v4  ;;  %v3177_v20 = vadd.f32 %v6540_v4, %v3176_v47  ;;  %v4662_v37 = vpop.f32.mrb[8].mxu0 }
 0x1f6   : > { %v6548_v35 = vadd.f32 %v4662_v37, %v4262_v61  ;;  %v2989_v12 = vpop.f32.mrb[9].mxu0 }
 0x1f7   : > { %v6550_v31 = vadd.f32 %v2989_v12, %v1458_v17  ;;  %v3178_v55 = vadd.f32 %v6538_v33, %v3177_v20 }
 0x1f8   : > { %3149 = vst [vmem:[%s6507_s11 + $0x48] sm:$0xff] %v6548_v35 }
 0x1f9   : > { %3148 = vst [vmem:[%s6507_s11 + $0x40] sm:$0xff] %v6550_v31  ;;  %v3179_v43 = vadd.f32 %v6550_v31, %v3178_v55  ;;  %v4665_v46 = vpop.f32.mrb[10].mxu0 }
 0x1fa   : > { %v6558_v58 = vadd.f32 %v4665_v46, %v4265_v18  ;;  %v2999_v29 = vpop.f32.mrb[11].mxu0 }
 0x1fb   : > { %v6560_v19 = vadd.f32 %v2999_v29, %v1468_v34  ;;  %v3180_v39 = vadd.f32 %v6548_v35, %v3179_v43 }
 0x1fc   : > { %3151 = vst [vmem:[%s6507_s11 + $0x58] sm:$0xff] %v6558_v58 }
 0x1fd   : > { %3150 = vst [vmem:[%s6507_s11 + $0x50] sm:$0xff] %v6560_v19  ;;  %v3181_v44 = vadd.f32 %v6560_v19, %v3180_v39  ;;  %v4668_v38 = vpop.f32.mrb[12].mxu0 }
 0x1fe   : > { %v6568_v54 = vadd.f32 %v4668_v38, %v4268_v2  ;;  %v3009_v14 = vpop.f32.mrb[13].mxu0 }
 0x1ff   : > { %v6570_v45 = vadd.f32 %v3009_v14, %v1478_v10  ;;  %v3182_v62 = vadd.f32 %v6558_v58, %v3181_v44 }
 0x200   : > { %3153 = vst [vmem:[%s6507_s11 + $0x68] sm:$0xff] %v6568_v54 }
 0x201   : > { %3152 = vst [vmem:[%s6507_s11 + $0x60] sm:$0xff] %v6570_v45  ;;  %v3183_v15 = vadd.f32 %v6570_v45, %v3182_v62  ;;  %v4671_v63 = vpop.f32.mrb[14].mxu0 }
 0x202   : > { %v6578_v26 = vadd.f32 %v4671_v63, %v4271_v56  ;;  %v3019_v60 = vpop.f32.mrb[15].mxu0 }
 0x203   : > { %v6580_v48 = vadd.f32 %v3019_v60, %v1488_v6  ;;  %v3184_v42 = vadd.f32 %v6568_v54, %v3183_v15 }
 0x204   : > { %3155 = vst [vmem:[%s6507_s11 + $0x78] sm:$0xff] %v6578_v26  ;;  %v4354_v32 = vpop.f32.mrb[16].mxu1 }
 0x205   : > { %3154 = vst [vmem:[%s6507_s11 + $0x70] sm:$0xff] %v6580_v48  ;;  %v3185_v36 = vadd.f32 %v6580_v48, %v3184_v42  ;;  %v4674_v49 = vpop.f32.mrb[16].mxu0  ;;  %v1804_v30 = vpop.f32.mrb[17].mxu1 }
 0x206   : > { %v6588_v8 = vadd.f32 %v4674_v49, %v4354_v32  ;;  %v3029_v7 = vpop.f32.mrb[17].mxu0 }
 0x207   : > { %v6590_v25 = vadd.f32 %v3029_v7, %v1804_v30  ;;  %v3186_v41 = vadd.f32 %v6578_v26, %v3185_v36 }
 0x208   : > { %3157 = vst [vmem:[%s6507_s11 + $0x88] sm:$0xff] %v6588_v8  ;;  %v4357_v13 = vpop.f32.mrb[18].mxu1 }
 0x209   : > { %3156 = vst [vmem:[%s6507_s11 + $0x80] sm:$0xff] %v6590_v25  ;;  %v3187_v40 = vadd.f32 %v6590_v25, %v3186_v41  ;;  %v4677_v59 = vpop.f32.mrb[18].mxu0  ;;  %v1814_v61 = vpop.f32.mrb[19].mxu1 }
 0x20a   : > { %v6598_v17 = vadd.f32 %v4677_v59, %v4357_v13  ;;  %v3039_v18 = vpop.f32.mrb[19].mxu0 }
 0x20b   : > { %v6600_v34 = vadd.f32 %v3039_v18, %v1814_v61  ;;  %v3188_v2 = vadd.f32 %v6588_v8, %v3187_v40 }
 0x20c   : > { %3159 = vst [vmem:[%s6507_s11 + $0x98] sm:$0xff] %v6598_v17  ;;  %v4360_v10 = vpop.f32.mrb[20].mxu1 }
 0x20d   : > { %3158 = vst [vmem:[%s6507_s11 + $0x90] sm:$0xff] %v6600_v34  ;;  %v3189_v56 = vadd.f32 %v6600_v34, %v3188_v2  ;;  %v4680_v6 = vpop.f32.mrb[20].mxu0  ;;  %v1824_v23 = vpop.f32.mrb[21].mxu1 }
 0x20e   : > { %v6608_v16 = vadd.f32 %v4680_v6, %v4360_v10  ;;  %v3049_v51 = vpop.f32.mrb[21].mxu0 }
 0x20f   : > { %v6610_v9 = vadd.f32 %v3049_v51, %v1824_v23  ;;  %v3190_v57 = vadd.f32 %v6598_v17, %v3189_v56 }
 0x210   : > { %3161 = vst [vmem:[%s6507_s11 + $0xa8] sm:$0xff] %v6608_v16  ;;  %v4363_v27 = vpop.f32.mrb[22].mxu1 }
 0x211   : > { %3160 = vst [vmem:[%s6507_s11 + $0xa0] sm:$0xff] %v6610_v9  ;;  %v3191_v50 = vadd.f32 %v6610_v9, %v3190_v57  ;;  %v4683_v52 = vpop.f32.mrb[22].mxu0  ;;  %v1834_v5 = vpop.f32.mrb[23].mxu1 }
 0x212   : > { %v6618_v53 = vadd.f32 %v4683_v52, %v4363_v27  ;;  %v3059_v21 = vpop.f32.mrb[23].mxu0 }
 0x213   : > { %v6620_v22 = vadd.f32 %v3059_v21, %v1834_v5  ;;  %v3192_v47 = vadd.f32 %v6608_v16, %v3191_v50 }
 0x214   : > { %3163 = vst [vmem:[%s6507_s11 + $0xb8] sm:$0xff] %v6618_v53  ;;  %v4366_v20 = vpop.f32.mrb[24].mxu1 }
 0x215   : > { %3162 = vst [vmem:[%s6507_s11 + $0xb0] sm:$0xff] %v6620_v22  ;;  %v3193_v37 = vadd.f32 %v6620_v22, %v3192_v47  ;;  %v4686_v12 = vpop.f32.mrb[24].mxu0  ;;  %v1844_v55 = vpop.f32.mrb[25].mxu1 }
 0x216   : > { %v6628_v43 = vadd.f32 %v4686_v12, %v4366_v20  ;;  %v3069_v46 = vpop.f32.mrb[25].mxu0 }
 0x217   : > { %v6630_v29 = vadd.f32 %v3069_v46, %v1844_v55  ;;  %v3194_v39 = vadd.f32 %v6618_v53, %v3193_v37 }
 0x218   : > { %3165 = vst [vmem:[%s6507_s11 + $0xc8] sm:$0xff] %v6628_v43  ;;  %v4369_v44 = vpop.f32.mrb[26].mxu1 }
 0x219   : > { %3164 = vst [vmem:[%s6507_s11 + $0xc0] sm:$0xff] %v6630_v29  ;;  %v3195_v38 = vadd.f32 %v6630_v29, %v3194_v39  ;;  %v4689_v14 = vpop.f32.mrb[26].mxu0  ;;  %v1854_v62 = vpop.f32.mrb[27].mxu1 }
 0x21a   : > { %v6638_v15 = vadd.f32 %v4689_v14, %v4369_v44  ;;  %v3079_v63 = vpop.f32.mrb[27].mxu0 }
 0x21b   : > { %v6640_v60 = vadd.f32 %v3079_v63, %v1854_v62  ;;  %v3196_v42 = vadd.f32 %v6628_v43, %v3195_v38 }
 0x21c   : > { %3167 = vst [vmem:[%s6507_s11 + $0xd8] sm:$0xff] %v6638_v15  ;;  %v4372_v32 = vpop.f32.mrb[28].mxu1 }
 0x21d   : > { %3166 = vst [vmem:[%s6507_s11 + $0xd0] sm:$0xff] %v6640_v60  ;;  %v3197_v36 = vadd.f32 %v6640_v60, %v3196_v42  ;;  %v4692_v49 = vpop.f32.mrb[28].mxu0  ;;  %v1864_v30 = vpop.f32.mrb[29].mxu1 }
 0x21e   : > { %v6648_v7 = vadd.f32 %v4692_v49, %v4372_v32  ;;  %v3089_v41 = vpop.f32.mrb[29].mxu0 }
 0x21f   : > { %v6650_v13 = vadd.f32 %v3089_v41, %v1864_v30  ;;  %v3198_v40 = vadd.f32 %v6638_v15, %v3197_v36 }
 0x220   : > { %3169 = vst [vmem:[%s6507_s11 + $0xe8] sm:$0xff] %v6648_v7  ;;  %v4375_v59 = vpop.f32.mrb[30].mxu1 }
 0x221   : > { %3168 = vst [vmem:[%s6507_s11 + $0xe0] sm:$0xff] %v6650_v13  ;;  %v3199_v61 = vadd.f32 %v6650_v13, %v3198_v40  ;;  %v4695_v18 = vpop.f32.mrb[30].mxu0  ;;  %v1874_v2 = vpop.f32.mrb[31].mxu1 }
 0x222   : > { %v6658_v10 = vadd.f32 %v4695_v18, %v4375_v59  ;;  %v3099_v56 = vpop.f32.mrb[31].mxu0 }
 0x223   : > { %v6660_v6 = vadd.f32 %v3099_v56, %v1874_v2  ;;  %v3200_v23 = vadd.f32 %v6648_v7, %v3199_v61 }
 0x224   : > { %3171 = vst [vmem:[%s6507_s11 + $0xf8] sm:$0xff] %v6658_v10 }
 0x225   : > { %3170 = vst [vmem:[%s6507_s11 + $0xf0] sm:$0xff] %v6660_v6  ;;  %v3201_v51 = vadd.f32 %v6660_v6, %v3200_v23 }
 0x227   : > { %v3202_v57 = vadd.f32 %v6658_v10, %v3201_v51 }
 0x229   : > { %v3203_v27 = vrot.slane %v3202_v57, 4 }
 0x22b   : > { %v3204_v50 = vadd.f32 %v3203_v27, %v3202_v57 }
 0x22d   : > { %v3205_v52 = vrot.slane %v3204_v50, 2 }
 0x22f   : > { %v3206_v5 = vadd.f32 %v3205_v52, %v3204_v50 }
 0x231   : > { %v3207_v21 = vrot.slane %v3206_v5, 1 }
 0x233   : > { %v6669_v47 = vadd.f32 %v3207_v21, %v3206_v5 }
 0x235   : > { %v6672_v20 = vmul.f32 0.00390625, %v6669_v47 }
 0x237   : > { %v3210_v37 = vsub.f32 %v6511_v0, %v6672_v20  ;;  %v3211_v12 = vsub.f32 %v6509_v24, %v6672_v20  ;;  %v3212_v55 = vsub.f32 %v6521_v28, %v6672_v20  ;;  %v3213_v44 = vsub.f32 %v6517_v3, %v6672_v20 }
 0x238   : > { %v3214_v38 = vsub.f32 %v6530_v11, %v6672_v20  ;;  %v3215_v63 = vsub.f32 %v6528_v1, %v6672_v20  ;;  %v3216_v24 = vsub.f32 %v6540_v4, %v6672_v20  ;;  %v3217_v36 = vsub.f32 %v6538_v33, %v6672_v20 }
 0x239   : > { %v3242_v46 = vmul.f32 %v3210_v37, %v3210_v37  ;;  %v3243_v39 = vmul.f32 %v3211_v12, %v3211_v12  ;;  %v3244_v14 = vmul.f32 %v3212_v55, %v3212_v55  ;;  %v3245_v0 = vmul.f32 %v3213_v44, %v3213_v44 }
 0x23a   : > { %v3246_v32 = vmul.f32 %v3214_v38, %v3214_v38  ;;  %v3247_v49 = vmul.f32 %v3215_v63, %v3215_v63  ;;  %v3218_v11 = vsub.f32 %v6550_v31, %v6672_v20  ;;  %v3248_v30 = vmul.f32 %v3216_v24, %v3216_v24 }
 0x23b   : > { %v3274_v62 = vadd.f32 %v3243_v39, %v3242_v46  ;;  %v3219_v1 = vsub.f32 %v6548_v35, %v6672_v20  ;;  %v3249_v40 = vmul.f32 %v3217_v36, %v3217_v36  ;;  %v3220_v4 = vsub.f32 %v6560_v19, %v6672_v20 }
 0x23c   : > { %v3250_v61 = vmul.f32 %v3218_v11, %v3218_v11  ;;  %v3221_v33 = vsub.f32 %v6558_v58, %v6672_v20  ;;  %v3222_v31 = vsub.f32 %v6570_v45, %v6672_v20  ;;  %v3223_v35 = vsub.f32 %v6568_v54, %v6672_v20 }
 0x23d   : > { %v3275_v42 = vadd.f32 %v3274_v62, %v3244_v14  ;;  %v3251_v2 = vmul.f32 %v3219_v1, %v3219_v1  ;;  %v3252_v23 = vmul.f32 %v3220_v4, %v3220_v4  ;;  %v3224_v19 = vsub.f32 %v6580_v48, %v6672_v20 }
 0x23e   : > { %v3253_v57 = vmul.f32 %v3221_v33, %v3221_v33  ;;  %v3254_v50 = vmul.f32 %v3222_v31, %v3222_v31  ;;  %v3225_v58 = vsub.f32 %v6578_v26, %v6672_v20  ;;  %v3255_v5 = vmul.f32 %v3223_v35, %v3223_v35 }
 0x23f   : > { %v3276_v28 = vadd.f32 %v3275_v42, %v3245_v0  ;;  %v3226_v45 = vsub.f32 %v6590_v25, %v6672_v20  ;;  %v3256_v37 = vmul.f32 %v3224_v19, %v3224_v19  ;;  %v3227_v54 = vsub.f32 %v6588_v8, %v6672_v20 }
 0x240   : > { %v3257_v55 = vmul.f32 %v3225_v58, %v3225_v58  ;;  %v3228_v48 = vsub.f32 %v6600_v34, %v6672_v20  ;;  %v3229_v26 = vsub.f32 %v6598_v17, %v6672_v20  ;;  %v3230_v25 = vsub.f32 %v6610_v9, %v6672_v20 }
 0x241   : > { %v3277_v3 = vadd.f32 %v3276_v28, %v3246_v32  ;;  %v3258_v39 = vmul.f32 %v3226_v45, %v3226_v45  ;;  %v3259_v38 = vmul.f32 %v3227_v54, %v3227_v54  ;;  %v3231_v8 = vsub.f32 %v6608_v16, %v6672_v20 }
 0x242   : > { %v3260_v62 = vmul.f32 %v3228_v48, %v3228_v48  ;;  %v3261_v0 = vmul.f32 %v3229_v26, %v3229_v26  ;;  %v3232_v34 = vsub.f32 %v6620_v22, %v6672_v20  ;;  %v3262_v24 = vmul.f32 %v3230_v25, %v3230_v25 }
 0x243   : > { %v3278_v41 = vadd.f32 %v3277_v3, %v3247_v49  ;;  %v3233_v17 = vsub.f32 %v6618_v53, %v6672_v20  ;;  %v3263_v28 = vmul.f32 %v3231_v8, %v3231_v8  ;;  %v3234_v9 = vsub.f32 %v6630_v29, %v6672_v20 }
 0x244   : > { %v3264_v49 = vmul.f32 %v3232_v34, %v3232_v34  ;;  %v3235_v16 = vsub.f32 %v6628_v43, %v6672_v20  ;;  %v3236_v22 = vsub.f32 %v6640_v60, %v6672_v20  ;;  %v3237_v53 = vsub.f32 %v6638_v15, %v6672_v20 }
 0x245   : > { %v3279_v59 = vadd.f32 %v3278_v41, %v3248_v30  ;;  %v3265_v11 = vmul.f32 %v3233_v17, %v3233_v17  ;;  %v3266_v41 = vmul.f32 %v3234_v9, %v3234_v9  ;;  %v3238_v29 = vsub.f32 %v6650_v13, %v6672_v20 }
 0x246   : > { %v3268_v4 = vmul.f32 %v3236_v22, %v3236_v22  ;;  %v3239_v43 = vsub.f32 %v6648_v7, %v6672_v20  ;;  %v3240_v60 = vsub.f32 %v6660_v6, %v6672_v20  ;;  %v3241_v15 = vsub.f32 %v6658_v10, %v6672_v20 }
 0x247   : > { %v3280_v18 = vadd.f32 %v3279_v59, %v3249_v40  ;;  %v3267_v40 = vmul.f32 %v3235_v16, %v3235_v16 }
 0x248   : > { %v3271_v31 = vmul.f32 %v3239_v43, %v3239_v43  ;;  %v3273_v35 = vmul.f32 %v3241_v15, %v3241_v15 }
 0x249   : > { %v3281_v56 = vadd.f32 %v3280_v18, %v3250_v61  ;;  %v3269_v18 = vmul.f32 %v3237_v53, %v3237_v53 }
 0x24b   : > { %v3282_v51 = vadd.f32 %v3281_v56, %v3251_v2  ;;  %v3270_v2 = vmul.f32 %v3238_v29, %v3238_v29 }
 0x24d   : > { %v3283_v27 = vadd.f32 %v3282_v51, %v3252_v23  ;;  %v3272_v51 = vmul.f32 %v3240_v60, %v3240_v60 }
 0x24f   : > { %v3284_v52 = vadd.f32 %v3283_v27, %v3253_v57 }
 0x251   : > { %v3285_v21 = vadd.f32 %v3284_v52, %v3254_v50 }
 0x253   : > { %v3286_v12 = vadd.f32 %v3285_v21, %v3255_v5 }
 0x255   : > { %v3287_v46 = vadd.f32 %v3286_v12, %v3256_v37 }
 0x257   : > { %v3288_v44 = vadd.f32 %v3287_v46, %v3257_v55 }
 0x259   : > { %v3289_v14 = vadd.f32 %v3288_v44, %v3258_v39 }
 0x25b   : > { %v3290_v63 = vadd.f32 %v3289_v14, %v3259_v38 }
 0x25d   : > { %v3291_v42 = vadd.f32 %v3290_v63, %v3260_v62 }
 0x25f   : > { %v3292_v32 = vadd.f32 %v3291_v42, %v3261_v0 }
 0x261   : > { %v3293_v36 = vadd.f32 %v3292_v32, %v3262_v24 }
 0x263   : > { %v3294_v3 = vadd.f32 %v3293_v36, %v3263_v28 }
 0x265   : > { %v3295_v30 = vadd.f32 %v3294_v3, %v3264_v49 }
 0x267   : > { %v3296_v1 = vadd.f32 %v3295_v30, %v3265_v11 }
 0x269   : > { %v3297_v59 = vadd.f32 %v3296_v1, %v3266_v41 }
 0x26b   : > { %v3298_v61 = vadd.f32 %v3297_v59, %v3267_v40 }
 0x26d   : > { %v3299_v33 = vadd.f32 %v3298_v61, %v3268_v4 }
 0x26f   : > { %v3300_v56 = vadd.f32 %v3299_v33, %v3269_v18 }
 0x271   : > { %v3301_v23 = vadd.f32 %v3300_v56, %v3270_v2 }
 0x273   : > { %v3302_v13 = vadd.f32 %v3301_v23, %v3271_v31 }
 0x275   : > { %v3303_v57 = vadd.f32 %v3302_v13, %v3272_v51 }
 0x277   : > { %v3304_v27 = vadd.f32 %v3303_v57, %v3273_v35 }
 0x279   : > { %v3305_v19 = vrot.slane %v3304_v27, 4 }
 0x27b   : > { %v3306_v7 = vadd.f32 %v3305_v19, %v3304_v27 }
 0x27d   : > { %v3307_v50 = vrot.slane %v3306_v7, 2 }
 0x27f   : > { %v3308_v52 = vadd.f32 %v3307_v50, %v3306_v7 }
 0x281   : > { %v3309_v58 = vrot.slane %v3308_v52, 1 }
 0x283   : > { %v3310_v6 = vadd.f32 %v3309_v58, %v3308_v52 }
 0x285   : > { %v3312_v10 = vsel %vm3311_vm0, %v6669_v47, %v3310_v6 }
 0x286   : > { %3313 = vst [vmem:[%s235_s14] sm:$0x3] %v3312_v10 }
 0x287 PF: > { %s16_s18 = sadd.s32 1, %s5275_s18  }
 0x288   : > { %p13_p4 = scmp.ge.s32.totalorder %s16_s18, 4  }
 0x28a   :  { %15 = sbr.rel (!%p13_p4) target bundleno = 1 (0x1), region = 89 }

// kernel: basic_block.3
= control target key start
LH: loop header
LB: loop body
LE: loop exit
PB: predicated region body
PF: predicated region fallthrough
CT: control target
= control target key end

     0   :  { %s5137_s12 = smov 0   ;;  %s6421_s0 = inlined_call_operand.vmem [shape: f32[2,16,16,128], index: 0, kind: input, shape index: {}]   ;;  %s6422_s1 = inlined_call_operand.vmem [shape: f32[9,128,128], index: 1, kind: input, shape index: {}]   ;;  %s6423_s2 = inlined_call_operand.vmem [shape: f32[2,16,16,128], index: 2, kind: output, shape index: {0}]   ;;  %s6424_s3 = inlined_call_operand.vmem [shape: f32[2,2,128], index: 3, kind: output, shape index: {1}]  }
   0x1 LB: > { %s3236_s13 = sadd.s32 4294967295, %s5114_s12   ;;  %p3240_p0 = scmp.ge.s32.totalorder %s5114_s12, 1  ;;  %s5114_s12 = sphi %s5137_s12, %s14_s12  }
   0x2   : > { %p140_p1 = scmp.lt.s32.totalorder %s5114_s12, 3 }
   0x4   : > { %p141_p2 = pnand %p3240_p0, %p140_p1 }
   0x6   : > { %144 = sbr.rel (%p141_p2) target bundleno = 646 (0x286), region = 28 }
   0xd   : > { %v3246_v0 = vld [vmem:[%s6422_s1 + $0x80] sm:$0xff]  ;;  %v3247_v1 = vld [vmem:[%s6422_s1 + $0x88] sm:$0xff]  ;;  %p5156_p3 = scmp.lt.s32.totalorder %s3236_s13, 1  ;;  %v3248_v5 = vld [vmem:[%s6422_s1 + $0x90] sm:$0xff]  ;;  %v5116_v7 = vmov 0.0   ;;  %vm3147_vm0 = vcmask 1040384  }
   0xe   : > { %v3294_v2 = vld [vmem:[%s6422_s1 + $0x200] sm:$0xff]  ;;  %v4530_v3 = vpack.c.bf16 %v3247_v1, %v3246_v0  ;;  %v3295_v4 = vld [vmem:[%s6422_s1 + $0x208] sm:$0xff]  ;;  %v3249_v6 = vld [vmem:[%s6422_s1 + $0x98] sm:$0xff]  ;;  %182 = vst [vmem:[#allocation2] sm:$0xff] %v5116_v7 }
   0xf   : > { %183 = vst [vmem:[#allocation2 + $0x8] sm:$0xff] %v5116_v7  ;;  %184 = vst [vmem:[#allocation2 + $0x10] sm:$0x3] %v5116_v7  ;;  %v5207_v8 = vpack.c.bf16 %v3295_v4, %v3294_v2  ;;  %v4534_v9 = vpack.c.bf16 %v3249_v6, %v3248_v5  ;;  %v3296_v10 = vld [vmem:[%s6422_s1 + $0x210] sm:$0xff]  ;;  %v3297_v11 = vld [vmem:[%s6422_s1 + $0x218] sm:$0xff]  ;;  %s6480_s13 = smov (!%p5156_p3, %s3236_s13), 1 }
  0x10   : > { %186 = vst [vmem:[#allocation2 + $0x198] sm:$0xff] %v5116_v7  ;;  %187 = vst [vmem:[#allocation2 + $0x1a0] sm:$0xff] %v5116_v7  ;;  %v3250_v12 = vld [vmem:[%s6422_s1 + $0xa0] sm:$0xff]  ;;  %4531 = vmatprep.subr.bf16.mxu1 %v4530_v3  ;;  %v5224_v13 = vpack.c.bf16 %v3297_v11, %v3296_v10  ;;  %v3251_v14 = vld [vmem:[%s6422_s1 + $0xa8] sm:$0xff]  ;;  %s3376_s14 = sshll.u32 %s6480_s13, 8 }
  0x11   : > { %188 = vst [vmem:[#allocation2 + $0x1a8] sm:$0x3] %v5116_v7  ;;  %190 = vst [vmem:[#allocation2 + $0x18] sm:$0x1] %v5116_v7  ;;  %v3298_v15 = vld [vmem:[%s6422_s1 + $0x220] sm:$0xff]  ;;  %v3299_v16 = vld [vmem:[%s6422_s1 + $0x228] sm:$0xff]  ;;  %4659 = vmatprep.subr.bf16.mxu0 %v5207_v8  ;;  %4533 = vmatpush3.bf16.msra.mxu1 %v4530_v3  ;;  %v4538_v17 = vpack.c.bf16 %v3251_v14, %v3250_v12  ;;  %s5258_s25 = scalar_lea.vmem %s6421_s0, %s3376_s14  ;;  %s6182_s23 = scalar_lea.vmem %s6423_s2, %s3376_s14 }
  0x12   : > { %191 = vst [vmem:[#allocation2 + $0x30] sm:$0x1] %v5116_v7  ;;  %192 = vst [vmem:[#allocation2 + $0x48] sm:$0x1] %v5116_v7  ;;  %4661 = vmatpush3.bf16.msra.mxu0 %v5207_v8  ;;  %4535 = vmatprep.subr.bf16.mxu1 %v4534_v9  ;;  %v5239_v18 = vpack.c.bf16 %v3299_v16, %v3298_v15  ;;  %v3252_v19 = vld [vmem:[%s6422_s1 + $0xb0] sm:$0xff]  ;;  %v3253_v20 = vld [vmem:[%s6422_s1 + $0xb8] sm:$0xff] }
  0x13   : > { %193 = vst [vmem:[#allocation2 + $0x60] sm:$0x1] %v5116_v7  ;;  %194 = vst [vmem:[#allocation2 + $0x78] sm:$0x1] %v5116_v7  ;;  %4663 = vmatprep.subr.bf16.mxu0 %v5224_v13  ;;  %v3300_v21 = vld [vmem:[%s6422_s1 + $0x230] sm:$0xff]  ;;  %v3301_v22 = vld [vmem:[%s6422_s1 + $0x238] sm:$0xff]  ;;  %v4542_v23 = vpack.c.bf16 %v3253_v20, %v3252_v19 }
  0x14   : > { %195 = vst [vmem:[#allocation2 + $0x90] sm:$0x1] %v5116_v7  ;;  %196 = vst [vmem:[#allocation2 + $0xa8] sm:$0x1] %v5116_v7  ;;  %v5262_v24 = vpack.c.bf16 %v3301_v22, %v3300_v21  ;;  %v3254_v25 = vld [vmem:[%s6422_s1 + $0xc0] sm:$0xff]  ;;  %v3255_v26 = vld [vmem:[%s6422_s1 + $0xc8] sm:$0xff] }
  0x15   : > { %197 = vst [vmem:[#allocation2 + $0xc0] sm:$0x1] %v5116_v7  ;;  %198 = vst [vmem:[#allocation2 + $0xd8] sm:$0x1] %v5116_v7  ;;  %4537 = vmatpush3.bf16.msra.mxu1 %v4534_v9  ;;  %v3302_v28 = vld [vmem:[%s6422_s1 + $0x240] sm:$0xff]  ;;  %v3303_v29 = vld [vmem:[%s6422_s1 + $0x248] sm:$0xff]  ;;  %v4546_v32 = vpack.c.bf16 %v3255_v26, %v3254_v25 }
  0x16   : > { %199 = vst [vmem:[#allocation2 + $0xf0] sm:$0x1] %v5116_v7  ;;  %200 = vst [vmem:[#allocation2 + $0x108] sm:$0x1] %v5116_v7  ;;  %4665 = vmatpush3.bf16.msra.mxu0 %v5224_v13  ;;  %4539 = vmatprep.subr.bf16.mxu1 %v4538_v17  ;;  %v334_v27 = vld [vmem:[#allocation2 + $0x1] sm:$0xff]  ;;  %v5287_v33 = vld [vmem:[%s5258_s25 + $0x10] sm:$0xff]  ;;  %v5293_v35 = vpack.c.bf16 %v3303_v29, %v3302_v28 }
  0x17   : > { %201 = vst [vmem:[#allocation2 + $0x120] sm:$0x1] %v5116_v7  ;;  %202 = vst [vmem:[#allocation2 + $0x138] sm:$0x1] %v5116_v7  ;;  %4667 = vmatprep.subr.bf16.mxu0 %v5239_v18  ;;  %3842 = vmatprep.mubr.f32.mxu1 %v334_v27  ;;  %v5277_v30 = vld [vmem:[%s5258_s25] sm:$0xff]  ;;  %v5282_v31 = vld [vmem:[%s5258_s25 + $0x8] sm:$0xff] }
  0x18   : > { %203 = vst [vmem:[#allocation2 + $0x150] sm:$0x1] %v5116_v7  ;;  %204 = vst [vmem:[#allocation2 + $0x168] sm:$0x1] %v5116_v7  ;;  %4162 = vmatprep.mubr.f32.mxu0 %v5277_v30  ;;  %v5290_v34 = vld [vmem:[%s5258_s25 + $0x18] sm:$0xff]  ;;  %v3256_v36 = vld [vmem:[%s6422_s1 + $0xd0] sm:$0xff] }
  0x19   : > { %205 = vst [vmem:[#allocation2 + $0x180] sm:$0x1] %v5116_v7  ;;  %206 = vst [vmem:[#allocation2 + $0x29] sm:$0x1] %v5116_v7  ;;  %4541 = vmatpush3.bf16.msra.mxu1 %v4538_v17  ;;  %v3257_v37 = vld [vmem:[%s6422_s1 + $0xd8] sm:$0xff]  ;;  %v5304_v38 = vld [vmem:[%s5258_s25 + $0x20] sm:$0xff] }
  0x1a   : > { %207 = vst [vmem:[#allocation2 + $0x41] sm:$0x1] %v5116_v7  ;;  %208 = vst [vmem:[#allocation2 + $0x59] sm:$0x1] %v5116_v7  ;;  %4669 = vmatpush3.bf16.msra.mxu0 %v5239_v18  ;;  %4543 = vmatprep.subr.bf16.mxu1 %v4542_v23  ;;  %v3304_v39 = vld [vmem:[%s6422_s1 + $0x250] sm:$0xff]  ;;  %v3305_v40 = vld [vmem:[%s6422_s1 + $0x258] sm:$0xff]  ;;  %v4550_v43 = vpack.c.bf16 %v3257_v37, %v3256_v36 }
  0x1b   : > { %209 = vst [vmem:[#allocation2 + $0x71] sm:$0x1] %v5116_v7  ;;  %210 = vst [vmem:[#allocation2 + $0x89] sm:$0x1] %v5116_v7  ;;  %4671 = vmatprep.subr.bf16.mxu0 %v5262_v24  ;;  %v5314_v41 = vld [vmem:[%s5258_s25 + $0x28] sm:$0xff]  ;;  %v5318_v42 = vld [vmem:[%s5258_s25 + $0x30] sm:$0xff]  ;;  %v5326_v45 = vpack.c.bf16 %v3305_v40, %v3304_v39 }
  0x1c   : > { %211 = vst [vmem:[#allocation2 + $0xa1] sm:$0x1] %v5116_v7  ;;  %212 = vst [vmem:[#allocation2 + $0xb9] sm:$0x1] %v5116_v7  ;;  %v5323_v44 = vld [vmem:[%s5258_s25 + $0x38] sm:$0xff]  ;;  %v3258_v46 = vld [vmem:[%s6422_s1 + $0xe0] sm:$0xff] }
  0x1d   : > { %213 = vst [vmem:[#allocation2 + $0xd1] sm:$0x1] %v5116_v7  ;;  %214 = vst [vmem:[#allocation2 + $0xe9] sm:$0x1] %v5116_v7  ;;  %4545 = vmatpush3.bf16.msra.mxu1 %v4542_v23  ;;  %v3259_v47 = vld [vmem:[%s6422_s1 + $0xe8] sm:$0xff]  ;;  %v5336_v48 = vld [vmem:[%s5258_s25 + $0x40] sm:$0xff] }
  0x1e   : > { %215 = vst [vmem:[#allocation2 + $0x101] sm:$0x1] %v5116_v7  ;;  %216 = vst [vmem:[#allocation2 + $0x119] sm:$0x1] %v5116_v7  ;;  %4673 = vmatpush3.bf16.msra.mxu0 %v5262_v24  ;;  %4547 = vmatprep.subr.bf16.mxu1 %v4546_v32  ;;  %v3306_v49 = vld [vmem:[%s6422_s1 + $0x260] sm:$0xff]  ;;  %v3307_v50 = vld [vmem:[%s6422_s1 + $0x268] sm:$0xff]  ;;  %v4554_v54 = vpack.c.bf16 %v3259_v47, %v3258_v46 }
  0x1f   : > { %217 = vst [vmem:[#allocation2 + $0x131] sm:$0x1] %v5116_v7  ;;  %218 = vst [vmem:[#allocation2 + $0x149] sm:$0x1] %v5116_v7  ;;  %4675 = vmatprep.subr.bf16.mxu0 %v5293_v35  ;;  %v5346_v51 = vld [vmem:[%s5258_s25 + $0x48] sm:$0xff]  ;;  %v5350_v52 = vld [vmem:[%s5258_s25 + $0x50] sm:$0xff]  ;;  %v5365_v57 = vpack.c.bf16 %v3307_v50, %v3306_v49 }
  0x20   : > { %219 = vst [vmem:[#allocation2 + $0x161] sm:$0x1] %v5116_v7  ;;  %220 = vst [vmem:[#allocation2 + $0x179] sm:$0x1] %v5116_v7  ;;  %v5353_v53 = vld [vmem:[%s5258_s25 + $0x58] sm:$0xff]  ;;  %v3260_v55 = vld [vmem:[%s6422_s1 + $0xf0] sm:$0xff] }
  0x21   : > { %221 = vst [vmem:[#allocation2 + $0x191] sm:$0x1] %v5116_v7  ;;  %6447 = vst [vmem:[#allocation3_spill] sm:$0xff] %v5262_v24  ;;  %4549 = vmatpush3.bf16.msra.mxu1 %v4546_v32  ;;  %v5362_v56 = vld [vmem:[%s5258_s25 + $0x60] sm:$0xff]  ;;  %v3261_v58 = vld [vmem:[%s6422_s1 + $0xf8] sm:$0xff]  ;;  %s3245_s14 = sshll.u32 %s6480_s13, 1 }
  0x22   : > { %254 = vst [vmem:[#allocation2 + $0x19] sm:$0xff] %v5277_v30  ;;  %255 = vst [vmem:[#allocation2 + $0x21] sm:$0xff] %v5282_v31  ;;  %4677 = vmatpush3.bf16.msra.mxu0 %v5293_v35  ;;  %4551 = vmatprep.subr.bf16.mxu1 %v4550_v43  ;;  %v3308_v59 = vld [vmem:[%s6422_s1 + $0x270] sm:$0xff]  ;;  %v5375_v60 = vld [vmem:[%s5258_s25 + $0x68] sm:$0xff]  ;;  %v4558_v0 = vpack.c.bf16 %v3261_v58, %v3260_v55  ;;  %s181_s26 = scalar_lea.vmem %s6424_s3, %s3245_s14 }
  0x23   : > { %6448 = vst [vmem:[#allocation4_spill] sm:$0xff] %v5293_v35  ;;  %256 = vst [vmem:[#allocation2 + $0x31] sm:$0xff] %v5287_v33  ;;  %4679 = vmatprep.subr.bf16.mxu0 %v5326_v45  ;;  %v3309_v61 = vld [vmem:[%s6422_s1 + $0x278] sm:$0xff]  ;;  %v5382_v62 = vld [vmem:[%s5258_s25 + $0x70] sm:$0xff] }
  0x24   : > { %257 = vst [vmem:[#allocation2 + $0x39] sm:$0xff] %v5290_v34  ;;  %258 = vst [vmem:[#allocation2 + $0x49] sm:$0xff] %v5304_v38  ;;  %v5385_v63 = vld [vmem:[%s5258_s25 + $0x78] sm:$0xff]  ;;  %v5391_v1 = vpack.c.bf16 %v3309_v61, %v3308_v59  ;;  %v318_v2 = vld [vmem:[%s6422_s1] sm:$0xff] }
  0x25   : > { %259 = vst [vmem:[#allocation2 + $0x51] sm:$0xff] %v5314_v41  ;;  %260 = vst [vmem:[#allocation2 + $0x61] sm:$0xff] %v5318_v42  ;;  %4553 = vmatpush3.bf16.msra.mxu1 %v4550_v43  ;;  %v319_v3 = vld [vmem:[%s6422_s1 + $0x8] sm:$0xff]  ;;  %v5400_v4 = vld [vmem:[%s5258_s25 + $0x80] sm:$0xff] }
  0x26   : > { %6449 = vst [vmem:[#allocation5_spill] sm:$0xff] %v5326_v45  ;;  %261 = vst [vmem:[#allocation2 + $0x69] sm:$0xff] %v5323_v44  ;;  %4681 = vmatpush3.bf16.msra.mxu0 %v5326_v45  ;;  %4555 = vmatprep.subr.bf16.mxu1 %v4554_v54  ;;  %v3310_v5 = vld [vmem:[%s6422_s1 + $0x280] sm:$0xff]  ;;  %v3311_v6 = vld [vmem:[%s6422_s1 + $0x288] sm:$0xff]  ;;  %v4562_v12 = vpack.c.bf16 %v319_v3, %v318_v2 }
  0x27   : > { %262 = vst [vmem:[#allocation2 + $0x79] sm:$0xff] %v5336_v48  ;;  %263 = vst [vmem:[#allocation2 + $0x81] sm:$0xff] %v5346_v51  ;;  %4683 = vmatprep.subr.bf16.mxu0 %v5365_v57  ;;  %v5410_v9 = vld [vmem:[%s5258_s25 + $0x88] sm:$0xff]  ;;  %v5414_v10 = vld [vmem:[%s5258_s25 + $0x90] sm:$0xff]  ;;  %v4690_v15 = vpack.c.bf16 %v3311_v6, %v3310_v5 }
  0x28   : > { %264 = vst [vmem:[#allocation2 + $0x91] sm:$0xff] %v5350_v52  ;;  %265 = vst [vmem:[#allocation2 + $0x99] sm:$0xff] %v5353_v53  ;;  %v5417_v11 = vld [vmem:[%s5258_s25 + $0x98] sm:$0xff]  ;;  %v335_v14 = vld [vmem:[#allocation2 + $0x9] sm:$0xff] }
  0x29   : > { %6450 = vst [vmem:[#allocation6_spill] sm:$0xff] %v5365_v57  ;;  %266 = vst [vmem:[#allocation2 + $0xa9] sm:$0xff] %v5362_v56  ;;  %4557 = vmatpush3.bf16.msra.mxu1 %v4554_v54  ;;  %v3312_v16 = vld [vmem:[%s6422_s1 + $0x290] sm:$0xff]  ;;  %v5427_v17 = vld [vmem:[%s5258_s25 + $0xa0] sm:$0xff] }
  0x2a   : > { %267 = vst [vmem:[#allocation2 + $0xb1] sm:$0xff] %v5375_v60  ;;  %268 = vst [vmem:[#allocation2 + $0xc1] sm:$0xff] %v5382_v62  ;;  %4685 = vmatpush3.bf16.msra.mxu0 %v5365_v57  ;;  %4559 = vmatprep.subr.bf16.mxu1 %v4558_v0  ;;  %v3313_v19 = vld [vmem:[%s6422_s1 + $0x298] sm:$0xff]  ;;  %v320_v20 = vld [vmem:[%s6422_s1 + $0x10] sm:$0xff] }
  0x2b   : > { %269 = vst [vmem:[#allocation2 + $0xc9] sm:$0xff] %v5385_v63  ;;  %6451 = vst [vmem:[#allocation7_spill] sm:$0xff] %v5391_v1  ;;  %4687 = vmatprep.subr.bf16.mxu0 %v5391_v1  ;;  %v5437_v21 = vld [vmem:[%s5258_s25 + $0xa8] sm:$0xff]  ;;  %v321_v22 = vld [vmem:[%s6422_s1 + $0x18] sm:$0xff]  ;;  %v4694_v26 = vpack.c.bf16 %v3313_v19, %v3312_v16 }
  0x2c   : > { %270 = vst [vmem:[#allocation2 + $0xd9] sm:$0xff] %v5400_v4  ;;  %271 = vst [vmem:[#allocation2 + $0xe1] sm:$0xff] %v5410_v9  ;;  %v5444_v23 = vld [vmem:[%s5258_s25 + $0xb0] sm:$0xff]  ;;  %v5447_v25 = vld [vmem:[%s5258_s25 + $0xb8] sm:$0xff]  ;;  %v4566_v29 = vpack.c.bf16 %v321_v22, %v320_v20 }
  0x2d   : > { %272 = vst [vmem:[#allocation2 + $0xf1] sm:$0xff] %v5414_v10  ;;  %273 = vst [vmem:[#allocation2 + $0xf9] sm:$0xff] %v5417_v11  ;;  %4561 = vmatpush3.bf16.msra.mxu1 %v4558_v0  ;;  %v3314_v27 = vld [vmem:[%s6422_s1 + $0x2a0] sm:$0xff]  ;;  %v3315_v32 = vld [vmem:[%s6422_s1 + $0x2a8] sm:$0xff] }
  0x2e   : > { %274 = vst [vmem:[#allocation2 + $0x109] sm:$0xff] %v5427_v17  ;;  %275 = vst [vmem:[#allocation2 + $0x111] sm:$0xff] %v5437_v21  ;;  %4689 = vmatpush3.bf16.msra.mxu0 %v5391_v1  ;;  %4563 = vmatprep.subr.bf16.mxu1 %v4562_v12  ;;  %v5456_v28 = vld [vmem:[%s5258_s25 + $0xc0] sm:$0xff]  ;;  %v5466_v37 = vld [vmem:[%s5258_s25 + $0xc8] sm:$0xff]  ;;  %v4698_v46 = vpack.c.bf16 %v3315_v32, %v3314_v27 }
  0x2f   : > { %276 = vst [vmem:[#allocation2 + $0x121] sm:$0xff] %v5444_v23  ;;  %277 = vst [vmem:[#allocation2 + $0x129] sm:$0xff] %v5447_v25  ;;  %4691 = vmatprep.subr.bf16.mxu0 %v4690_v15  ;;  %v322_v36 = vld [vmem:[%s6422_s1 + $0x20] sm:$0xff]  ;;  %v323_v39 = vld [vmem:[%s6422_s1 + $0x28] sm:$0xff] }
  0x30   : > { %3843 = vmatmul.mubr.f32.vlgmr.msra.gmra.mrb[0].mxu1 %v335_v14  ;;  %278 = vst [vmem:[#allocation2 + $0x139] sm:$0xff] %v5456_v28  ;;  %279 = vst [vmem:[#allocation2 + $0x141] sm:$0xff] %v5466_v37  ;;  %v5474_v40 = vld [vmem:[%s5258_s25 + $0xd0] sm:$0xff]  ;;  %v5477_v43 = vld [vmem:[%s5258_s25 + $0xd8] sm:$0xff]  ;;  %v4570_v50 = vpack.c.bf16 %v323_v39, %v322_v36 }
  0x31   : > { %4163 = vmatmul.mubr.f32.vlgmr.msra.gmra.mrb[0].mxu0 %v5282_v31  ;;  %4565 = vmatpush3.bf16.msra.mxu1 %v4562_v12  ;;  %280 = vst [vmem:[#allocation2 + $0x151] sm:$0xff] %v5474_v40  ;;  %281 = vst [vmem:[#allocation2 + $0x159] sm:$0xff] %v5477_v43  ;;  %v5484_v47 = vld [vmem:[%s5258_s25 + $0xe0] sm:$0xff]  ;;  %v3316_v49 = vld [vmem:[%s6422_s1 + $0x2b0] sm:$0xff] }
  0x32   : > { %4693 = vmatpush3.bf16.msra.mxu0 %v4690_v15  ;;  %3845 = vmatprep.mubr.f32.mxu1 %v5277_v30  ;;  %v3317_v30 = vld [vmem:[%s6422_s1 + $0x2b8] sm:$0xff]  ;;  %282 = vst [vmem:[#allocation2 + $0x169] sm:$0xff] %v5484_v47  ;;  %v5495_v54 = vld [vmem:[%s5258_s25 + $0xe8] sm:$0xff]  ;;  %v326_v0 = vld [vmem:[%s6422_s1 + $0x40] sm:$0xff] }
  0x33   : > { %4165 = vmatprep.mubr.f32.mxu0 %v5287_v33  ;;  %4695 = vmatprep.subr.bf16.mxu0 %v4694_v26  ;;  %v325_v55 = vld [vmem:[%s6422_s1 + $0x38] sm:$0xff]  ;;  %283 = vst [vmem:[#allocation2 + $0x171] sm:$0xff] %v5495_v54  ;;  %v4702_v58 = vpack.c.bf16 %v3317_v30, %v3316_v49  ;;  %v3319_v59 = vld [vmem:[%s6422_s1 + $0x2c8] sm:$0xff]  ;;  %v328_v6 = vld [vmem:[%s6422_s1 + $0x50] sm:$0xff] }
  0x34   : > { %3846 = vmatmul.mubr.f32.gmra.mrb[2].mxu1 %v5282_v31  ;;  %4567 = vmatprep.subr.bf16.mxu1 %v4566_v29  ;;  %v324_v31 = vld [vmem:[%s6422_s1 + $0x30] sm:$0xff]  ;;  %v3321_v3 = vld [vmem:[%s6422_s1 + $0x2d8] sm:$0xff]  ;;  %v3323_v14 = vld [vmem:[%s6422_s1 + $0x2e8] sm:$0xff] }
  0x35   : > { %4166 = vmatmul.mubr.f32.gmra.mrb[2].mxu0 %v5290_v34  ;;  %3848 = vmatprep.mubr.f32.mxu1 %v5287_v33  ;;  %v3318_v33 = vld [vmem:[%s6422_s1 + $0x2c0] sm:$0xff]  ;;  %v4574_v61 = vpack.c.bf16 %v325_v55, %v324_v31  ;;  %v5556_v20 = vld [vmem:[%s5258_s25 + $0xf0] sm:$0xff]  ;;  %v5559_v22 = vld [vmem:[%s5258_s25 + $0xf8] sm:$0xff] }
  0x36   : > { %4697 = vmatpush3.bf16.msra.mxu0 %v4694_v26  ;;  %4168 = vmatprep.mubr.f32.mxu0 %v5304_v38  ;;  %v4706_v2 = vpack.c.bf16 %v3319_v59, %v3318_v33  ;;  %v330_v16 = vld [vmem:[%s6422_s1 + $0x60] sm:$0xff]  ;;  %6452 = vst [vmem:[#allocation8_spill] sm:$0xff] %v5556_v20  ;;  %6453 = vst [vmem:[#allocation9_spill] sm:$0xff] %v5559_v22  ;;  %v3325_v26 = vld [vmem:[%s6422_s1 + $0x2f8] sm:$0xff] }
  0x37   : > { %4699 = vmatprep.subr.bf16.mxu0 %v4698_v46  ;;  %4569 = vmatpush3.bf16.msra.mxu1 %v4566_v29  ;;  %284 = vst [vmem:[#allocation2 + $0x181] sm:$0xff] %v5556_v20  ;;  %285 = vst [vmem:[#allocation2 + $0x189] sm:$0xff] %v5559_v22  ;;  %v333_v29 = vld [vmem:[%s6422_s1 + $0x78] sm:$0xff]  ;;  %v3327_v36 = vld [vmem:[%s6422_s1 + $0x308] sm:$0xff] }
  0x38   : > { %3849 = vmatmul.mubr.f32.gmra.mrb[4].mxu1 %v5290_v34  ;;  %4571 = vmatprep.subr.bf16.mxu1 %v4570_v50  ;;  %v327_v34 = vld [vmem:[%s6422_s1 + $0x48] sm:$0xff]  ;;  %v5595_v49 = vld [vmem:[#allocation2 + $0x1a] sm:$0xff]  ;;  %v5905_v35 = vld [vmem:[#allocation2 + $0x110] sm:$0xff] }
  0x39   : > { %4169 = vmatmul.mubr.f32.gmra.mrb[4].mxu0 %v5314_v41  ;;  %3851 = vmatprep.mubr.f32.mxu1 %v5304_v38  ;;  %v3320_v38 = vld [vmem:[%s6422_s1 + $0x2d0] sm:$0xff]  ;;  %v4578_v5 = vpack.c.bf16 %v327_v34, %v326_v0  ;;  %v5609_v55 = vld [vmem:[#allocation2 + $0x22] sm:$0xff]  ;;  %v5624_v59 = vld [vmem:[#allocation2 + $0x3a] sm:$0xff] }
  0x3a   : > { %4701 = vmatpush3.bf16.msra.mxu0 %v4698_v46  ;;  %4171 = vmatprep.mubr.f32.mxu0 %v5318_v42  ;;  %v4710_v12 = vpack.c.bf16 %v3321_v3, %v3320_v38  ;;  %v3262_v46 = vld [vmem:[%s6422_s1 + $0x100] sm:$0xff]  ;;  %v3332_v0 = vld [vmem:[%s6422_s1 + $0x330] sm:$0xff]  ;;  %v3333_v34 = vld [vmem:[%s6422_s1 + $0x338] sm:$0xff] }
  0x3b   : > { %4703 = vmatprep.subr.bf16.mxu0 %v4702_v58  ;;  %4573 = vmatpush3.bf16.msra.mxu1 %v4570_v50  ;;  %v3329_v50 = vld [vmem:[%s6422_s1 + $0x318] sm:$0xff]  ;;  %v3330_v33 = vld [vmem:[%s6422_s1 + $0x320] sm:$0xff]  ;;  %v3335_v3 = vld [vmem:[%s6422_s1 + $0x348] sm:$0xff] }
  0x3c   : > { %3852 = vmatmul.mubr.f32.gmra.mrb[6].mxu1 %v5314_v41  ;;  %4575 = vmatprep.subr.bf16.mxu1 %v4574_v61  ;;  %v329_v41 = vld [vmem:[%s6422_s1 + $0x58] sm:$0xff]  ;;  %v3334_v38 = vld [vmem:[%s6422_s1 + $0x340] sm:$0xff]  ;;  %v3351_v45 = vld [vmem:[%s6422_s1 + $0x3c8] sm:$0xff] }
  0x3d   : > { %4172 = vmatmul.mubr.f32.gmra.mrb[6].mxu0 %v5323_v44  ;;  %3854 = vmatprep.mubr.f32.mxu1 %v5318_v42  ;;  %v3322_v42 = vld [vmem:[%s6422_s1 + $0x2e0] sm:$0xff]  ;;  %v4582_v15 = vpack.c.bf16 %v329_v41, %v328_v6  ;;  %v3336_v6 = vld [vmem:[%s6422_s1 + $0x350] sm:$0xff]  ;;  %v3337_v41 = vld [vmem:[%s6422_s1 + $0x358] sm:$0xff] }
  0x3e   : > { %4705 = vmatpush3.bf16.msra.mxu0 %v4702_v58  ;;  %4174 = vmatprep.mubr.f32.mxu0 %v5336_v48  ;;  %v4714_v19 = vpack.c.bf16 %v3323_v14, %v3322_v42  ;;  %v3338_v42 = vld [vmem:[%s6422_s1 + $0x360] sm:$0xff]  ;;  %v3339_v14 = vld [vmem:[%s6422_s1 + $0x368] sm:$0xff]  ;;  %v3345_v1 = vld [vmem:[%s6422_s1 + $0x398] sm:$0xff] }
  0x3f   : > { %4707 = vmatprep.subr.bf16.mxu0 %v4706_v2  ;;  %4577 = vmatpush3.bf16.msra.mxu1 %v4574_v61  ;;  %v5876_v22 = vld [vmem:[#allocation2 + $0xe0] sm:$0xff]  ;;  %v3349_v57 = vld [vmem:[%s6422_s1 + $0x3b8] sm:$0xff]  ;;  %v834_v24 = vld [vmem:[#allocation2 + $0xa] sm:$0xff] }
  0x40   : > { %3855 = vmatmul.mubr.f32.gmra.mrb[8].mxu1 %v5323_v44  ;;  %4579 = vmatprep.subr.bf16.mxu1 %v4578_v5  ;;  %v331_v44 = vld [vmem:[%s6422_s1 + $0x68] sm:$0xff]  ;;  %v3350_v20 = vld [vmem:[%s6422_s1 + $0x3c0] sm:$0xff] }
  0x41   : > { %4175 = vmatmul.mubr.f32.gmra.mrb[8].mxu0 %v5346_v51  ;;  %3857 = vmatprep.mubr.f32.mxu1 %v5336_v48  ;;  %v3324_v48 = vld [vmem:[%s6422_s1 + $0x2f0] sm:$0xff]  ;;  %v4586_v27 = vpack.c.bf16 %v331_v44, %v330_v16  ;;  %v3341_v44 = vld [vmem:[%s6422_s1 + $0x378] sm:$0xff] }
  0x42   : > { %4709 = vmatpush3.bf16.msra.mxu0 %v4706_v2  ;;  %4177 = vmatprep.mubr.f32.mxu0 %v5350_v52  ;;  %v4718_v32 = vpack.c.bf16 %v3325_v26, %v3324_v48  ;;  %v5640_v2 = vld [vmem:[#allocation2 + $0x62] sm:$0xff]  ;;  %v3340_v16 = vld [vmem:[%s6422_s1 + $0x370] sm:$0xff] }
  0x43   : > { %4711 = vmatprep.subr.bf16.mxu0 %v4710_v12  ;;  %4581 = vmatpush3.bf16.msra.mxu1 %v4578_v5  ;;  %v5654_v5 = vld [vmem:[#allocation2 + $0x7a] sm:$0xff]  ;;  %v3343_v26 = vld [vmem:[%s6422_s1 + $0x388] sm:$0xff] }
  0x44   : > { %3858 = vmatmul.mubr.f32.gmra.mrb[10].mxu1 %v5346_v51  ;;  %4583 = vmatprep.subr.bf16.mxu1 %v4582_v15  ;;  %v332_v51 = vld [vmem:[%s6422_s1 + $0x70] sm:$0xff]  ;;  %v3342_v48 = vld [vmem:[%s6422_s1 + $0x380] sm:$0xff] }
  0x45   : > { %4178 = vmatmul.mubr.f32.gmra.mrb[10].mxu0 %v5353_v53  ;;  %3860 = vmatprep.mubr.f32.mxu1 %v5350_v52  ;;  %v3326_v52 = vld [vmem:[%s6422_s1 + $0x300] sm:$0xff]  ;;  %v4590_v39 = vpack.c.bf16 %v333_v29, %v332_v51  ;;  %v3264_v51 = vld [vmem:[%s6422_s1 + $0x110] sm:$0xff] }
  0x46   : > { %4713 = vmatpush3.bf16.msra.mxu0 %v4710_v12  ;;  %4180 = vmatprep.mubr.f32.mxu0 %v5362_v56  ;;  %v4722_v30 = vpack.c.bf16 %v3327_v36, %v3326_v52  ;;  %v5668_v12 = vld [vmem:[#allocation2 + $0x92] sm:$0xff]  ;;  %v5724_v29 = vld [vmem:[#allocation2 + $0xe2] sm:$0xff] }
  0x47   : > { %4715 = vmatprep.subr.bf16.mxu0 %v4714_v19  ;;  %4585 = vmatpush3.bf16.msra.mxu1 %v4582_v15  ;;  %v5682_v15 = vld [vmem:[#allocation2 + $0xaa] sm:$0xff]  ;;  %v3266_v36 = vld [vmem:[%s6422_s1 + $0x120] sm:$0xff] }
  0x48   : > { %3861 = vmatmul.mubr.f32.gmra.mrb[12].mxu1 %v5353_v53  ;;  %4587 = vmatprep.subr.bf16.mxu1 %v4586_v27  ;;  %v3263_v53 = vld [vmem:[%s6422_s1 + $0x108] sm:$0xff] }
  0x49   : > { %4181 = vmatmul.mubr.f32.gmra.mrb[12].mxu0 %v5375_v60  ;;  %3863 = vmatprep.mubr.f32.mxu1 %v5362_v56  ;;  %v3328_v56 = vld [vmem:[%s6422_s1 + $0x310] sm:$0xff]  ;;  %v5604_v31 = vpack.c.bf16 %v3263_v53, %v3262_v46  ;;  %v5740_v46 = vld [vmem:[#allocation2 + $0x20] sm:$0xff] }
  0x4a   : > { %4717 = vmatpush3.bf16.msra.mxu0 %v4714_v19  ;;  %4183 = vmatprep.mubr.f32.mxu0 %v5382_v62  ;;  %v4726_v58 = vpack.c.bf16 %v3329_v50, %v3328_v56  ;;  %v5696_v19 = vld [vmem:[#allocation2 + $0xc2] sm:$0xff]  ;;  %v5744_v53 = vld [vmem:[#allocation2 + $0xfa] sm:$0xff]  ;;  %v3268_v50 = vld [vmem:[%s6422_s1 + $0x130] sm:$0xff] }
  0x4b   : > { %4719 = vmatprep.subr.bf16.mxu0 %v4718_v32  ;;  %4589 = vmatpush3.bf16.msra.mxu1 %v4586_v27  ;;  %v5710_v27 = vld [vmem:[#allocation2 + $0xda] sm:$0xff] }
  0x4c   : > { %3864 = vmatmul.mubr.f32.gmra.mrb[14].mxu1 %v5375_v60  ;;  %4591 = vmatprep.subr.bf16.mxu1 %v4590_v39  ;;  %v5611_v60 = vld [vmem:[#allocation2 + $0x32] sm:$0xff] }
  0x4d   : > { %4184 = vmatmul.mubr.f32.gmra.mrb[14].mxu0 %v5385_v63  ;;  %3866 = vmatprep.mubr.f32.mxu1 %v5382_v62  ;;  %v3331_v62 = vld [vmem:[%s6422_s1 + $0x328] sm:$0xff] }
  0x4e   : > { %4721 = vmatpush3.bf16.msra.mxu0 %v4718_v32  ;;  %4242 = vmatprep.mubr.f32.mxu0 %v5595_v49  ;;  %v4730_v61 = vpack.c.bf16 %v3331_v62, %v3330_v33  ;;  %v5726_v32 = vld [vmem:[#allocation2 + $0x18] sm:$0xff]  ;;  %v5764_v62 = vld [vmem:[#allocation2 + $0x48] sm:$0xff] }
  0x4f   : > { %4723 = vmatprep.subr.bf16.mxu0 %v4722_v30  ;;  %4593 = vmatpush3.bf16.msra.mxu1 %v4590_v39  ;;  %v3267_v39 = vld [vmem:[%s6422_s1 + $0x128] sm:$0xff]  ;;  %v5762_v33 = vld [vmem:[#allocation2 + $0x112] sm:$0xff] }
  0x50   : > { %3867 = vmatmul.mubr.f32.gmra.mrb[16].mxu1 %v5385_v63  ;;  %4595 = vmatprep.subr.bf16.mxu1 %v5604_v31  ;;  %v5626_v63 = vld [vmem:[#allocation2 + $0x4a] sm:$0xff]  ;;  %v4602_v56 = vpack.c.bf16 %v3267_v39, %v3266_v36 }
  0x51   : > { %4243 = vmatmul.mubr.f32.vlgmr.msra.gmra.mrb[0].mxu0 %v5609_v55  ;;  %3869 = vmatprep.mubr.f32.mxu1 %v5400_v4  ;;  %v5638_v4 = vld [vmem:[#allocation2 + $0x52] sm:$0xff]  ;;  %v5820_v36 = vld [vmem:[#allocation2 + $0x16a] sm:$0xff] }
  0x52   : > { %4725 = vmatpush3.bf16.msra.mxu0 %v4722_v30  ;;  %4245 = vmatprep.mubr.f32.mxu0 %v5611_v60  ;;  %v5748_v30 = vld [vmem:[#allocation2 + $0x10a] sm:$0xff] }
  0x53   : > { %4727 = vmatprep.subr.bf16.mxu0 %v4726_v58 }
  0x54   : > { %3870 = vmatmul.mubr.f32.gmra.mrb[18].mxu1 %v5410_v9  ;;  %v4734_v9 = vpack.c.bf16 %v3333_v34, %v3332_v0  ;;  %v3270_v34 = vld [vmem:[%s6422_s1 + $0x140] sm:$0xff] }
  0x55   : > { %4246 = vmatmul.mubr.f32.gmra.mrb[2].mxu0 %v5624_v59  ;;  %3872 = vmatprep.mubr.f32.mxu1 %v5414_v10  ;;  %v5652_v10 = vld [vmem:[#allocation2 + $0x6a] sm:$0xff] }
  0x56   : > { %4248 = vmatprep.mubr.f32.mxu0 %v5626_v63  ;;  %4729 = vmatpush3.bf16.msra.mxu0 %v4726_v58  ;;  %v5759_v58 = vld [vmem:[#allocation2 + $0x38] sm:$0xff] }
  0x57   : > { %4731 = vmatprep.subr.bf16.mxu0 %v4730_v61 }
  0x58   : > { %3873 = vmatmul.mubr.f32.gmra.mrb[20].mxu1 %v5417_v11  ;;  %v4738_v11 = vpack.c.bf16 %v3335_v3, %v3334_v38  ;;  %v5777_v38 = vld [vmem:[#allocation2 + $0x50] sm:$0xff] }
  0x59   : > { %4249 = vmatmul.mubr.f32.gmra.mrb[4].mxu0 %v5638_v4  ;;  %3875 = vmatprep.mubr.f32.mxu1 %v5427_v17  ;;  %v5666_v17 = vld [vmem:[#allocation2 + $0x82] sm:$0xff]  ;;  %v5780_v3 = vld [vmem:[#allocation2 + $0x12a] sm:$0xff] }
  0x5a   : > { %4251 = vmatprep.mubr.f32.mxu0 %v5640_v2  ;;  %4733 = vmatpush3.bf16.msra.mxu0 %v4730_v61  ;;  %v5766_v61 = vld [vmem:[#allocation2 + $0x122] sm:$0xff] }
  0x5b   : > { %4735 = vmatprep.subr.bf16.mxu0 %v4734_v9 }
  0x5c   : > { %3876 = vmatmul.mubr.f32.gmra.mrb[22].mxu1 %v5437_v21  ;;  %v4742_v21 = vpack.c.bf16 %v3337_v41, %v3336_v6  ;;  %v5784_v6 = vld [vmem:[#allocation2 + $0x13a] sm:$0xff] }
  0x5d   : > { %4252 = vmatmul.mubr.f32.gmra.mrb[6].mxu0 %v5652_v10  ;;  %3878 = vmatprep.mubr.f32.mxu1 %v5444_v23  ;;  %v5680_v23 = vld [vmem:[#allocation2 + $0x9a] sm:$0xff] }
  0x5e   : > { %4254 = vmatprep.mubr.f32.mxu0 %v5654_v5  ;;  %4737 = vmatpush3.bf16.msra.mxu0 %v4734_v9  ;;  %v3271_v9 = vld [vmem:[%s6422_s1 + $0x148] sm:$0xff] }
  0x5f   : > { %4739 = vmatprep.subr.bf16.mxu0 %v4738_v11  ;;  %v4610_v41 = vpack.c.bf16 %v3271_v9, %v3270_v34  ;;  %v5836_v34 = vld [vmem:[#allocation2 + $0xa8] sm:$0xff] }
  0x60   : > { %3879 = vmatmul.mubr.f32.gmra.mrb[24].mxu1 %v5447_v25  ;;  %v4746_v25 = vpack.c.bf16 %v3339_v14, %v3338_v42  ;;  %v3273_v42 = vld [vmem:[%s6422_s1 + $0x158] sm:$0xff]  ;;  %v5795_v14 = vld [vmem:[#allocation2 + $0x68] sm:$0xff]  ;;  %6459 = vst [vmem:[#allocation15_spill] sm:$0xff] %v5836_v34 }
  0x61   : > { %4255 = vmatmul.mubr.f32.gmra.mrb[8].mxu0 %v5666_v17  ;;  %3881 = vmatprep.mubr.f32.mxu1 %v5456_v28  ;;  %v5694_v28 = vld [vmem:[#allocation2 + $0xb2] sm:$0xff]  ;;  %6454 = vst [vmem:[#allocation10_spill] sm:$0xff] %v5795_v14  ;;  %v1781_v9 = vld [vmem:[#allocation2 + $0x182] sm:$0xff] }
  0x62   : > { %4257 = vmatprep.mubr.f32.mxu0 %v5668_v12  ;;  %4741 = vmatpush3.bf16.msra.mxu0 %v4738_v11  ;;  %v5782_v11 = vld [vmem:[#allocation2 + $0x60] sm:$0xff] }
  0x63   : > { %4743 = vmatprep.subr.bf16.mxu0 %v4742_v21 }
  0x64   : > { %3882 = vmatmul.mubr.f32.gmra.mrb[26].mxu1 %v5466_v37  ;;  %v4750_v37 = vpack.c.bf16 %v3341_v44, %v3340_v16  ;;  %v5800_v16 = vld [vmem:[#allocation2 + $0x78] sm:$0xff] }
  0x65   : > { %4258 = vmatmul.mubr.f32.gmra.mrb[10].mxu0 %v5680_v23  ;;  %3884 = vmatprep.mubr.f32.mxu1 %v5474_v40  ;;  %v5708_v40 = vld [vmem:[#allocation2 + $0xca] sm:$0xff]  ;;  %6455 = vst [vmem:[#allocation11_spill] sm:$0xff] %v5800_v16  ;;  %v5802_v44 = vld [vmem:[#allocation2 + $0x152] sm:$0xff] }
  0x66   : > { %4260 = vmatprep.mubr.f32.mxu0 %v5682_v15  ;;  %4745 = vmatpush3.bf16.msra.mxu0 %v4742_v21  ;;  %v3272_v21 = vld [vmem:[%s6422_s1 + $0x150] sm:$0xff] }
  0x67   : > { %4747 = vmatprep.subr.bf16.mxu0 %v4746_v25 }
  0x68   : > { %3885 = vmatmul.mubr.f32.gmra.mrb[28].mxu1 %v5477_v43  ;;  %v5712_v43 = vpack.c.bf16 %v3343_v26, %v3342_v48  ;;  %v3274_v48 = vld [vmem:[%s6422_s1 + $0x160] sm:$0xff]  ;;  %v3275_v26 = vld [vmem:[%s6422_s1 + $0x168] sm:$0xff] }
  0x69   : > { %4261 = vmatmul.mubr.f32.gmra.mrb[12].mxu0 %v5694_v28  ;;  %3887 = vmatprep.mubr.f32.mxu1 %v5484_v47  ;;  %v3265_v47 = vld [vmem:[%s6422_s1 + $0x118] sm:$0xff]  ;;  %v4618_v39 = vpack.c.bf16 %v3275_v26, %v3274_v48  ;;  %v5847_v48 = vld [vmem:[#allocation2 + $0xb0] sm:$0xff]  ;;  %v5849_v26 = vld [vmem:[#allocation2 + $0xc0] sm:$0xff] }
  0x6a   : > { %4263 = vmatprep.mubr.f32.mxu0 %v5696_v19  ;;  %4749 = vmatpush3.bf16.msra.mxu0 %v4746_v25  ;;  %v4598_v52 = vpack.c.bf16 %v3265_v47, %v3264_v51  ;;  %v5798_v25 = vld [vmem:[#allocation2 + $0x142] sm:$0xff]  ;;  %v5816_v47 = vld [vmem:[#allocation2 + $0x15a] sm:$0xff]  ;;  %6460 = vst [vmem:[#allocation16_spill] sm:$0xff] %v5847_v48  ;;  %6461 = vst [vmem:[#allocation17_spill] sm:$0xff] %v5849_v26 }
  0x6b   : > { %4751 = vmatprep.subr.bf16.mxu0 %v4750_v37  ;;  %v5813_v51 = vld [vmem:[#allocation2 + $0x80] sm:$0xff] }
  0x6c   : > { %3888 = vmatmul.mubr.f32.gmra.mrb[30].mxu1 %v5495_v54  ;;  %v5728_v54 = vld [vmem:[#allocation2 + $0xf2] sm:$0xff]  ;;  %6456 = vst [vmem:[#allocation12_spill] sm:$0xff] %v5813_v51 }
  0x6d   : > { %4264 = vmatmul.mubr.f32.gmra.mrb[14].mxu0 %v5708_v40  ;;  %3922 = vmatprep.mubr.f32.mxu1 %v5116_v7 }
  0x6e   : > { %4266 = vmatprep.mubr.f32.mxu0 %v5710_v27  ;;  %4753 = vmatpush3.bf16.msra.mxu0 %v4750_v37  ;;  %v4614_v37 = vpack.c.bf16 %v3273_v42, %v3272_v21  ;;  %v3278_v21 = vld [vmem:[%s6422_s1 + $0x180] sm:$0xff]  ;;  %v3279_v42 = vld [vmem:[%s6422_s1 + $0x188] sm:$0xff] }
  0x6f   : > { %4755 = vmatprep.subr.bf16.mxu0 %v5712_v43 }
  0x70   : > { %3923 = vmatmul.mubr.f32.vlgmr.msra.gmra.mrb[0].mxu1 %v5116_v7  ;;  %v5746_v7 = vld [vmem:[#allocation2 + $0x30] sm:$0xff] }
  0x71   : > { %4267 = vmatmul.mubr.f32.gmra.mrb[16].mxu0 %v5724_v29  ;;  %4597 = vmatpush3.bf16.msra.mxu1 %v5604_v31  ;;  %v3269_v31 = vld [vmem:[%s6422_s1 + $0x138] sm:$0xff] }
  0x72   : > { %3925 = vmatprep.mubr.f32.mxu1 %v5726_v32  ;;  %4269 = vmatprep.mubr.f32.mxu0 %v5728_v54  ;;  %v4606_v0 = vpack.c.bf16 %v3269_v31, %v3268_v50  ;;  %v3277_v50 = vld [vmem:[%s6422_s1 + $0x178] sm:$0xff] }
  0x73   : > { %4599 = vmatprep.subr.bf16.mxu1 %v4598_v52  ;;  %v5831_v31 = vld [vmem:[#allocation2 + $0x98] sm:$0xff] }
  0x74   : > { %3926 = vmatmul.mubr.f32.gmra.mrb[2].mxu1 %v5740_v46  ;;  %6458 = vst [vmem:[#allocation14_spill] sm:$0xff] %v5831_v31 }
  0x75   : > { %4270 = vmatmul.mubr.f32.gmra.mrb[18].mxu0 %v5744_v53  ;;  %3928 = vmatprep.mubr.f32.mxu1 %v5746_v7 }
  0x76   : > { %4272 = vmatprep.mubr.f32.mxu0 %v5748_v30  ;;  %4601 = vmatpush3.bf16.msra.mxu1 %v4598_v52  ;;  %v5818_v52 = vld [vmem:[#allocation2 + $0x90] sm:$0xff] }
  0x77   : > { %4603 = vmatprep.subr.bf16.mxu1 %v4602_v56  ;;  %6457 = vst [vmem:[#allocation13_spill] sm:$0xff] %v5818_v52 }
  0x78   : > { %3929 = vmatmul.mubr.f32.gmra.mrb[4].mxu1 %v5759_v58 }
  0x79   : > { %4273 = vmatmul.mubr.f32.gmra.mrb[20].mxu0 %v5762_v33  ;;  %3931 = vmatprep.mubr.f32.mxu1 %v5764_v62 }
  0x7a   : > { %4275 = vmatprep.mubr.f32.mxu0 %v5766_v61  ;;  %4605 = vmatpush3.bf16.msra.mxu1 %v4602_v56  ;;  %v3276_v56 = vld [vmem:[%s6422_s1 + $0x170] sm:$0xff] }
  0x7b   : > { %4607 = vmatprep.subr.bf16.mxu1 %v4606_v0 }
  0x7c   : > { %3932 = vmatmul.mubr.f32.gmra.mrb[6].mxu1 %v5777_v38 }
  0x7d   : > { %4276 = vmatmul.mubr.f32.gmra.mrb[22].mxu0 %v5780_v3  ;;  %3934 = vmatprep.mubr.f32.mxu1 %v5782_v11 }
  0x7e   : > { %4278 = vmatprep.mubr.f32.mxu0 %v5784_v6  ;;  %4609 = vmatpush3.bf16.msra.mxu1 %v4606_v0  ;;  %v5834_v0 = vld [vmem:[#allocation2 + $0x172] sm:$0xff] }
  0x7f   : > { %4611 = vmatprep.subr.bf16.mxu1 %v4610_v41 }
  0x80   : > { %3935 = vmatmul.mubr.f32.gmra.mrb[8].mxu1 %v5795_v14 }
  0x81   : > { %4279 = vmatmul.mubr.f32.gmra.mrb[24].mxu0 %v5798_v25  ;;  %3937 = vmatprep.mubr.f32.mxu1 %v5800_v16 }
  0x82   : > { %4281 = vmatprep.mubr.f32.mxu0 %v5802_v44  ;;  %4613 = vmatpush3.bf16.msra.mxu1 %v4610_v41  ;;  %v4622_v41 = vpack.c.bf16 %v3277_v50, %v3276_v56  ;;  %v5851_v56 = vpack.c.bf16 %v3279_v42, %v3278_v21  ;;  %v3344_v50 = vld [vmem:[%s6422_s1 + $0x390] sm:$0xff]  ;;  %v3346_v42 = vld [vmem:[%s6422_s1 + $0x3a0] sm:$0xff] }
  0x83   : > { %4615 = vmatprep.subr.bf16.mxu1 %v4614_v37  ;;  %v4758_v21 = vpack.c.bf16 %v3345_v1, %v3344_v50  ;;  %v5880_v1 = vld [vmem:[#allocation2 + $0xf0] sm:$0xff] }
  0x84   : > { %3938 = vmatmul.mubr.f32.gmra.mrb[10].mxu1 %v5813_v51  ;;  %v3348_v50 = vld [vmem:[%s6422_s1 + $0x3b0] sm:$0xff] }
  0x85   : > { %4282 = vmatmul.mubr.f32.gmra.mrb[26].mxu0 %v5816_v47  ;;  %3940 = vmatprep.mubr.f32.mxu1 %v5818_v52 }
  0x86   : > { %4284 = vmatprep.mubr.f32.mxu0 %v5820_v36  ;;  %4617 = vmatpush3.bf16.msra.mxu1 %v4614_v37  ;;  %v1782_v37 = vld [vmem:[#allocation2 + $0x18a] sm:$0xff] }
  0x87   : > { %4619 = vmatprep.subr.bf16.mxu1 %v4618_v39 }
  0x88   : > { %3941 = vmatmul.mubr.f32.gmra.mrb[12].mxu1 %v5831_v31 }
  0x89   : > { %4285 = vmatmul.mubr.f32.gmra.mrb[28].mxu0 %v5834_v0  ;;  %3943 = vmatprep.mubr.f32.mxu1 %v5836_v34 }
  0x8a   : > { %4287 = vmatprep.mubr.f32.mxu0 %v1781_v9  ;;  %4621 = vmatpush3.bf16.msra.mxu1 %v4618_v39  ;;  %v5861_v9 = vld [vmem:[#allocation2 + $0xc8] sm:$0xff]  ;;  %v5864_v39 = vld [vmem:[#allocation2 + $0xd8] sm:$0xff] }
  0x8b   : > { %4623 = vmatprep.subr.bf16.mxu1 %v4622_v41  ;;  %6462 = vst [vmem:[#allocation18_spill] sm:$0xff] %v5861_v9 }
  0x8c   : > { %3944 = vmatmul.mubr.f32.gmra.mrb[14].mxu1 %v5847_v48 }
  0x8d   : > { %4288 = vmatmul.mubr.f32.gmra.mrb[30].mxu0 %v1782_v37  ;;  %3946 = vmatprep.mubr.f32.mxu1 %v5849_v26  ;;  %v3347_v37 = vld [vmem:[%s6422_s1 + $0x3a8] sm:$0xff] }
  0x8e   : > { %4322 = vmatprep.mubr.f32.mxu0 %v5746_v7  ;;  %4625 = vmatpush3.bf16.msra.mxu1 %v4622_v41  ;;  %v4762_v41 = vpack.c.bf16 %v3347_v37, %v3346_v42  ;;  %v5894_v42 = vld [vmem:[#allocation2 + $0x108] sm:$0xff]  ;;  %v4766_v37 = vpack.c.bf16 %v3349_v57, %v3348_v50  ;;  %v4770_v57 = vpack.c.bf16 %v3351_v45, %v3350_v20  ;;  %v3352_v50 = vld [vmem:[%s6422_s1 + $0x3d0] sm:$0xff]  ;;  %v3354_v20 = vld [vmem:[%s6422_s1 + $0x3e0] sm:$0xff] }
  0x8f   : > { %4627 = vmatprep.subr.bf16.mxu1 %v5851_v56 }
  0x90   : > { %3947 = vmatmul.mubr.f32.gmra.mrb[16].mxu1 %v5861_v9 }
  0x91   : > { %4323 = vmatmul.mubr.f32.vlgmr.msra.gmra.mrb[0].mxu0 %v5759_v58  ;;  %3949 = vmatprep.mubr.f32.mxu1 %v5864_v39 }
  0x92   : > { %4757 = vmatpush3.bf16.msra.mxu0 %v5712_v43  ;;  %4325 = vmatprep.mubr.f32.mxu0 %v5764_v62  ;;  %v5891_v43 = vld [vmem:[#allocation2 + $0xf8] sm:$0xff] }
  0x93   : > { %4759 = vmatprep.subr.bf16.mxu0 %v4758_v21 }
  0x94   : > { %3950 = vmatmul.mubr.f32.gmra.mrb[18].mxu1 %v5876_v22 }
  0x95   : > { %4326 = vmatmul.mubr.f32.gmra.mrb[2].mxu0 %v5777_v38  ;;  %3952 = vmatprep.mubr.f32.mxu1 %v5880_v1 }
  0x96   : > { %4328 = vmatprep.mubr.f32.mxu0 %v5782_v11  ;;  %4761 = vmatpush3.bf16.msra.mxu0 %v4758_v21  ;;  %v5908_v21 = vld [vmem:[#allocation2 + $0x120] sm:$0xff] }
  0x97   : > { %4763 = vmatprep.subr.bf16.mxu0 %v4762_v41 }
  0x98   : > { %3953 = vmatmul.mubr.f32.gmra.mrb[20].mxu1 %v5891_v43 }
  0x99   : > { %4329 = vmatmul.mubr.f32.gmra.mrb[4].mxu0 %v5795_v14  ;;  %3955 = vmatprep.mubr.f32.mxu1 %v5894_v42  ;;  %v3353_v14 = vld [vmem:[%s6422_s1 + $0x3d8] sm:$0xff] }
  0x9a   : > { %4331 = vmatprep.mubr.f32.mxu0 %v5800_v16  ;;  %4765 = vmatpush3.bf16.msra.mxu0 %v4762_v41  ;;  %v5919_v16 = vld [vmem:[#allocation2 + $0x128] sm:$0xff]  ;;  %v5922_v41 = vld [vmem:[#allocation2 + $0x138] sm:$0xff]  ;;  %v4774_v45 = vpack.c.bf16 %v3353_v14, %v3352_v50  ;;  %v3356_v50 = vld [vmem:[%s6422_s1 + $0x3f0] sm:$0xff] }
  0x9b   : > { %4767 = vmatprep.subr.bf16.mxu0 %v4766_v37 }
  0x9c   : > { %3956 = vmatmul.mubr.f32.gmra.mrb[22].mxu1 %v5905_v35 }
  0x9d   : > { %4332 = vmatmul.mubr.f32.gmra.mrb[6].mxu0 %v5813_v51  ;;  %3958 = vmatprep.mubr.f32.mxu1 %v5908_v21  ;;  %v3355_v51 = vld [vmem:[%s6422_s1 + $0x3e8] sm:$0xff] }
  0x9e   : > { %4334 = vmatprep.mubr.f32.mxu0 %v5818_v52  ;;  %4769 = vmatpush3.bf16.msra.mxu0 %v4766_v37  ;;  %v5933_v52 = vld [vmem:[#allocation2 + $0x140] sm:$0xff]  ;;  %v5936_v37 = vld [vmem:[#allocation2 + $0x150] sm:$0xff]  ;;  %v4778_v14 = vpack.c.bf16 %v3355_v51, %v3354_v20 }
  0x9f   : > { %4771 = vmatprep.subr.bf16.mxu0 %v4770_v57  ;;  %v3358_v20 = vld [vmem:[%s6422_s1 + $0x400] sm:$0xff] }
  0xa0   : > { %3959 = vmatmul.mubr.f32.gmra.mrb[24].mxu1 %v5919_v16 }
  0xa1   : > { %4335 = vmatmul.mubr.f32.gmra.mrb[8].mxu0 %v5831_v31  ;;  %3961 = vmatprep.mubr.f32.mxu1 %v5922_v41  ;;  %v3357_v31 = vld [vmem:[%s6422_s1 + $0x3f8] sm:$0xff] }
  0xa2   : > { %4337 = vmatprep.mubr.f32.mxu0 %v5836_v34  ;;  %4773 = vmatpush3.bf16.msra.mxu0 %v4770_v57  ;;  %v5947_v34 = vld [vmem:[#allocation2 + $0x158] sm:$0xff]  ;;  %v5950_v57 = vld [vmem:[#allocation2 + $0x168] sm:$0xff]  ;;  %v4782_v51 = vpack.c.bf16 %v3357_v31, %v3356_v50  ;;  %v3280_v50 = vld [vmem:[%s6422_s1 + $0x190] sm:$0xff] }
  0xa3   : > { %4775 = vmatprep.subr.bf16.mxu0 %v4774_v45 }
  0xa4   : > { %3962 = vmatmul.mubr.f32.gmra.mrb[26].mxu1 %v5933_v52 }
  0xa5   : > { %4338 = vmatmul.mubr.f32.gmra.mrb[10].mxu0 %v5847_v48  ;;  %3964 = vmatprep.mubr.f32.mxu1 %v5936_v37  ;;  %v3359_v48 = vld [vmem:[%s6422_s1 + $0x408] sm:$0xff] }
  0xa6   : > { %4340 = vmatprep.mubr.f32.mxu0 %v5849_v26  ;;  %4777 = vmatpush3.bf16.msra.mxu0 %v4774_v45  ;;  %v5961_v26 = vld [vmem:[#allocation2 + $0x170] sm:$0xff]  ;;  %v833_v45 = vld [vmem:[#allocation2 + $0x2] sm:$0xff]  ;;  %v5964_v31 = vpack.c.bf16 %v3359_v48, %v3358_v20 }
  0xa7   : > { %4779 = vmatprep.subr.bf16.mxu0 %v4778_v14  ;;  %v3282_v48 = vld [vmem:[%s6422_s1 + $0x1a0] sm:$0xff]  ;;  %v3283_v20 = vld [vmem:[%s6422_s1 + $0x1a8] sm:$0xff] }
  0xa8   : > { %3965 = vmatmul.mubr.f32.gmra.mrb[28].mxu1 %v5947_v34 }
  0xa9   : > { %4341 = vmatmul.mubr.f32.gmra.mrb[12].mxu0 %v5861_v9  ;;  %3967 = vmatprep.mubr.f32.mxu1 %v5950_v57  ;;  %v3281_v9 = vld [vmem:[%s6422_s1 + $0x198] sm:$0xff] }
  0xaa   : > { %4343 = vmatprep.mubr.f32.mxu0 %v5864_v39  ;;  %4781 = vmatpush3.bf16.msra.mxu0 %v4778_v14  ;;  %v4630_v14 = vpack.c.bf16 %v3281_v9, %v3280_v50  ;;  %v4634_v9 = vpack.c.bf16 %v3283_v20, %v3282_v48  ;;  %v3291_v50 = vld [vmem:[%s6422_s1 + $0x1e8] sm:$0xff]  ;;  %v3293_v48 = vld [vmem:[%s6422_s1 + $0x1f8] sm:$0xff] }
  0xab   : > { %4783 = vmatprep.subr.bf16.mxu0 %v4782_v51 }
  0xac   : > { %3968 = vmatmul.mubr.f32.gmra.mrb[30].mxu1 %v5961_v26 }
  0xad   : > { %4344 = vmatmul.mubr.f32.gmra.mrb[14].mxu0 %v5876_v22  ;;  %4002 = vmatprep.mubr.f32.mxu1 %v833_v45  ;;  %v3289_v45 = vld [vmem:[%s6422_s1 + $0x1d8] sm:$0xff] }
  0xae   : > { %4346 = vmatprep.mubr.f32.mxu0 %v5880_v1  ;;  %4785 = vmatpush3.bf16.msra.mxu0 %v4782_v51  ;;  %v3285_v51 = vld [vmem:[%s6422_s1 + $0x1b8] sm:$0xff] }
  0xaf   : > { %4787 = vmatprep.subr.bf16.mxu0 %v5964_v31 }
  0xb0   : > { %4003 = vmatmul.mubr.f32.vlgmr.msra.gmra.mrb[0].mxu1 %v834_v24  ;;  %v3284_v24 = vld [vmem:[%s6422_s1 + $0x1b0] sm:$0xff] }
  0xb1   : > { %4347 = vmatmul.mubr.f32.gmra.mrb[16].mxu0 %v5891_v43  ;;  %4629 = vmatpush3.bf16.msra.mxu1 %v5851_v56  ;;  %v3287_v56 = vld [vmem:[%s6422_s1 + $0x1c8] sm:$0xff] }
  0xb2   : > { %4005 = vmatprep.mubr.f32.mxu1 %v5595_v49  ;;  %4349 = vmatprep.mubr.f32.mxu0 %v5894_v42  ;;  %v4638_v49 = vpack.c.bf16 %v3285_v51, %v3284_v24  ;;  %v3361_v24 = vld [vmem:[%s6422_s1 + $0x418] sm:$0xff] }
  0xb3   : > { %4631 = vmatprep.subr.bf16.mxu1 %v4630_v14 }
  0xb4   : > { %4006 = vmatmul.mubr.f32.gmra.mrb[2].mxu1 %v5609_v55  ;;  %v3286_v55 = vld [vmem:[%s6422_s1 + $0x1c0] sm:$0xff] }
  0xb5   : > { %4350 = vmatmul.mubr.f32.gmra.mrb[18].mxu0 %v5905_v35  ;;  %4008 = vmatprep.mubr.f32.mxu1 %v5611_v60  ;;  %v4642_v60 = vpack.c.bf16 %v3287_v56, %v3286_v55  ;;  %v2368_v55 = vld [vmem:[#allocation2 + $0x61] sm:$0xff] }
  0xb6   : > { %4352 = vmatprep.mubr.f32.mxu0 %v5908_v21  ;;  %4633 = vmatpush3.bf16.msra.mxu1 %v4630_v14 }
  0xb7   : > { %4635 = vmatprep.subr.bf16.mxu1 %v4634_v9 }
  0xb8   : > { %4009 = vmatmul.mubr.f32.gmra.mrb[4].mxu1 %v5624_v59  ;;  %v3288_v59 = vld [vmem:[%s6422_s1 + $0x1d0] sm:$0xff] }
  0xb9   : > { %4353 = vmatmul.mubr.f32.gmra.mrb[20].mxu0 %v5919_v16  ;;  %4011 = vmatprep.mubr.f32.mxu1 %v5626_v63  ;;  %v4646_v63 = vpack.c.bf16 %v3289_v45, %v3288_v59  ;;  %v3367_v45 = vld [vmem:[%s6422_s1 + $0x448] sm:$0xff] }
  0xba   : > { %4355 = vmatprep.mubr.f32.mxu0 %v5922_v41  ;;  %4637 = vmatpush3.bf16.msra.mxu1 %v4634_v9  ;;  %v2364_v9 = vld [vmem:[#allocation2 + $0x31] sm:$0xff] }
  0xbb   : > { %4639 = vmatprep.subr.bf16.mxu1 %v4638_v49 }
  0xbc   : > { %4012 = vmatmul.mubr.f32.gmra.mrb[6].mxu1 %v5638_v4  ;;  %v3290_v4 = vld [vmem:[%s6422_s1 + $0x1e0] sm:$0xff] }
  0xbd   : > { %4356 = vmatmul.mubr.f32.gmra.mrb[22].mxu0 %v5933_v52  ;;  %4014 = vmatprep.mubr.f32.mxu1 %v5640_v2  ;;  %v6026_v2 = vld [vmem:[#allocation2 + $0x180] sm:$0xff]  ;;  %v4650_v14 = vpack.c.bf16 %v3291_v50, %v3290_v4  ;;  %v3369_v50 = vld [vmem:[%s6422_s1 + $0x458] sm:$0xff] }
  0xbe   : > { %4358 = vmatprep.mubr.f32.mxu0 %v5936_v37  ;;  %4641 = vmatpush3.bf16.msra.mxu1 %v4638_v49  ;;  %v3363_v49 = vld [vmem:[%s6422_s1 + $0x428] sm:$0xff] }
  0xbf   : > { %4643 = vmatprep.subr.bf16.mxu1 %v4642_v60 }
  0xc0   : > { %4015 = vmatmul.mubr.f32.gmra.mrb[8].mxu1 %v5652_v10  ;;  %v3292_v10 = vld [vmem:[%s6422_s1 + $0x1f0] sm:$0xff] }
  0xc1   : > { %4359 = vmatmul.mubr.f32.gmra.mrb[24].mxu0 %v5947_v34  ;;  %4017 = vmatprep.mubr.f32.mxu1 %v5654_v5  ;;  %v6038_v5 = vld [vmem:[#allocation2 + $0x188] sm:$0xff]  ;;  %v4654_v20 = vpack.c.bf16 %v3293_v48, %v3292_v10 }
  0xc2   : > { %4361 = vmatprep.mubr.f32.mxu0 %v5950_v57  ;;  %4645 = vmatpush3.bf16.msra.mxu1 %v4642_v60  ;;  %v3365_v60 = vld [vmem:[%s6422_s1 + $0x438] sm:$0xff]  ;;  %v3371_v48 = vld [vmem:[%s6422_s1 + $0x468] sm:$0xff] }
  0xc3   : > { %4647 = vmatprep.subr.bf16.mxu1 %v4646_v63 }
  0xc4   : > { %4018 = vmatmul.mubr.f32.gmra.mrb[10].mxu1 %v5666_v17  ;;  %v5099_v17 = vld [vmem:[#allocation2] sm:$0xff] }
  0xc5   : > { %4362 = vmatmul.mubr.f32.gmra.mrb[26].mxu0 %v5961_v26  ;;  %4020 = vmatprep.mubr.f32.mxu1 %v5668_v12  ;;  %v3360_v12 = vld [vmem:[%s6422_s1 + $0x410] sm:$0xff] }
  0xc6   : > { %4364 = vmatprep.mubr.f32.mxu0 %v6026_v2  ;;  %4649 = vmatpush3.bf16.msra.mxu1 %v4646_v63  ;;  %v4790_v51 = vpack.c.bf16 %v3361_v24, %v3360_v12  ;;  %v2372_v63 = vld [vmem:[#allocation2 + $0x91] sm:$0xff]  ;;  %v6101_v12 = vld [vmem:[#allocation2 + $0xd9] sm:$0xff] }
  0xc7   : > { %4651 = vmatprep.subr.bf16.mxu1 %v4650_v14 }
  0xc8   : > { %4021 = vmatmul.mubr.f32.gmra.mrb[12].mxu1 %v5680_v23  ;;  %v2365_v23 = vld [vmem:[#allocation2 + $0x39] sm:$0xff] }
  0xc9   : > { %4365 = vmatmul.mubr.f32.gmra.mrb[28].mxu0 %v6038_v5  ;;  %4023 = vmatprep.mubr.f32.mxu1 %v5682_v15  ;;  %v2366_v15 = vld [vmem:[#allocation2 + $0x49] sm:$0xff] }
  0xca   : > { %4367 = vmatprep.mubr.f32.mxu0 %v5099_v17  ;;  %4653 = vmatpush3.bf16.msra.mxu1 %v4650_v14  ;;  %v2374_v14 = vld [vmem:[#allocation2 + $0xa9] sm:$0xff] }
  0xcb   : > { %4655 = vmatprep.subr.bf16.mxu1 %v4654_v20 }
  0xcc   : > { %4024 = vmatmul.mubr.f32.gmra.mrb[14].mxu1 %v5694_v28  ;;  %v3362_v28 = vld [vmem:[%s6422_s1 + $0x420] sm:$0xff] }
  0xcd   : > { %4368 = vmatmul.mubr.f32.gmra.mrb[30].mxu0 %v5099_v17  ;;  %4026 = vmatprep.mubr.f32.mxu1 %v5696_v19  ;;  %v2367_v19 = vld [vmem:[#allocation2 + $0x51] sm:$0xff]  ;;  %v4794_v56 = vpack.c.bf16 %v3363_v49, %v3362_v28  ;;  %v6469_v28 = vld [vmem:[#allocation5_spill] sm:$0xff]  ;;  %v6470_v49 = vld [vmem:[#allocation14_spill] sm:$0xff] }
  0xce   : > { %4402 = vmatprep.mubr.f32.mxu0 %v2364_v9  ;;  %4657 = vmatpush3.bf16.msra.mxu1 %v4654_v20  ;;  %v2376_v20 = vld [vmem:[#allocation2 + $0xc1] sm:$0xff]  ;;  %v3373_v9 = vld [vmem:[%s6422_s1 + $0x478] sm:$0xff] }
  0xcf   : > { %4818 = vmatprep.subr.bf16.mxu1 %v5207_v8 }
  0xd0   : > { %4027 = vmatmul.mubr.f32.gmra.mrb[16].mxu1 %v5708_v40  ;;  %v3364_v40 = vld [vmem:[%s6422_s1 + $0x430] sm:$0xff] }
  0xd1   : > { %4403 = vmatmul.mubr.f32.vlgmr.msra.gmra.mrb[0].mxu0 %v2365_v23  ;;  %4029 = vmatprep.mubr.f32.mxu1 %v5710_v27  ;;  %v2369_v27 = vld [vmem:[#allocation2 + $0x69] sm:$0xff]  ;;  %v4798_v59 = vpack.c.bf16 %v3365_v60, %v3364_v40  ;;  %v6108_v23 = vld [vmem:[#allocation2 + $0xf1] sm:$0xff]  ;;  %v2394_v40 = vld [vmem:[#allocation2 + $0x199] sm:$0xff] }
  0xd2   : > { %4789 = vmatpush3.bf16.msra.mxu0 %v5964_v31  ;;  %4405 = vmatprep.mubr.f32.mxu0 %v2366_v15  ;;  %v2370_v31 = vld [vmem:[#allocation2 + $0x79] sm:$0xff]  ;;  %v6473_v60 = vld [vmem:[#allocation6_spill] sm:$0xff] }
  0xd3   : > { %4791 = vmatprep.subr.bf16.mxu0 %v4790_v51  ;;  %v6467_v15 = vld [vmem:[#allocation12_spill] sm:$0xff] }
  0xd4   : > { %4030 = vmatmul.mubr.f32.gmra.mrb[18].mxu1 %v5724_v29  ;;  %v3366_v29 = vld [vmem:[%s6422_s1 + $0x440] sm:$0xff] }
  0xd5   : > { %4406 = vmatmul.mubr.f32.gmra.mrb[2].mxu0 %v2367_v19  ;;  %4032 = vmatprep.mubr.f32.mxu1 %v5728_v54  ;;  %v2371_v54 = vld [vmem:[#allocation2 + $0x81] sm:$0xff]  ;;  %v4802_v4 = vpack.c.bf16 %v3367_v45, %v3366_v29  ;;  %v5107_v19 = vld [vmem:[#allocation2 + $0x171] sm:$0xff] }
  0xd6   : > { %4408 = vmatprep.mubr.f32.mxu0 %v2368_v55  ;;  %4793 = vmatpush3.bf16.msra.mxu0 %v4790_v51  ;;  %v6468_v51 = vld [vmem:[#allocation13_spill] sm:$0xff]  ;;  %v6471_v55 = vld [vmem:[#allocation15_spill] sm:$0xff] }
  0xd7   : > { %4795 = vmatprep.subr.bf16.mxu0 %v4794_v56  ;;  %v2395_v29 = vld [vmem:[#allocation2 + $0x1a1] sm:$0xff]  ;;  %v2670_v45 = vld [vmem:[#allocation2 + $0x32] sm:$0xff] }
  0xd8   : > { %4033 = vmatmul.mubr.f32.gmra.mrb[20].mxu1 %v5744_v53  ;;  %v3368_v53 = vld [vmem:[%s6422_s1 + $0x450] sm:$0xff] }
  0xd9   : > { %4409 = vmatmul.mubr.f32.gmra.mrb[4].mxu0 %v2369_v27  ;;  %4035 = vmatprep.mubr.f32.mxu1 %v5748_v30  ;;  %v2373_v30 = vld [vmem:[#allocation2 + $0x99] sm:$0xff]  ;;  %v4806_v10 = vpack.c.bf16 %v3369_v50, %v3368_v53  ;;  %v2672_v53 = vld [vmem:[#allocation2 + $0x4a] sm:$0xff] }
  0xda   : > { %4411 = vmatprep.mubr.f32.mxu0 %v2370_v31  ;;  %4797 = vmatpush3.bf16.msra.mxu0 %v4794_v56  ;;  %v6472_v56 = vld [vmem:[#allocation8_spill] sm:$0xff]  ;;  %v6475_v31 = vld [vmem:[#allocation9_spill] sm:$0xff] }
  0xdb   : > { %4799 = vmatprep.subr.bf16.mxu0 %v4798_v59  ;;  %v6474_v27 = vld [vmem:[#allocation16_spill] sm:$0xff] }
  0xdc   : > { %4036 = vmatmul.mubr.f32.gmra.mrb[22].mxu1 %v5762_v33  ;;  %v3370_v33 = vld [vmem:[%s6422_s1 + $0x460] sm:$0xff]  ;;  %v2673_v50 = vld [vmem:[#allocation2 + $0x52] sm:$0xff] }
  0xdd   : > { %4412 = vmatmul.mubr.f32.gmra.mrb[6].mxu0 %v2371_v54  ;;  %4038 = vmatprep.mubr.f32.mxu1 %v5766_v61  ;;  %v2375_v61 = vld [vmem:[#allocation2 + $0xb1] sm:$0xff]  ;;  %v4810_v17 = vpack.c.bf16 %v3371_v48, %v3370_v33  ;;  %v2692_v33 = vld [vmem:[#allocation2 + $0x13a] sm:$0xff]  ;;  %v1468_v48 = vld [vmem:[#allocation2 + $0x129] sm:$0xff] }
  0xde   : > { %4414 = vmatprep.mubr.f32.mxu0 %v2372_v63  ;;  %4801 = vmatpush3.bf16.msra.mxu0 %v4798_v59  ;;  %v6476_v59 = vld [vmem:[#allocation17_spill] sm:$0xff]  ;;  %v6477_v54 = vld [vmem:[#allocation7_spill] sm:$0xff]  ;;  %v6478_v63 = vld [vmem:[#allocation18_spill] sm:$0xff] }
  0xdf   : > { %4803 = vmatprep.subr.bf16.mxu0 %v4802_v4 }
  0xe0   : > { %4039 = vmatmul.mubr.f32.gmra.mrb[24].mxu1 %v5780_v3  ;;  %v3372_v3 = vld [vmem:[%s6422_s1 + $0x470] sm:$0xff] }
  0xe1   : > { %4415 = vmatmul.mubr.f32.gmra.mrb[8].mxu0 %v2373_v30  ;;  %4041 = vmatprep.mubr.f32.mxu1 %v5784_v6  ;;  %v2377_v6 = vld [vmem:[#allocation2 + $0xc9] sm:$0xff]  ;;  %v4814_v24 = vpack.c.bf16 %v3373_v9, %v3372_v3  ;;  %v1470_v3 = vld [vmem:[#allocation2 + $0x141] sm:$0xff] }
  0xe2   : > { %4417 = vmatprep.mubr.f32.mxu0 %v2374_v14  ;;  %4805 = vmatpush3.bf16.msra.mxu0 %v4802_v4  ;;  %v2671_v4 = vld [vmem:[#allocation2 + $0x3a] sm:$0xff]  ;;  %v2674_v30 = vld [vmem:[#allocation2 + $0x62] sm:$0xff] }
  0xe3   : > { %4807 = vmatprep.subr.bf16.mxu0 %v4806_v10  ;;  %v2676_v14 = vld [vmem:[#allocation2 + $0x7a] sm:$0xff] }
  0xe4   : > { %4042 = vmatmul.mubr.f32.gmra.mrb[26].mxu1 %v5798_v25  ;;  %v6106_v25 = vld [vmem:[#allocation2 + $0xe1] sm:$0xff] }
  0xe5   : > { %4418 = vmatmul.mubr.f32.gmra.mrb[10].mxu0 %v2375_v61  ;;  %4044 = vmatprep.mubr.f32.mxu1 %v5802_v44  ;;  %v6114_v44 = vld [vmem:[#allocation2 + $0xf9] sm:$0xff]  ;;  %v2693_v61 = vld [vmem:[#allocation2 + $0x142] sm:$0xff] }
  0xe6   : > { %4420 = vmatprep.mubr.f32.mxu0 %v2376_v20  ;;  %4809 = vmatpush3.bf16.msra.mxu0 %v4806_v10  ;;  %v2678_v10 = vld [vmem:[#allocation2 + $0x92] sm:$0xff]  ;;  %v2695_v9 = vld [vmem:[#allocation2 + $0x15a] sm:$0xff] }
  0xe7   : > { %4811 = vmatprep.subr.bf16.mxu0 %v4810_v17  ;;  %v1469_v20 = vld [vmem:[#allocation2 + $0x139] sm:$0xff] }
  0xe8   : > { %4045 = vmatmul.mubr.f32.gmra.mrb[28].mxu1 %v5816_v47  ;;  %v6116_v47 = vld [vmem:[#allocation2 + $0x109] sm:$0xff] }
  0xe9   : > { %4421 = vmatmul.mubr.f32.gmra.mrb[12].mxu0 %v2377_v6  ;;  %4047 = vmatprep.mubr.f32.mxu1 %v5820_v36  ;;  %v6123_v36 = vld [vmem:[#allocation2 + $0x111] sm:$0xff] }
  0xea   : > { %4423 = vmatprep.mubr.f32.mxu0 %v6101_v12  ;;  %4813 = vmatpush3.bf16.msra.mxu0 %v4810_v17  ;;  %v2694_v17 = vld [vmem:[#allocation2 + $0x152] sm:$0xff] }
  0xeb   : > { %4815 = vmatprep.subr.bf16.mxu0 %v4814_v24  ;;  %v1471_v6 = vld [vmem:[#allocation2 + $0x151] sm:$0xff] }
  0xec   : > { %4048 = vmatmul.mubr.f32.gmra.mrb[30].mxu1 %v5834_v0  ;;  %v6465_v0 = vld [vmem:[#allocation11_spill] sm:$0xff] }
  0xed   : > { %4424 = vmatmul.mubr.f32.gmra.mrb[14].mxu0 %v6106_v25  ;;  %4082 = vmatprep.mubr.f32.mxu1 %v5726_v32  ;;  %v5100_v32 = vld [vmem:[#allocation2 + $0x121] sm:$0xff] }
  0xee   : > { %4426 = vmatprep.mubr.f32.mxu0 %v6108_v23  ;;  %4817 = vmatpush3.bf16.msra.mxu0 %v4814_v24  ;;  %v1472_v24 = vld [vmem:[#allocation2 + $0x159] sm:$0xff] }
  0xf0   : > { %4083 = vmatmul.mubr.f32.vlgmr.msra.gmra.mrb[0].mxu1 %v5740_v46  ;;  %v5102_v46 = vld [vmem:[#allocation2 + $0x139] sm:$0xff] }
  0xf1   : > { %4427 = vmatmul.mubr.f32.gmra.mrb[16].mxu0 %v6114_v44  ;;  %4826 = vmatpush3.bf16.msra.mxu1 %v5207_v8  ;;  %v5101_v8 = vld [vmem:[#allocation2 + $0x129] sm:$0xff] }
  0xf2   : > { %4085 = vmatprep.mubr.f32.mxu1 %v5746_v7  ;;  %4429 = vmatprep.mubr.f32.mxu0 %v6116_v47  ;;  %v6463_v7 = vld [vmem:[#allocation3_spill] sm:$0xff] }
  0xf3   : > { %4819 = vmatprep.subr.bf16.mxu1 %v5224_v13 }
  0xf4   : > { %4086 = vmatmul.mubr.f32.gmra.mrb[2].mxu1 %v5759_v58  ;;  %v6464_v58 = vld [vmem:[#allocation10_spill] sm:$0xff] }
  0xf5   : > { %4430 = vmatmul.mubr.f32.gmra.mrb[18].mxu0 %v6123_v36  ;;  %4088 = vmatprep.mubr.f32.mxu1 %v5764_v62  ;;  %v5103_v62 = vld [vmem:[#allocation2 + $0x141] sm:$0xff] }
  0xf6   : > { %4432 = vmatprep.mubr.f32.mxu0 %v5100_v32  ;;  %4827 = vmatpush3.bf16.msra.mxu1 %v5224_v13  ;;  %v5104_v13 = vld [vmem:[#allocation2 + $0x151] sm:$0xff]  ;;  %v1475_v32 = vld [vmem:[#allocation2 + $0x181] sm:$0xff] }
  0xf7   : > { %4820 = vmatprep.subr.bf16.mxu1 %v5239_v18 }
  0xf8   : > { %4089 = vmatmul.mubr.f32.gmra.mrb[4].mxu1 %v5777_v38  ;;  %v6466_v38 = vld [vmem:[#allocation4_spill] sm:$0xff] }
  0xf9   : > { %4433 = vmatmul.mubr.f32.gmra.mrb[20].mxu0 %v5101_v8  ;;  %4091 = vmatprep.mubr.f32.mxu1 %v5782_v11  ;;  %v5105_v11 = vld [vmem:[#allocation2 + $0x159] sm:$0xff] }
  0xfa   : > { %4435 = vmatprep.mubr.f32.mxu0 %v5102_v46  ;;  %4828 = vmatpush3.bf16.msra.mxu1 %v5239_v18  ;;  %v5106_v18 = vld [vmem:[#allocation2 + $0x169] sm:$0xff]  ;;  %v2700_v8 = vld [vmem:[#allocation2 + $0x19a] sm:$0xff] }
  0xfb   : > { %4821 = vmatprep.subr.bf16.mxu1 %v6463_v7  ;;  %v1476_v46 = vld [vmem:[#allocation2 + $0x189] sm:$0xff] }
  0xfc   : > { %4092 = vmatmul.mubr.f32.gmra.mrb[6].mxu1 %v6464_v58 }
  0xfd   : > { %4436 = vmatmul.mubr.f32.gmra.mrb[22].mxu0 %v5103_v62  ;;  %4094 = vmatprep.mubr.f32.mxu1 %v6465_v0 }
  0xfe   : > { %4438 = vmatprep.mubr.f32.mxu0 %v5104_v13  ;;  %4829 = vmatpush3.bf16.msra.mxu1 %v6463_v7  ;;  %v2701_v7 = vld [vmem:[#allocation2 + $0x1a2] sm:$0xff] }
  0xff   : > { %4822 = vmatprep.subr.bf16.mxu1 %v6466_v38 }
 0x100   : > { %4095 = vmatmul.mubr.f32.gmra.mrb[8].mxu1 %v6467_v15 }
 0x101   : > { %4439 = vmatmul.mubr.f32.gmra.mrb[24].mxu0 %v5105_v11  ;;  %4097 = vmatprep.mubr.f32.mxu1 %v6468_v51 }
 0x102   : > { %4441 = vmatprep.mubr.f32.mxu0 %v5106_v18  ;;  %4830 = vmatpush3.bf16.msra.mxu1 %v6466_v38 }
 0x103   : > { %4823 = vmatprep.subr.bf16.mxu1 %v6469_v28 }
 0x104   : > { %4098 = vmatmul.mubr.f32.gmra.mrb[10].mxu1 %v6470_v49 }
 0x105   : > { %4442 = vmatmul.mubr.f32.gmra.mrb[26].mxu0 %v5107_v19  ;;  %4100 = vmatprep.mubr.f32.mxu1 %v6471_v55 }
 0x106   : > { %4444 = vmatprep.mubr.f32.mxu0 %v6472_v56  ;;  %4831 = vmatpush3.bf16.msra.mxu1 %v6469_v28 }
 0x107   : > { %4824 = vmatprep.subr.bf16.mxu1 %v6473_v60 }
 0x108   : > { %4101 = vmatmul.mubr.f32.gmra.mrb[12].mxu1 %v6474_v27 }
 0x109   : > { %4445 = vmatmul.mubr.f32.gmra.mrb[28].mxu0 %v6475_v31  ;;  %4103 = vmatprep.mubr.f32.mxu1 %v6476_v59 }
 0x10a   : > { %4447 = vmatprep.mubr.f32.mxu0 %v2394_v40  ;;  %4832 = vmatpush3.bf16.msra.mxu1 %v6473_v60 }
 0x10b   : > { %4825 = vmatprep.subr.bf16.mxu1 %v6477_v54 }
 0x10c   : > { %4104 = vmatmul.mubr.f32.gmra.mrb[14].mxu1 %v6478_v63 }
 0x10d   : > { %4448 = vmatmul.mubr.f32.gmra.mrb[30].mxu0 %v2395_v29  ;;  %4106 = vmatprep.mubr.f32.mxu1 %v5864_v39  ;;  %v2675_v39 = vld [vmem:[#allocation2 + $0x6a] sm:$0xff] }
 0x10e   : > { %4482 = vmatprep.mubr.f32.mxu0 %v2670_v45  ;;  %4833 = vmatpush3.bf16.msra.mxu1 %v6477_v54 }
 0x110   : > { %4107 = vmatmul.mubr.f32.gmra.mrb[16].mxu1 %v5876_v22  ;;  %v2677_v22 = vld [vmem:[#allocation2 + $0x82] sm:$0xff] }
 0x111   : > { %4483 = vmatmul.mubr.f32.vlgmr.msra.gmra.mrb[0].mxu0 %v2671_v4  ;;  %4109 = vmatprep.mubr.f32.mxu1 %v5880_v1  ;;  %v2679_v1 = vld [vmem:[#allocation2 + $0x9a] sm:$0xff] }
 0x112   : > { %4485 = vmatprep.mubr.f32.mxu0 %v2672_v53 }
 0x114   : > { %4110 = vmatmul.mubr.f32.gmra.mrb[18].mxu1 %v5891_v43  ;;  %v2680_v43 = vld [vmem:[#allocation2 + $0xaa] sm:$0xff] }
 0x115   : > { %4486 = vmatmul.mubr.f32.gmra.mrb[2].mxu0 %v2673_v50  ;;  %4112 = vmatprep.mubr.f32.mxu1 %v5894_v42  ;;  %v2682_v42 = vld [vmem:[#allocation2 + $0xc2] sm:$0xff] }
 0x116   : > { %4488 = vmatprep.mubr.f32.mxu0 %v2674_v30 }
 0x118   : > { %4113 = vmatmul.mubr.f32.gmra.mrb[20].mxu1 %v5905_v35  ;;  %v2681_v35 = vld [vmem:[#allocation2 + $0xb2] sm:$0xff] }
 0x119   : > { %4489 = vmatmul.mubr.f32.gmra.mrb[4].mxu0 %v2675_v39  ;;  %4115 = vmatprep.mubr.f32.mxu1 %v5908_v21  ;;  %v2684_v21 = vld [vmem:[#allocation2 + $0xda] sm:$0xff] }
 0x11a   : > { %4491 = vmatprep.mubr.f32.mxu0 %v2676_v14 }
 0x11c   : > { %4116 = vmatmul.mubr.f32.gmra.mrb[22].mxu1 %v5919_v16  ;;  %v2683_v16 = vld [vmem:[#allocation2 + $0xca] sm:$0xff] }
 0x11d   : > { %4492 = vmatmul.mubr.f32.gmra.mrb[6].mxu0 %v2677_v22  ;;  %4118 = vmatprep.mubr.f32.mxu1 %v5922_v41  ;;  %v2686_v41 = vld [vmem:[#allocation2 + $0xf2] sm:$0xff] }
 0x11e   : > { %4494 = vmatprep.mubr.f32.mxu0 %v2678_v10 }
 0x120   : > { %4119 = vmatmul.mubr.f32.gmra.mrb[24].mxu1 %v5933_v52  ;;  %v2685_v52 = vld [vmem:[#allocation2 + $0xe2] sm:$0xff] }
 0x121   : > { %4495 = vmatmul.mubr.f32.gmra.mrb[8].mxu0 %v2679_v1  ;;  %4121 = vmatprep.mubr.f32.mxu1 %v5936_v37  ;;  %v2688_v37 = vld [vmem:[#allocation2 + $0x10a] sm:$0xff] }
 0x122   : > { %4497 = vmatprep.mubr.f32.mxu0 %v2680_v43 }
 0x124   : > { %4122 = vmatmul.mubr.f32.gmra.mrb[26].mxu1 %v5947_v34  ;;  %v2687_v34 = vld [vmem:[#allocation2 + $0xfa] sm:$0xff] }
 0x125   : > { %4498 = vmatmul.mubr.f32.gmra.mrb[10].mxu0 %v2681_v35  ;;  %4124 = vmatprep.mubr.f32.mxu1 %v5950_v57  ;;  %v2690_v57 = vld [vmem:[#allocation2 + $0x122] sm:$0xff] }
 0x126   : > { %4500 = vmatprep.mubr.f32.mxu0 %v2682_v42 }
 0x128   : > { %4125 = vmatmul.mubr.f32.gmra.mrb[28].mxu1 %v5961_v26  ;;  %v2689_v26 = vld [vmem:[#allocation2 + $0x112] sm:$0xff] }
 0x129   : > { %4501 = vmatmul.mubr.f32.gmra.mrb[12].mxu0 %v2683_v16  ;;  %4127 = vmatprep.mubr.f32.mxu1 %v6026_v2  ;;  %v2691_v2 = vld [vmem:[#allocation2 + $0x12a] sm:$0xff] }
 0x12a   : > { %4503 = vmatprep.mubr.f32.mxu0 %v2684_v21 }
 0x12c   : > { %4128 = vmatmul.mubr.f32.gmra.mrb[30].mxu1 %v6038_v5  ;;  %v1467_v5 = vld [vmem:[#allocation2 + $0x121] sm:$0xff] }
 0x12d   : > { %4504 = vmatmul.mubr.f32.gmra.mrb[14].mxu0 %v2685_v52  ;;  %4186 = vmatprep.mubr.f32.mxu1 %v6101_v12  ;;  %v2696_v12 = vld [vmem:[#allocation2 + $0x16a] sm:$0xff] }
 0x12e   : > { %4506 = vmatprep.mubr.f32.mxu0 %v2686_v41 }
 0x130   : > { %4187 = vmatmul.mubr.f32.vlgmr.msra.gmra.mrb[16].mxu1 %v6106_v25  ;;  %v2697_v25 = vld [vmem:[#allocation2 + $0x172] sm:$0xff] }
 0x131   : > { %4507 = vmatmul.mubr.f32.gmra.mrb[16].mxu0 %v2687_v34  ;;  %4189 = vmatprep.mubr.f32.mxu1 %v6108_v23  ;;  %v1473_v23 = vld [vmem:[#allocation2 + $0x169] sm:$0xff] }
 0x132   : > { %4509 = vmatprep.mubr.f32.mxu0 %v2688_v37 }
 0x134   : > { %4190 = vmatmul.mubr.f32.gmra.mrb[18].mxu1 %v6114_v44  ;;  %v2698_v44 = vld [vmem:[#allocation2 + $0x182] sm:$0xff] }
 0x135   : > { %4510 = vmatmul.mubr.f32.gmra.mrb[18].mxu0 %v2689_v26  ;;  %4192 = vmatprep.mubr.f32.mxu1 %v6116_v47  ;;  %v1474_v47 = vld [vmem:[#allocation2 + $0x171] sm:$0xff] }
 0x136   : > { %4512 = vmatprep.mubr.f32.mxu0 %v2690_v57 }
 0x138   : > { %4193 = vmatmul.mubr.f32.gmra.mrb[20].mxu1 %v6123_v36  ;;  %v2699_v36 = vld [vmem:[#allocation2 + $0x18a] sm:$0xff] }
 0x139   : > { %4513 = vmatmul.mubr.f32.gmra.mrb[20].mxu0 %v2691_v2  ;;  %4195 = vmatprep.mubr.f32.mxu1 %v1467_v5 }
 0x13a   : > { %4515 = vmatprep.mubr.f32.mxu0 %v2692_v33 }
 0x13c   : > { %4196 = vmatmul.mubr.f32.gmra.mrb[22].mxu1 %v1468_v48 }
 0x13d   : > { %4516 = vmatmul.mubr.f32.gmra.mrb[22].mxu0 %v2693_v61  ;;  %4198 = vmatprep.mubr.f32.mxu1 %v1469_v20 }
 0x13e   : > { %4518 = vmatprep.mubr.f32.mxu0 %v2694_v17 }
 0x140   : > { %4199 = vmatmul.mubr.f32.gmra.mrb[24].mxu1 %v1470_v3 }
 0x141   : > { %4519 = vmatmul.mubr.f32.gmra.mrb[24].mxu0 %v2695_v9  ;;  %4201 = vmatprep.mubr.f32.mxu1 %v1471_v6 }
 0x142   : > { %4521 = vmatprep.mubr.f32.mxu0 %v2696_v12 }
 0x144   : > { %4202 = vmatmul.mubr.f32.gmra.mrb[26].mxu1 %v1472_v24 }
 0x145   : > { %4522 = vmatmul.mubr.f32.gmra.mrb[26].mxu0 %v2697_v25  ;;  %4204 = vmatprep.mubr.f32.mxu1 %v1473_v23 }
 0x146   : > { %4524 = vmatprep.mubr.f32.mxu0 %v2698_v44 }
 0x148   : > { %4205 = vmatmul.mubr.f32.gmra.mrb[28].mxu1 %v1474_v47 }
 0x149   : > { %4525 = vmatmul.mubr.f32.gmra.mrb[28].mxu0 %v2699_v36  ;;  %4207 = vmatprep.mubr.f32.mxu1 %v1475_v32 }
 0x14a   : > { %4527 = vmatprep.mubr.f32.mxu0 %v2700_v8 }
 0x14c   : > { %4208 = vmatmul.mubr.f32.gmra.mrb[30].mxu1 %v1476_v46 }
 0x14d   : > { %4528 = vmatmul.mubr.f32.gmra.mrb[30].mxu0 %v2701_v7 }
 0x1c3   : > { %v4084_v58 = vpop.f32.mrb[0].mxu1 }
 0x1c4   : > { %v1254_v62 = vpop.f32.mrb[1].mxu1 }
 0x1c7   : > { %v4087_v0 = vpop.f32.mrb[2].mxu1 }
 0x1c8   : > { %v1264_v13 = vpop.f32.mrb[3].mxu1 }
 0x1cb   : > { %v4090_v38 = vpop.f32.mrb[4].mxu1 }
 0x1cc   : > { %v1274_v15 = vpop.f32.mrb[5].mxu1 }
 0x1cf   : > { %v4093_v11 = vpop.f32.mrb[6].mxu1 }
 0x1d0   : > { %v1284_v51 = vpop.f32.mrb[7].mxu1 }
 0x1d3   : > { %v4096_v18 = vpop.f32.mrb[8].mxu1 }
 0x1d4   : > { %v1294_v28 = vpop.f32.mrb[9].mxu1 }
 0x1d7   : > { %v4099_v49 = vpop.f32.mrb[10].mxu1 }
 0x1d8   : > { %v1304_v19 = vpop.f32.mrb[11].mxu1 }
 0x1db   : > { %v4102_v55 = vpop.f32.mrb[12].mxu1 }
 0x1dc   : > { %v1314_v56 = vpop.f32.mrb[13].mxu1 }
 0x1df   : > { %v4105_v40 = vpop.f32.mrb[14].mxu1 }
 0x1e0   : > { %v1324_v60 = vpop.f32.mrb[15].mxu1 }
 0x1e4   : > { %v4484_v27 = vpop.f32.mrb[0].mxu0 }
 0x1e5   : > { %v6184_v31 = vadd.f32 %v4484_v27, %v4084_v58  ;;  %v2785_v59 = vpop.f32.mrb[1].mxu0 }
 0x1e6   : > { %v6186_v29 = vadd.f32 %v2785_v59, %v1254_v62 }
 0x1e7   : > { %2977 = vst [vmem:[%s6182_s23 + $0x8] sm:$0xff] %v6184_v31 }
 0x1e8   : > { %2976 = vst [vmem:[%s6182_s23] sm:$0xff] %v6186_v29  ;;  %v4487_v45 = vpop.f32.mrb[2].mxu0  ;;  %v3008_v4 = vadd.f32 %v6186_v29, %v6184_v31 }
 0x1e9   : > { %v6192_v54 = vadd.f32 %v4487_v45, %v4087_v0  ;;  %v2795_v63 = vpop.f32.mrb[3].mxu0 }
 0x1ea   : > { %v6196_v53 = vadd.f32 %v2795_v63, %v1264_v13 }
 0x1eb   : > { %2979 = vst [vmem:[%s6182_s23 + $0x18] sm:$0xff] %v6192_v54 }
 0x1ec   : > { %2978 = vst [vmem:[%s6182_s23 + $0x10] sm:$0xff] %v6196_v53  ;;  %v3009_v50 = vadd.f32 %v6196_v53, %v3008_v4  ;;  %v4490_v30 = vpop.f32.mrb[4].mxu0 }
 0x1ed   : > { %v6203_v39 = vadd.f32 %v4490_v30, %v4090_v38  ;;  %v2805_v14 = vpop.f32.mrb[5].mxu0 }
 0x1ee   : > { %v6205_v22 = vadd.f32 %v2805_v14, %v1274_v15  ;;  %v3010_v10 = vadd.f32 %v6192_v54, %v3009_v50 }
 0x1ef   : > { %2981 = vst [vmem:[%s6182_s23 + $0x28] sm:$0xff] %v6203_v39 }
 0x1f0   : > { %2980 = vst [vmem:[%s6182_s23 + $0x20] sm:$0xff] %v6205_v22  ;;  %v3011_v1 = vadd.f32 %v6205_v22, %v3010_v10  ;;  %v4493_v43 = vpop.f32.mrb[6].mxu0 }
 0x1f1   : > { %v6213_v35 = vadd.f32 %v4493_v43, %v4093_v11  ;;  %v2815_v42 = vpop.f32.mrb[7].mxu0 }
 0x1f2   : > { %v6215_v16 = vadd.f32 %v2815_v42, %v1284_v51  ;;  %v3012_v21 = vadd.f32 %v6203_v39, %v3011_v1 }
 0x1f3   : > { %2983 = vst [vmem:[%s6182_s23 + $0x38] sm:$0xff] %v6213_v35 }
 0x1f4   : > { %2982 = vst [vmem:[%s6182_s23 + $0x30] sm:$0xff] %v6215_v16  ;;  %v3013_v52 = vadd.f32 %v6215_v16, %v3012_v21  ;;  %v4496_v41 = vpop.f32.mrb[8].mxu0 }
 0x1f5   : > { %v6223_v34 = vadd.f32 %v4496_v41, %v4096_v18  ;;  %v2825_v37 = vpop.f32.mrb[9].mxu0 }
 0x1f6   : > { %v6225_v26 = vadd.f32 %v2825_v37, %v1294_v28  ;;  %v3014_v57 = vadd.f32 %v6213_v35, %v3013_v52 }
 0x1f7   : > { %2985 = vst [vmem:[%s6182_s23 + $0x48] sm:$0xff] %v6223_v34 }
 0x1f8   : > { %2984 = vst [vmem:[%s6182_s23 + $0x40] sm:$0xff] %v6225_v26  ;;  %v3015_v2 = vadd.f32 %v6225_v26, %v3014_v57  ;;  %v4499_v5 = vpop.f32.mrb[10].mxu0 }
 0x1f9   : > { %v6233_v33 = vadd.f32 %v4499_v5, %v4099_v49  ;;  %v2835_v48 = vpop.f32.mrb[11].mxu0 }
 0x1fa   : > { %v6235_v61 = vadd.f32 %v2835_v48, %v1304_v19  ;;  %v3016_v20 = vadd.f32 %v6223_v34, %v3015_v2 }
 0x1fb   : > { %2987 = vst [vmem:[%s6182_s23 + $0x58] sm:$0xff] %v6233_v33 }
 0x1fc   : > { %2986 = vst [vmem:[%s6182_s23 + $0x50] sm:$0xff] %v6235_v61  ;;  %v3017_v17 = vadd.f32 %v6235_v61, %v3016_v20  ;;  %v4502_v3 = vpop.f32.mrb[12].mxu0 }
 0x1fd   : > { %v6243_v9 = vadd.f32 %v4502_v3, %v4102_v55  ;;  %v2845_v6 = vpop.f32.mrb[13].mxu0 }
 0x1fe   : > { %v6245_v12 = vadd.f32 %v2845_v6, %v1314_v56  ;;  %v3018_v24 = vadd.f32 %v6233_v33, %v3017_v17 }
 0x1ff   : > { %2989 = vst [vmem:[%s6182_s23 + $0x68] sm:$0xff] %v6243_v9 }
 0x200   : > { %2988 = vst [vmem:[%s6182_s23 + $0x60] sm:$0xff] %v6245_v12  ;;  %v3019_v25 = vadd.f32 %v6245_v12, %v3018_v24  ;;  %v4505_v23 = vpop.f32.mrb[14].mxu0 }
 0x201   : > { %v6253_v44 = vadd.f32 %v4505_v23, %v4105_v40  ;;  %v2855_v47 = vpop.f32.mrb[15].mxu0 }
 0x202   : > { %v6255_v36 = vadd.f32 %v2855_v47, %v1324_v60  ;;  %v3020_v32 = vadd.f32 %v6243_v9, %v3019_v25 }
 0x203   : > { %2991 = vst [vmem:[%s6182_s23 + $0x78] sm:$0xff] %v6253_v44  ;;  %v4188_v8 = vpop.f32.mrb[16].mxu1 }
 0x204   : > { %2990 = vst [vmem:[%s6182_s23 + $0x70] sm:$0xff] %v6255_v36  ;;  %v3021_v46 = vadd.f32 %v6255_v36, %v3020_v32  ;;  %v4508_v7 = vpop.f32.mrb[16].mxu0  ;;  %v1640_v58 = vpop.f32.mrb[17].mxu1 }
 0x205   : > { %v6263_v62 = vadd.f32 %v4508_v7, %v4188_v8  ;;  %v2865_v0 = vpop.f32.mrb[17].mxu0 }
 0x206   : > { %v6265_v13 = vadd.f32 %v2865_v0, %v1640_v58  ;;  %v3022_v38 = vadd.f32 %v6253_v44, %v3021_v46 }
 0x207   : > { %2993 = vst [vmem:[%s6182_s23 + $0x88] sm:$0xff] %v6263_v62  ;;  %v4191_v15 = vpop.f32.mrb[18].mxu1 }
 0x208   : > { %2992 = vst [vmem:[%s6182_s23 + $0x80] sm:$0xff] %v6265_v13  ;;  %v3023_v11 = vadd.f32 %v6265_v13, %v3022_v38  ;;  %v4511_v51 = vpop.f32.mrb[18].mxu0  ;;  %v1650_v18 = vpop.f32.mrb[19].mxu1 }
 0x209   : > { %v6273_v28 = vadd.f32 %v4511_v51, %v4191_v15  ;;  %v2875_v49 = vpop.f32.mrb[19].mxu0 }
 0x20a   : > { %v6275_v19 = vadd.f32 %v2875_v49, %v1650_v18  ;;  %v3024_v55 = vadd.f32 %v6263_v62, %v3023_v11 }
 0x20b   : > { %2995 = vst [vmem:[%s6182_s23 + $0x98] sm:$0xff] %v6273_v28  ;;  %v4194_v56 = vpop.f32.mrb[20].mxu1 }
 0x20c   : > { %2994 = vst [vmem:[%s6182_s23 + $0x90] sm:$0xff] %v6275_v19  ;;  %v3025_v40 = vadd.f32 %v6275_v19, %v3024_v55  ;;  %v4514_v60 = vpop.f32.mrb[20].mxu0  ;;  %v1660_v27 = vpop.f32.mrb[21].mxu1 }
 0x20d   : > { %v6283_v59 = vadd.f32 %v4514_v60, %v4194_v56  ;;  %v2885_v45 = vpop.f32.mrb[21].mxu0 }
 0x20e   : > { %v6285_v63 = vadd.f32 %v2885_v45, %v1660_v27  ;;  %v3026_v4 = vadd.f32 %v6273_v28, %v3025_v40 }
 0x20f   : > { %2997 = vst [vmem:[%s6182_s23 + $0xa8] sm:$0xff] %v6283_v59  ;;  %v4197_v50 = vpop.f32.mrb[22].mxu1 }
 0x210   : > { %2996 = vst [vmem:[%s6182_s23 + $0xa0] sm:$0xff] %v6285_v63  ;;  %v3027_v30 = vadd.f32 %v6285_v63, %v3026_v4  ;;  %v4517_v14 = vpop.f32.mrb[22].mxu0  ;;  %v1670_v10 = vpop.f32.mrb[23].mxu1 }
 0x211   : > { %v6293_v1 = vadd.f32 %v4517_v14, %v4197_v50  ;;  %v2895_v43 = vpop.f32.mrb[23].mxu0 }
 0x212   : > { %v6295_v42 = vadd.f32 %v2895_v43, %v1670_v10  ;;  %v3028_v21 = vadd.f32 %v6283_v59, %v3027_v30 }
 0x213   : > { %2999 = vst [vmem:[%s6182_s23 + $0xb8] sm:$0xff] %v6293_v1  ;;  %v4200_v52 = vpop.f32.mrb[24].mxu1 }
 0x214   : > { %2998 = vst [vmem:[%s6182_s23 + $0xb0] sm:$0xff] %v6295_v42  ;;  %v3029_v41 = vadd.f32 %v6295_v42, %v3028_v21  ;;  %v4520_v37 = vpop.f32.mrb[24].mxu0  ;;  %v1680_v57 = vpop.f32.mrb[25].mxu1 }
 0x215   : > { %v6303_v2 = vadd.f32 %v4520_v37, %v4200_v52  ;;  %v2905_v5 = vpop.f32.mrb[25].mxu0 }
 0x216   : > { %v6305_v48 = vadd.f32 %v2905_v5, %v1680_v57  ;;  %v3030_v20 = vadd.f32 %v6293_v1, %v3029_v41 }
 0x217   : > { %3001 = vst [vmem:[%s6182_s23 + $0xc8] sm:$0xff] %v6303_v2  ;;  %v4203_v17 = vpop.f32.mrb[26].mxu1 }
 0x218   : > { %3000 = vst [vmem:[%s6182_s23 + $0xc0] sm:$0xff] %v6305_v48  ;;  %v3031_v3 = vadd.f32 %v6305_v48, %v3030_v20  ;;  %v4523_v6 = vpop.f32.mrb[26].mxu0  ;;  %v1690_v24 = vpop.f32.mrb[27].mxu1 }
 0x219   : > { %v6313_v25 = vadd.f32 %v4523_v6, %v4203_v17  ;;  %v2915_v23 = vpop.f32.mrb[27].mxu0 }
 0x21a   : > { %v6315_v47 = vadd.f32 %v2915_v23, %v1690_v24  ;;  %v3032_v32 = vadd.f32 %v6303_v2, %v3031_v3 }
 0x21b   : > { %3003 = vst [vmem:[%s6182_s23 + $0xd8] sm:$0xff] %v6313_v25  ;;  %v4206_v8 = vpop.f32.mrb[28].mxu1 }
 0x21c   : > { %3002 = vst [vmem:[%s6182_s23 + $0xd0] sm:$0xff] %v6315_v47  ;;  %v3033_v46 = vadd.f32 %v6315_v47, %v3032_v32  ;;  %v4526_v7 = vpop.f32.mrb[28].mxu0  ;;  %v1700_v58 = vpop.f32.mrb[29].mxu1 }
 0x21d   : > { %v6323_v0 = vadd.f32 %v4526_v7, %v4206_v8  ;;  %v2925_v38 = vpop.f32.mrb[29].mxu0 }
 0x21e   : > { %v6325_v15 = vadd.f32 %v2925_v38, %v1700_v58  ;;  %v3034_v11 = vadd.f32 %v6313_v25, %v3033_v46 }
 0x21f   : > { %3005 = vst [vmem:[%s6182_s23 + $0xe8] sm:$0xff] %v6323_v0  ;;  %v4209_v51 = vpop.f32.mrb[30].mxu1 }
 0x220   : > { %3004 = vst [vmem:[%s6182_s23 + $0xe0] sm:$0xff] %v6325_v15  ;;  %v3035_v18 = vadd.f32 %v6325_v15, %v3034_v11  ;;  %v4529_v49 = vpop.f32.mrb[30].mxu0  ;;  %v1710_v55 = vpop.f32.mrb[31].mxu1 }
 0x221   : > { %v6333_v56 = vadd.f32 %v4529_v49, %v4209_v51  ;;  %v2935_v40 = vpop.f32.mrb[31].mxu0 }
 0x222   : > { %v6335_v60 = vadd.f32 %v2935_v40, %v1710_v55  ;;  %v3036_v27 = vadd.f32 %v6323_v0, %v3035_v18 }
 0x223   : > { %3007 = vst [vmem:[%s6182_s23 + $0xf8] sm:$0xff] %v6333_v56 }
 0x224   : > { %3006 = vst [vmem:[%s6182_s23 + $0xf0] sm:$0xff] %v6335_v60  ;;  %v3037_v45 = vadd.f32 %v6335_v60, %v3036_v27 }
 0x226   : > { %v3038_v4 = vadd.f32 %v6333_v56, %v3037_v45 }
 0x228   : > { %v3039_v50 = vrot.slane %v3038_v4, 4 }
 0x22a   : > { %v3040_v30 = vadd.f32 %v3039_v50, %v3038_v4 }
 0x22c   : > { %v3041_v14 = vrot.slane %v3040_v30, 2 }
 0x22e   : > { %v3042_v10 = vadd.f32 %v3041_v14, %v3040_v30 }
 0x230   : > { %v3043_v43 = vrot.slane %v3042_v10, 1 }
 0x232   : > { %v6344_v21 = vadd.f32 %v3043_v43, %v3042_v10 }
 0x234   : > { %v6347_v52 = vmul.f32 0.00390625, %v6344_v21 }
 0x236   : > { %v3046_v41 = vsub.f32 %v6186_v29, %v6347_v52  ;;  %v3047_v37 = vsub.f32 %v6184_v31, %v6347_v52  ;;  %v3048_v57 = vsub.f32 %v6196_v53, %v6347_v52  ;;  %v3049_v17 = vsub.f32 %v6192_v54, %v6347_v52 }
 0x237   : > { %v3050_v3 = vsub.f32 %v6205_v22, %v6347_v52  ;;  %v3051_v23 = vsub.f32 %v6203_v39, %v6347_v52  ;;  %v3052_v31 = vsub.f32 %v6215_v16, %v6347_v52  ;;  %v3053_v46 = vsub.f32 %v6213_v35, %v6347_v52 }
 0x238   : > { %v3078_v5 = vmul.f32 %v3046_v41, %v3046_v41  ;;  %v3079_v20 = vmul.f32 %v3047_v37, %v3047_v37  ;;  %v3080_v6 = vmul.f32 %v3048_v57, %v3048_v57  ;;  %v3081_v29 = vmul.f32 %v3049_v17, %v3049_v17 }
 0x239   : > { %v3082_v8 = vmul.f32 %v3050_v3, %v3050_v3  ;;  %v3083_v7 = vmul.f32 %v3051_v23, %v3051_v23  ;;  %v3054_v22 = vsub.f32 %v6225_v26, %v6347_v52  ;;  %v3084_v58 = vmul.f32 %v3052_v31, %v3052_v31 }
 0x23a   : > { %v3110_v24 = vadd.f32 %v3079_v20, %v3078_v5  ;;  %v3055_v39 = vsub.f32 %v6223_v34, %v6347_v52  ;;  %v3085_v11 = vmul.f32 %v3053_v46, %v3053_v46  ;;  %v3056_v16 = vsub.f32 %v6235_v61, %v6347_v52 }
 0x23b   : > { %v3086_v18 = vmul.f32 %v3054_v22, %v3054_v22  ;;  %v3057_v35 = vsub.f32 %v6233_v33, %v6347_v52  ;;  %v3058_v26 = vsub.f32 %v6245_v12, %v6347_v52  ;;  %v3059_v34 = vsub.f32 %v6243_v9, %v6347_v52 }
 0x23c   : > { %v3111_v32 = vadd.f32 %v3110_v24, %v3080_v6  ;;  %v3087_v55 = vmul.f32 %v3055_v39, %v3055_v39  ;;  %v3088_v27 = vmul.f32 %v3056_v16, %v3056_v16  ;;  %v3060_v61 = vsub.f32 %v6255_v36, %v6347_v52 }
 0x23d   : > { %v3089_v4 = vmul.f32 %v3057_v35, %v3057_v35  ;;  %v3090_v30 = vmul.f32 %v3058_v26, %v3058_v26  ;;  %v3061_v33 = vsub.f32 %v6253_v44, %v6347_v52  ;;  %v3091_v10 = vmul.f32 %v3059_v34, %v3059_v34 }
 0x23e   : > { %v3112_v53 = vadd.f32 %v3111_v32, %v3081_v29  ;;  %v3062_v12 = vsub.f32 %v6265_v13, %v6347_v52  ;;  %v3092_v41 = vmul.f32 %v3060_v61, %v3060_v61  ;;  %v3063_v9 = vsub.f32 %v6263_v62, %v6347_v52 }
 0x23f   : > { %v3093_v57 = vmul.f32 %v3061_v33, %v3061_v33  ;;  %v3064_v36 = vsub.f32 %v6275_v19, %v6347_v52  ;;  %v3065_v44 = vsub.f32 %v6273_v28, %v6347_v52  ;;  %v3066_v13 = vsub.f32 %v6285_v63, %v6347_v52 }
 0x240   : > { %v3113_v54 = vadd.f32 %v3112_v53, %v3082_v8  ;;  %v3094_v20 = vmul.f32 %v3062_v12, %v3062_v12  ;;  %v3095_v3 = vmul.f32 %v3063_v9, %v3063_v9  ;;  %v3067_v62 = vsub.f32 %v6283_v59, %v6347_v52 }
 0x241   : > { %v3096_v24 = vmul.f32 %v3064_v36, %v3064_v36  ;;  %v3097_v29 = vmul.f32 %v3065_v44, %v3065_v44  ;;  %v3068_v19 = vsub.f32 %v6295_v42, %v6347_v52  ;;  %v3098_v31 = vmul.f32 %v3066_v13, %v3066_v13 }
 0x242   : > { %v3114_v38 = vadd.f32 %v3113_v54, %v3083_v7  ;;  %v3069_v28 = vsub.f32 %v6293_v1, %v6347_v52  ;;  %v3099_v53 = vmul.f32 %v3067_v62, %v3067_v62  ;;  %v3070_v63 = vsub.f32 %v6305_v48, %v6347_v52 }
 0x243   : > { %v3100_v7 = vmul.f32 %v3068_v19, %v3068_v19  ;;  %v3071_v59 = vsub.f32 %v6303_v2, %v6347_v52  ;;  %v3072_v42 = vsub.f32 %v6315_v47, %v6347_v52  ;;  %v3073_v1 = vsub.f32 %v6313_v25, %v6347_v52 }
 0x244   : > { %v3115_v51 = vadd.f32 %v3114_v38, %v3084_v58  ;;  %v3101_v22 = vmul.f32 %v3069_v28, %v3069_v28  ;;  %v3102_v38 = vmul.f32 %v3070_v63, %v3070_v63  ;;  %v3074_v48 = vsub.f32 %v6325_v15, %v6347_v52 }
 0x245   : > { %v3104_v16 = vmul.f32 %v3072_v42, %v3072_v42  ;;  %v3075_v2 = vsub.f32 %v6323_v0, %v6347_v52  ;;  %v3076_v47 = vsub.f32 %v6335_v60, %v6347_v52  ;;  %v3077_v25 = vsub.f32 %v6333_v56, %v6347_v52 }
 0x246   : > { %v3116_v49 = vadd.f32 %v3115_v51, %v3085_v11  ;;  %v3103_v11 = vmul.f32 %v3071_v59, %v3071_v59 }
 0x247   : > { %v3107_v26 = vmul.f32 %v3075_v2, %v3075_v2  ;;  %v3109_v34 = vmul.f32 %v3077_v25, %v3077_v25 }
 0x248   : > { %v3117_v40 = vadd.f32 %v3116_v49, %v3086_v18  ;;  %v3105_v49 = vmul.f32 %v3073_v1, %v3073_v1 }
 0x24a   : > { %v3118_v45 = vadd.f32 %v3117_v40, %v3087_v55  ;;  %v3106_v55 = vmul.f32 %v3074_v48, %v3074_v48 }
 0x24c   : > { %v3119_v50 = vadd.f32 %v3118_v45, %v3088_v27  ;;  %v3108_v45 = vmul.f32 %v3076_v47, %v3076_v47 }
 0x24e   : > { %v3120_v14 = vadd.f32 %v3119_v50, %v3089_v4 }
 0x250   : > { %v3121_v43 = vadd.f32 %v3120_v14, %v3090_v30 }
 0x252   : > { %v3122_v37 = vadd.f32 %v3121_v43, %v3091_v10 }
 0x254   : > { %v3123_v5 = vadd.f32 %v3122_v37, %v3092_v41 }
 0x256   : > { %v3124_v17 = vadd.f32 %v3123_v5, %v3093_v57 }
 0x258   : > { %v3125_v6 = vadd.f32 %v3124_v17, %v3094_v20 }
 0x25a   : > { %v3126_v23 = vadd.f32 %v3125_v6, %v3095_v3 }
 0x25c   : > { %v3127_v32 = vadd.f32 %v3126_v23, %v3096_v24 }
 0x25e   : > { %v3128_v8 = vadd.f32 %v3127_v32, %v3097_v29 }
 0x260   : > { %v3129_v46 = vadd.f32 %v3128_v8, %v3098_v31 }
 0x262   : > { %v3130_v54 = vadd.f32 %v3129_v46, %v3099_v53 }
 0x264   : > { %v3131_v58 = vadd.f32 %v3130_v54, %v3100_v7 }
 0x266   : > { %v3132_v39 = vadd.f32 %v3131_v58, %v3101_v22 }
 0x268   : > { %v3133_v51 = vadd.f32 %v3132_v39, %v3102_v38 }
 0x26a   : > { %v3134_v18 = vadd.f32 %v3133_v51, %v3103_v11 }
 0x26c   : > { %v3135_v35 = vadd.f32 %v3134_v18, %v3104_v16 }
 0x26e   : > { %v3136_v40 = vadd.f32 %v3135_v35, %v3105_v49 }
 0x270   : > { %v3137_v27 = vadd.f32 %v3136_v40, %v3106_v55 }
 0x272   : > { %v3138_v15 = vadd.f32 %v3137_v27, %v3107_v26 }
 0x274   : > { %v3139_v4 = vadd.f32 %v3138_v15, %v3108_v45 }
 0x276   : > { %v3140_v50 = vadd.f32 %v3139_v4, %v3109_v34 }
 0x278   : > { %v3141_v61 = vrot.slane %v3140_v50, 4 }
 0x27a   : > { %v3142_v0 = vadd.f32 %v3141_v61, %v3140_v50 }
 0x27c   : > { %v3143_v30 = vrot.slane %v3142_v0, 2 }
 0x27e   : > { %v3144_v14 = vadd.f32 %v3143_v30, %v3142_v0 }
 0x280   : > { %v3145_v33 = vrot.slane %v3144_v14, 1 }
 0x282   : > { %v3146_v60 = vadd.f32 %v3145_v33, %v3144_v14 }
 0x284   : > { %v3148_v56 = vsel %vm3147_vm0, %v6344_v21, %v3146_v60 }
 0x285   : > { %3149 = vst [vmem:[%s181_s26] sm:$0x3] %v3148_v56 }
 0x286 PF: > { %s14_s12 = sadd.s32 1, %s5114_s12  }
 0x287   : > { %p11_p4 = scmp.ge.s32.totalorder %s14_s12, 4  }
 0x289   :  { %13 = sbr.rel (!%p11_p4) target bundleno = 1 (0x1), region = 81 }

</bundles_post_ra>
